<compile_context>
chip_gen: v6e
topology: v6e:2x2x1
jax: 0.10.0
libtpu: 0.0.40
codegen_flags: <defaults>
</compile_context>

<pallas_src>
import functools

import jax
import jax.numpy as jnp
from jax.experimental import pallas as pl
from jax.experimental.pallas import tpu as pltpu

# --- small synthetic SigLIP-like config (tiles are (8,128)/MXU friendly) ---
EMBED_DIM = 128
NUM_HEADS = 4
HEAD_DIM = EMBED_DIM // NUM_HEADS
INTERMEDIATE = 256
NUM_LAYERS = 2
BSZ = 2
SEQLEN = 16
EPS = 1e-6


def _detect_int8_mxu():
    """v5e/v6e MXUs have a native int8 path (~2x bf16 rate); v7x does not."""
    try:
        kind = jax.devices()[0].device_kind.lower()
    except Exception:
        return False
    return ("v5" in kind) or ("v6" in kind)


def _detect_vmem_limit():
    """Per-generation VMEM budget (~48 MiB on v7x, ~96 MiB on v5e/v6e)."""
    try:
        cap = int(pltpu.get_tpu_info().vmem_capacity_bytes)
    except Exception:
        cap = 64 * 1024 * 1024
    return min(int(cap * 3 // 4), 100 * 1024 * 1024)


INT8_MXU = _detect_int8_mxu()
VMEM_LIMIT = _detect_vmem_limit()


# ----------------------------------------------------------------------------
# in-kernel helpers (traced)
# ----------------------------------------------------------------------------
def _gelu_tanh(x):
    # SigLIP uses gelu_pytorch_tanh
    c = 0.7978845608028654  # sqrt(2/pi)
    return 0.5 * x * (1.0 + jnp.tanh(c * (x + 0.044715 * x * x * x)))


def _quant_inreg(y, int8_path):
    """Dynamic symmetric per-token int8 quant kept in registers.

    Returns (q, scale): q is int8 on the int8-MXU path, bf16 (exact for |x|<=127)
    otherwise; scale is (rows, 1) f32.  The per-row divide is replaced with an
    EUP reciprocal + multiply (frees VALU slots in the GEMM prologue).
    """
    amax = jnp.maximum(jnp.max(jnp.abs(y), axis=-1, keepdims=True), 1e-8)
    inv = 127.0 * pl.reciprocal(amax, approx=True)
    q = jnp.clip(jnp.round(y * inv), -127.0, 127.0)
    q = q.astype(jnp.int8 if int8_path else jnp.bfloat16)
    scale = amax * (1.0 / 127.0)
    return q, scale


def _w8a8_dot(q, act_scale, w_ref, ws_ref, b_ref, int8_path):
    """Quantized-activation x quantized-weight GEMM -> f32, dequant + bias."""
    if int8_path:
        # int8 x int8 -> int32 on the MXU integer path (v5e/v6e).
        acc = jax.lax.dot_general(q, w_ref[...], (((1,), (0,)), ((), ())),
                                  preferred_element_type=jnp.int32)
        out = acc.astype(jnp.float32) * (act_scale * ws_ref[...])
    else:
        # bf16 weights already carry the per-channel scale (folded at init).
        acc = jnp.dot(q, w_ref[...], preferred_element_type=jnp.float32)
        out = acc * act_scale
    return out + b_ref[...]


# ----------------------------------------------------------------------------
# Pallas kernels
# ----------------------------------------------------------------------------
def norm_quant_gemm_kernel(x_ref, lnw_ref, lnb_ref, w_ref, ws_ref, b_ref,
                           o_ref, *, eps, int8_path):
    """RMSNorm (w*x/rms + b) -> per-token int8 quant -> W8A8 GEMM -> dequant+bias."""
    x = x_ref[...].astype(jnp.float32)                       # (TM, Din)
    var = jnp.mean(x * x, axis=-1, keepdims=True)
    y = x * jax.lax.rsqrt(var + eps) * lnw_ref[...] + lnb_ref[...]
    q, scale = _quant_inreg(y, int8_path)
    o_ref[...] = _w8a8_dot(q, scale, w_ref, ws_ref, b_ref,
                           int8_path).astype(o_ref.dtype)


def act_quant_gemm_kernel(x_ref, w_ref, ws_ref, b_ref, r_ref, o_ref,
                          *, apply_gelu, int8_path):
    """(optional tanh-GELU) -> per-token quant -> W8A8 GEMM -> dequant+bias+residual."""
    x = x_ref[...].astype(jnp.float32)                       # (TM, Din)
    if apply_gelu:
        x = _gelu_tanh(x)
    q, scale = _quant_inreg(x, int8_path)
    out = _w8a8_dot(q, scale, w_ref, ws_ref, b_ref, int8_path)
    o_ref[...] = (out + r_ref[...].astype(jnp.float32)).astype(o_ref.dtype)


def attention_kernel(qkv_ref, o_ref, *, num_heads, head_dim, sm_scale):
    """Non-causal softmax attention; one batch element per grid step, all heads
    handled in-kernel; bf16 MXU operands, f32 accumulation."""
    qkv = qkv_ref[0]                                         # (S, 3*D) bf16
    d = num_heads * head_dim
    for h in range(num_heads):                               # static unrolled loop
        lo = h * head_dim
        q = qkv[:, lo:lo + head_dim]
        k = qkv[:, d + lo:d + lo + head_dim]
        v = qkv[:, 2 * d + lo:2 * d + lo + head_dim]
        s = jax.lax.dot_general(q, k, (((1,), (1,)), ((), ())),
                                preferred_element_type=jnp.float32) * sm_scale
        m = jnp.max(s, axis=-1, keepdims=True)
        p = jnp.exp(s - m)
        p = p * pl.reciprocal(jnp.sum(p, axis=-1, keepdims=True), approx=True)
        out_h = jnp.dot(p.astype(jnp.bfloat16), v,
                        preferred_element_type=jnp.float32)
        o_ref[0, :, lo:lo + head_dim] = out_h.astype(o_ref.dtype)


# ----------------------------------------------------------------------------
# wrappers (pallas_call plumbing)
# ----------------------------------------------------------------------------
def _token_tile(n):
    for tm in (512, 256, 128, 64, 32, 16, 8):
        if n % tm == 0:
            return tm
    return n


def _dout_tile(dout):
    if dout <= 1024:
        return dout
    for tn in (1024, 512, 256, 768, 384, 128):
        if dout % tn == 0:
            return tn
    return dout


def _cparams(n_axes):
    return pltpu.CompilerParams(dimension_semantics=("parallel",) * n_axes,
                                vmem_limit_bytes=VMEM_LIMIT)


def norm_quant_gemm(x, ln_w, ln_b, w, ws, bias, *, eps=EPS):
    n, din = x.shape
    dout = w.shape[1]
    tm, tn = _token_tile(n), _dout_tile(dout)
    kernel = functools.partial(norm_quant_gemm_kernel, eps=eps,
                               int8_path=INT8_MXU)
    return pl.pallas_call(
        kernel,
        grid=(n // tm, dout // tn),
        in_specs=[pl.BlockSpec((tm, din), lambda i, j: (i, 0)),
                  pl.BlockSpec((1, din), lambda i, j: (0, 0)),
                  pl.BlockSpec((1, din), lambda i, j: (0, 0)),
                  pl.BlockSpec((din, tn), lambda i, j: (0, j)),
                  pl.BlockSpec((1, tn), lambda i, j: (0, j)),
                  pl.BlockSpec((1, tn), lambda i, j: (0, j))],
        out_specs=pl.BlockSpec((tm, tn), lambda i, j: (i, j)),
        out_shape=jax.ShapeDtypeStruct((n, dout), jnp.bfloat16),
        compiler_params=_cparams(2),
    )(x, ln_w.reshape(1, din), ln_b.reshape(1, din), w,
      ws.reshape(1, dout), bias.reshape(1, dout))


def act_quant_gemm(x, w, ws, bias, residual, *, apply_gelu):
    n, din = x.shape
    dout = w.shape[1]
    tm, tn = _token_tile(n), _dout_tile(dout)
    kernel = functools.partial(act_quant_gemm_kernel, apply_gelu=apply_gelu,
                               int8_path=INT8_MXU)
    return pl.pallas_call(
        kernel,
        grid=(n // tm, dout // tn),
        in_specs=[pl.BlockSpec((tm, din), lambda i, j: (i, 0)),
                  pl.BlockSpec((din, tn), lambda i, j: (0, j)),
                  pl.BlockSpec((1, tn), lambda i, j: (0, j)),
                  pl.BlockSpec((1, tn), lambda i, j: (0, j)),
                  pl.BlockSpec((tm, tn), lambda i, j: (i, j))],
        out_specs=pl.BlockSpec((tm, tn), lambda i, j: (i, j)),
        out_shape=jax.ShapeDtypeStruct((n, dout), jnp.bfloat16),
        compiler_params=_cparams(2),
    )(x, w, ws.reshape(1, dout), bias.reshape(1, dout), residual)


def attention(qkv, bsz, seqlen):
    d = EMBED_DIM
    qkv3 = qkv.reshape(bsz, seqlen, 3 * d)   # pure reshape, no transpose
    kernel = functools.partial(attention_kernel, num_heads=NUM_HEADS,
                               head_dim=HEAD_DIM, sm_scale=HEAD_DIM ** -0.5)
    out = pl.pallas_call(
        kernel,
        grid=(bsz,),
        in_specs=[pl.BlockSpec((1, seqlen, 3 * d), lambda b: (b, 0, 0))],
        out_specs=pl.BlockSpec((1, seqlen, d), lambda b: (b, 0, 0)),
        out_shape=jax.ShapeDtypeStruct((bsz, seqlen, d), jnp.bfloat16),
        compiler_params=_cparams(1),
    )(qkv3)
    return out.reshape(bsz * seqlen, d)      # pure reshape, no transpose


# ----------------------------------------------------------------------------
# parameter setup (deterministic, synthetic) + encoder forward
# ----------------------------------------------------------------------------
def init_linear(key, dout, din):
    """Per-output-channel int8 weight quant; stored pre-transposed (din, dout).

    int8-MXU chips keep the int8 weight + per-channel scale; otherwise the scale
    is folded into a pre-dequantized bf16 weight (ws becomes unused ones)."""
    kw, kb = jax.random.split(key)
    w = jax.random.normal(kw, (dout, din), jnp.float32) * 0.02
    b = jax.random.normal(kb, (dout,), jnp.float32) * 0.01
    amax = jnp.max(jnp.abs(w), axis=1, keepdims=True)
    scale = jnp.maximum(amax, 1e-8) / 127.0
    wq = jnp.clip(jnp.round(w / scale), -127.0, 127.0)
    if INT8_MXU:
        w_store = wq.astype(jnp.int8).T                        # (din, dout) i8
        ws = scale[:, 0].astype(jnp.float32)                   # (dout,)
    else:
        w_store = (wq * scale).T.astype(jnp.bfloat16)          # (din, dout) bf16
        ws = jnp.ones((dout,), jnp.float32)                    # unused
    return w_store, ws, b


def init_layer(key):
    ks = jax.random.split(key, 8)
    p = {}
    p["ln1_w"] = 1.0 + 0.01 * jax.random.normal(ks[0], (EMBED_DIM,), jnp.float32)
    p["ln1_b"] = 0.01 * jax.random.normal(ks[1], (EMBED_DIM,), jnp.float32)
    p["qkv_w"], p["qkv_ws"], p["qkv_b"] = init_linear(ks[2], 3 * EMBED_DIM, EMBED_DIM)
    p["out_w"], p["out_ws"], p["out_b"] = init_linear(ks[3], EMBED_DIM, EMBED_DIM)
    p["ln2_w"] = 1.0 + 0.01 * jax.random.normal(ks[4], (EMBED_DIM,), jnp.float32)
    p["ln2_b"] = 0.01 * jax.random.normal(ks[5], (EMBED_DIM,), jnp.float32)
    p["fc1_w"], p["fc1_ws"], p["fc1_b"] = init_linear(ks[6], INTERMEDIATE, EMBED_DIM)
    p["fc2_w"], p["fc2_ws"], p["fc2_b"] = init_linear(ks[7], EMBED_DIM, INTERMEDIATE)
    return p


def encoder_forward(inputs_embeds, layers):
    bsz, seqlen, d = inputs_embeds.shape
    # bf16 residual stream (reference keeps activations in fp16)
    h = inputs_embeds.reshape(bsz * seqlen, d).astype(jnp.bfloat16)
    for p in layers:
        # --- self-attention block ---
        residual = h
        qkv = norm_quant_gemm(h, p["ln1_w"], p["ln1_b"],
                              p["qkv_w"], p["qkv_ws"], p["qkv_b"])
        attn = attention(qkv, bsz, seqlen)
        h = act_quant_gemm(attn, p["out_w"], p["out_ws"], p["out_b"],
                           residual, apply_gelu=False)
        # --- MLP block ---
        residual = h
        f1 = norm_quant_gemm(h, p["ln2_w"], p["ln2_b"],
                             p["fc1_w"], p["fc1_ws"], p["fc1_b"])
        h = act_quant_gemm(f1, p["fc2_w"], p["fc2_ws"], p["fc2_b"],
                           residual, apply_gelu=True)
    return h.reshape(bsz, seqlen, d)


if __name__ == "__main__":
    key = jax.random.PRNGKey(0)
    k_in, k_layers = jax.random.split(key)
    inputs_embeds = jax.random.normal(k_in, (BSZ, SEQLEN, EMBED_DIM), jnp.float32)
    layer_keys = jax.random.split(k_layers, NUM_LAYERS)
    layers = [init_layer(k) for k in layer_keys]

    out = jax.jit(encoder_forward)(inputs_embeds, layers)
    out = jax.block_until_ready(out)
    assert out.shape == (BSZ, SEQLEN, EMBED_DIM)
    assert bool(jnp.all(jnp.isfinite(out.astype(jnp.float32))))
    print("KERNEL_OK")
</pallas_src>

<mosaic_0001>
module attributes {stable_mosaic.version = 11 : i64} {
  func.func @attention_kernel(%arg0: i32, %arg1: memref<1x16x384xbf16, #tpu.memory_space<vmem>>, %arg2: memref<1x16x128xbf16, #tpu.memory_space<vmem>>) attributes {dimension_semantics = [#tpu.dimension_semantics<parallel>], iteration_bounds = array<i64: 2>, scalar_prefetch = 0 : i64, scratch_operands = 0 : i64, tpu.core_type = #tpu.core_type<tc>, window_params = [{transform_indices = @transform_0, window_bounds = array<i64: 1, 16, 384>}, {transform_indices = @transform_1, window_bounds = array<i64: 1, 16, 128>}]} {
    %c0 = arith.constant 0 : index
    %c0_0 = arith.constant 0 : index
    %c0_1 = arith.constant 0 : index
    %0 = vector.load %arg1[%c0, %c0_0, %c0_1] : memref<1x16x384xbf16, #tpu.memory_space<vmem>>, vector<1x16x384xbf16>
    %1 = vector.shape_cast %0 : vector<1x16x384xbf16> to vector<16x384xbf16>
    %2 = vector.extract_strided_slice %1 {offsets = [0, 0], sizes = [16, 32], strides = [1, 1]} : vector<16x384xbf16> to vector<16x32xbf16>
    %3 = vector.extract_strided_slice %1 {offsets = [0, 128], sizes = [16, 32], strides = [1, 1]} : vector<16x384xbf16> to vector<16x32xbf16>
    %4 = vector.extract_strided_slice %1 {offsets = [0, 256], sizes = [16, 32], strides = [1, 1]} : vector<16x384xbf16> to vector<16x32xbf16>
    %cst = arith.constant dense<0.000000e+00> : vector<16x16xf32>
    %5 = tpu.matmul %2, %3, %cst {dimension_numbers = #tpu.dot_dimension_numbers<[1], [1], [0], [0], [0, 0, 1, 0], [], []>} : vector<16x32xbf16>, vector<16x32xbf16>, vector<16x16xf32> -> vector<16x16xf32>
    %cst_2 = arith.constant 0.176776692 : f32
    %6 = vector.broadcast %cst_2 : f32 to vector<16x16xf32>
    %7 = arith.mulf %5, %6 : vector<16x16xf32>
    %cst_3 = arith.constant dense<0xFF800000> : vector<16xf32>
    %8 = vector.multi_reduction <maximumf>, %7, %cst_3 [1] : vector<16x16xf32> to vector<16xf32>
    %9 = vector.shape_cast %8 : vector<16xf32> to vector<16x1xf32>
    %10 = vector.broadcast %9 : vector<16x1xf32> to vector<16x16xf32>
    %11 = arith.subf %7, %10 : vector<16x16xf32>
    %12 = math.exp %11 : vector<16x16xf32>
    %cst_4 = arith.constant dense<0.000000e+00> : vector<16xf32>
    %13 = vector.multi_reduction <add>, %12, %cst_4 [1] : vector<16x16xf32> to vector<16xf32>
    %14 = vector.shape_cast %13 : vector<16xf32> to vector<16x1xf32>
    %15 = tpu.reciprocal %14 {approx = true} : vector<16x1xf32> -> vector<16x1xf32>
    %16 = vector.broadcast %15 : vector<16x1xf32> to vector<16x16xf32>
    %17 = arith.mulf %12, %16 : vector<16x16xf32>
    %18 = arith.truncf %17 : vector<16x16xf32> to vector<16x16xbf16>
    %cst_5 = arith.constant dense<0.000000e+00> : vector<16x32xf32>
    %19 = tpu.matmul %18, %4, %cst_5 {dimension_numbers = #tpu.dot_dimension_numbers<[1], [0], [0], [1], [0, 0, 1, 1], [], []>} : vector<16x16xbf16>, vector<16x32xbf16>, vector<16x32xf32> -> vector<16x32xf32>
    %20 = arith.truncf %19 : vector<16x32xf32> to vector<16x32xbf16>
    %c0_6 = arith.constant 0 : index
    %c0_7 = arith.constant 0 : index
    %c0_8 = arith.constant 0 : index
    %21 = vector.load %arg2[%c0_6, %c0_7, %c0_8] : memref<1x16x128xbf16, #tpu.memory_space<vmem>>, vector<1x16x32xbf16>
    %22 = vector.shape_cast %21 : vector<1x16x32xbf16> to vector<16x32xbf16>
    %23 = vector.shape_cast %20 : vector<16x32xbf16> to vector<1x16x32xbf16>
    tpu.vector_store %arg2[%c0_6, %c0_7, %c0_8], %23 {strides = array<i32>} : memref<1x16x128xbf16, #tpu.memory_space<vmem>>, vector<1x16x32xbf16>,
    %24 = vector.extract_strided_slice %1 {offsets = [0, 32], sizes = [16, 32], strides = [1, 1]} : vector<16x384xbf16> to vector<16x32xbf16>
    %25 = vector.extract_strided_slice %1 {offsets = [0, 160], sizes = [16, 32], strides = [1, 1]} : vector<16x384xbf16> to vector<16x32xbf16>
    %26 = vector.extract_strided_slice %1 {offsets = [0, 288], sizes = [16, 32], strides = [1, 1]} : vector<16x384xbf16> to vector<16x32xbf16>
    %cst_9 = arith.constant dense<0.000000e+00> : vector<16x16xf32>
    %27 = tpu.matmul %24, %25, %cst_9 {dimension_numbers = #tpu.dot_dimension_numbers<[1], [1], [0], [0], [0, 0, 1, 0], [], []>} : vector<16x32xbf16>, vector<16x32xbf16>, vector<16x16xf32> -> vector<16x16xf32>
    %cst_10 = arith.constant 0.176776692 : f32
    %28 = vector.broadcast %cst_10 : f32 to vector<16x16xf32>
    %29 = arith.mulf %27, %28 : vector<16x16xf32>
    %cst_11 = arith.constant dense<0xFF800000> : vector<16xf32>
    %30 = vector.multi_reduction <maximumf>, %29, %cst_11 [1] : vector<16x16xf32> to vector<16xf32>
    %31 = vector.shape_cast %30 : vector<16xf32> to vector<16x1xf32>
    %32 = vector.broadcast %31 : vector<16x1xf32> to vector<16x16xf32>
    %33 = arith.subf %29, %32 : vector<16x16xf32>
    %34 = math.exp %33 : vector<16x16xf32>
    %cst_12 = arith.constant dense<0.000000e+00> : vector<16xf32>
    %35 = vector.multi_reduction <add>, %34, %cst_12 [1] : vector<16x16xf32> to vector<16xf32>
    %36 = vector.shape_cast %35 : vector<16xf32> to vector<16x1xf32>
    %37 = tpu.reciprocal %36 {approx = true} : vector<16x1xf32> -> vector<16x1xf32>
    %38 = vector.broadcast %37 : vector<16x1xf32> to vector<16x16xf32>
    %39 = arith.mulf %34, %38 : vector<16x16xf32>
    %40 = arith.truncf %39 : vector<16x16xf32> to vector<16x16xbf16>
    %cst_13 = arith.constant dense<0.000000e+00> : vector<16x32xf32>
    %41 = tpu.matmul %40, %26, %cst_13 {dimension_numbers = #tpu.dot_dimension_numbers<[1], [0], [0], [1], [0, 0, 1, 1], [], []>} : vector<16x16xbf16>, vector<16x32xbf16>, vector<16x32xf32> -> vector<16x32xf32>
    %42 = arith.truncf %41 : vector<16x32xf32> to vector<16x32xbf16>
    %c0_14 = arith.constant 0 : index
    %c0_15 = arith.constant 0 : index
    %c32 = arith.constant 32 : index
    %43 = vector.load %arg2[%c0_14, %c0_15, %c32] : memref<1x16x128xbf16, #tpu.memory_space<vmem>>, vector<1x16x32xbf16>
    %44 = vector.shape_cast %43 : vector<1x16x32xbf16> to vector<16x32xbf16>
    %45 = vector.shape_cast %42 : vector<16x32xbf16> to vector<1x16x32xbf16>
    tpu.vector_store %arg2[%c0_14, %c0_15, %c32], %45 {strides = array<i32>} : memref<1x16x128xbf16, #tpu.memory_space<vmem>>, vector<1x16x32xbf16>,
    %46 = vector.extract_strided_slice %1 {offsets = [0, 64], sizes = [16, 32], strides = [1, 1]} : vector<16x384xbf16> to vector<16x32xbf16>
    %47 = vector.extract_strided_slice %1 {offsets = [0, 192], sizes = [16, 32], strides = [1, 1]} : vector<16x384xbf16> to vector<16x32xbf16>
    %48 = vector.extract_strided_slice %1 {offsets = [0, 320], sizes = [16, 32], strides = [1, 1]} : vector<16x384xbf16> to vector<16x32xbf16>
    %cst_16 = arith.constant dense<0.000000e+00> : vector<16x16xf32>
    %49 = tpu.matmul %46, %47, %cst_16 {dimension_numbers = #tpu.dot_dimension_numbers<[1], [1], [0], [0], [0, 0, 1, 0], [], []>} : vector<16x32xbf16>, vector<16x32xbf16>, vector<16x16xf32> -> vector<16x16xf32>
    %cst_17 = arith.constant 0.176776692 : f32
    %50 = vector.broadcast %cst_17 : f32 to vector<16x16xf32>
    %51 = arith.mulf %49, %50 : vector<16x16xf32>
    %cst_18 = arith.constant dense<0xFF800000> : vector<16xf32>
    %52 = vector.multi_reduction <maximumf>, %51, %cst_18 [1] : vector<16x16xf32> to vector<16xf32>
    %53 = vector.shape_cast %52 : vector<16xf32> to vector<16x1xf32>
    %54 = vector.broadcast %53 : vector<16x1xf32> to vector<16x16xf32>
    %55 = arith.subf %51, %54 : vector<16x16xf32>
    %56 = math.exp %55 : vector<16x16xf32>
    %cst_19 = arith.constant dense<0.000000e+00> : vector<16xf32>
    %57 = vector.multi_reduction <add>, %56, %cst_19 [1] : vector<16x16xf32> to vector<16xf32>
    %58 = vector.shape_cast %57 : vector<16xf32> to vector<16x1xf32>
    %59 = tpu.reciprocal %58 {approx = true} : vector<16x1xf32> -> vector<16x1xf32>
    %60 = vector.broadcast %59 : vector<16x1xf32> to vector<16x16xf32>
    %61 = arith.mulf %56, %60 : vector<16x16xf32>
    %62 = arith.truncf %61 : vector<16x16xf32> to vector<16x16xbf16>
    %cst_20 = arith.constant dense<0.000000e+00> : vector<16x32xf32>
    %63 = tpu.matmul %62, %48, %cst_20 {dimension_numbers = #tpu.dot_dimension_numbers<[1], [0], [0], [1], [0, 0, 1, 1], [], []>} : vector<16x16xbf16>, vector<16x32xbf16>, vector<16x32xf32> -> vector<16x32xf32>
    %64 = arith.truncf %63 : vector<16x32xf32> to vector<16x32xbf16>
    %c0_21 = arith.constant 0 : index
    %c0_22 = arith.constant 0 : index
    %c64 = arith.constant 64 : index
    %65 = vector.load %arg2[%c0_21, %c0_22, %c64] : memref<1x16x128xbf16, #tpu.memory_space<vmem>>, vector<1x16x32xbf16>
    %66 = vector.shape_cast %65 : vector<1x16x32xbf16> to vector<16x32xbf16>
    %67 = vector.shape_cast %64 : vector<16x32xbf16> to vector<1x16x32xbf16>
    tpu.vector_store %arg2[%c0_21, %c0_22, %c64], %67 {strides = array<i32>} : memref<1x16x128xbf16, #tpu.memory_space<vmem>>, vector<1x16x32xbf16>,
    %68 = vector.extract_strided_slice %1 {offsets = [0, 96], sizes = [16, 32], strides = [1, 1]} : vector<16x384xbf16> to vector<16x32xbf16>
    %69 = vector.extract_strided_slice %1 {offsets = [0, 224], sizes = [16, 32], strides = [1, 1]} : vector<16x384xbf16> to vector<16x32xbf16>
    %70 = vector.extract_strided_slice %1 {offsets = [0, 352], sizes = [16, 32], strides = [1, 1]} : vector<16x384xbf16> to vector<16x32xbf16>
    %cst_23 = arith.constant dense<0.000000e+00> : vector<16x16xf32>
    %71 = tpu.matmul %68, %69, %cst_23 {dimension_numbers = #tpu.dot_dimension_numbers<[1], [1], [0], [0], [0, 0, 1, 0], [], []>} : vector<16x32xbf16>, vector<16x32xbf16>, vector<16x16xf32> -> vector<16x16xf32>
    %cst_24 = arith.constant 0.176776692 : f32
    %72 = vector.broadcast %cst_24 : f32 to vector<16x16xf32>
    %73 = arith.mulf %71, %72 : vector<16x16xf32>
    %cst_25 = arith.constant dense<0xFF800000> : vector<16xf32>
    %74 = vector.multi_reduction <maximumf>, %73, %cst_25 [1] : vector<16x16xf32> to vector<16xf32>
    %75 = vector.shape_cast %74 : vector<16xf32> to vector<16x1xf32>
    %76 = vector.broadcast %75 : vector<16x1xf32> to vector<16x16xf32>
    %77 = arith.subf %73, %76 : vector<16x16xf32>
    %78 = math.exp %77 : vector<16x16xf32>
    %cst_26 = arith.constant dense<0.000000e+00> : vector<16xf32>
    %79 = vector.multi_reduction <add>, %78, %cst_26 [1] : vector<16x16xf32> to vector<16xf32>
    %80 = vector.shape_cast %79 : vector<16xf32> to vector<16x1xf32>
    %81 = tpu.reciprocal %80 {approx = true} : vector<16x1xf32> -> vector<16x1xf32>
    %82 = vector.broadcast %81 : vector<16x1xf32> to vector<16x16xf32>
    %83 = arith.mulf %78, %82 : vector<16x16xf32>
    %84 = arith.truncf %83 : vector<16x16xf32> to vector<16x16xbf16>
    %cst_27 = arith.constant dense<0.000000e+00> : vector<16x32xf32>
    %85 = tpu.matmul %84, %70, %cst_27 {dimension_numbers = #tpu.dot_dimension_numbers<[1], [0], [0], [1], [0, 0, 1, 1], [], []>} : vector<16x16xbf16>, vector<16x32xbf16>, vector<16x32xf32> -> vector<16x32xf32>
    %86 = arith.truncf %85 : vector<16x32xf32> to vector<16x32xbf16>
    %c0_28 = arith.constant 0 : index
    %c0_29 = arith.constant 0 : index
    %c96 = arith.constant 96 : index
    %87 = vector.load %arg2[%c0_28, %c0_29, %c96] : memref<1x16x128xbf16, #tpu.memory_space<vmem>>, vector<1x16x32xbf16>
    %88 = vector.shape_cast %87 : vector<1x16x32xbf16> to vector<16x32xbf16>
    %89 = vector.shape_cast %86 : vector<16x32xbf16> to vector<1x16x32xbf16>
    tpu.vector_store %arg2[%c0_28, %c0_29, %c96], %89 {strides = array<i32>} : memref<1x16x128xbf16, #tpu.memory_space<vmem>>, vector<1x16x32xbf16>,
    return
  }
  func.func @transform_0(%arg0: i32) -> (i32, i32, i32) {
    %c0_i32 = arith.constant 0 : i32
    %c0_i32_0 = arith.constant 0 : i32
    %c0_i32_1 = arith.constant 0 : i32
    return %arg0, %c0_i32, %c0_i32_0 : i32, i32, i32
  }
  func.func @transform_1(%arg0: i32) -> (i32, i32, i32) {
    %c0_i32 = arith.constant 0 : i32
    %c0_i32_0 = arith.constant 0 : i32
    %c0_i32_1 = arith.constant 0 : i32
    return %arg0, %c0_i32, %c0_i32_0 : i32, i32, i32
  }
}

module attributes {stable_mosaic.version = 11 : i64} {
  func.func @norm_quant_gemm_kernel(%arg0: i32, %arg1: i32, %arg2: memref<32x128xbf16, #tpu.memory_space<vmem>>, %arg3: memref<1x128xf32, #tpu.memory_space<vmem>>, %arg4: memref<1x128xf32, #tpu.memory_space<vmem>>, %arg5: memref<128x384xbf16, #tpu.memory_space<vmem>>, %arg6: memref<1x384xf32, #tpu.memory_space<vmem>>, %arg7: memref<1x384xf32, #tpu.memory_space<vmem>>, %arg8: memref<32x384xbf16, #tpu.memory_space<vmem>>) attributes {dimension_semantics = [#tpu.dimension_semantics<parallel>, #tpu.dimension_semantics<parallel>], iteration_bounds = array<i64: 1, 1>, scalar_prefetch = 0 : i64, scratch_operands = 0 : i64, tpu.core_type = #tpu.core_type<tc>, window_params = [{transform_indices = @transform_0, window_bounds = array<i64: 32, 128>}, {pipeline_mode = #tpu.pipeline_mode<synchronous>, transform_indices = @transform_1, window_bounds = array<i64: 1, 128>}, {pipeline_mode = #tpu.pipeline_mode<synchronous>, transform_indices = @transform_2, window_bounds = array<i64: 1, 128>}, {transform_indices = @transform_3, window_bounds = array<i64: 128, 384>}, {transform_indices = @transform_4, window_bounds = array<i64: 1, 384>}, {transform_indices = @transform_5, window_bounds = array<i64: 1, 384>}, {transform_indices = @transform_6, window_bounds = array<i64: 32, 384>}]} {
    %c0 = arith.constant 0 : index
    %c0_0 = arith.constant 0 : index
    %0 = vector.load %arg2[%c0, %c0_0] : memref<32x128xbf16, #tpu.memory_space<vmem>>, vector<32x128xbf16>
    %1 = arith.extf %0 : vector<32x128xbf16> to vector<32x128xf32>
    %2 = arith.mulf %1, %1 : vector<32x128xf32>
    %cst = arith.constant dense<0.000000e+00> : vector<32xf32>
    %3 = vector.multi_reduction <add>, %2, %cst [1] : vector<32x128xf32> to vector<32xf32>
    %4 = vector.shape_cast %3 : vector<32xf32> to vector<32x1xf32>
    %cst_1 = arith.constant 1.280000e+02 : f32
    %5 = vector.broadcast %cst_1 : f32 to vector<32x1xf32>
    %6 = arith.divf %4, %5 : vector<32x1xf32>
    %cst_2 = arith.constant 9.99999997E-7 : f32
    %7 = vector.broadcast %cst_2 : f32 to vector<32x1xf32>
    %8 = arith.addf %6, %7 : vector<32x1xf32>
    %9 = math.rsqrt %8 : vector<32x1xf32>
    %10 = vector.broadcast %9 : vector<32x1xf32> to vector<32x128xf32>
    %11 = arith.mulf %1, %10 : vector<32x128xf32>
    %c0_3 = arith.constant 0 : index
    %c0_4 = arith.constant 0 : index
    %12 = vector.load %arg3[%c0_3, %c0_4] : memref<1x128xf32, #tpu.memory_space<vmem>>, vector<1x128xf32>
    %13 = vector.broadcast %12 : vector<1x128xf32> to vector<32x128xf32>
    %14 = arith.mulf %11, %13 : vector<32x128xf32>
    %c0_5 = arith.constant 0 : index
    %c0_6 = arith.constant 0 : index
    %15 = vector.load %arg4[%c0_5, %c0_6] : memref<1x128xf32, #tpu.memory_space<vmem>>, vector<1x128xf32>
    %16 = vector.broadcast %15 : vector<1x128xf32> to vector<32x128xf32>
    %17 = arith.addf %14, %16 : vector<32x128xf32>
    %18 = math.absf %17 : vector<32x128xf32>
    %cst_7 = arith.constant dense<0xFF800000> : vector<32xf32>
    %19 = vector.multi_reduction <maximumf>, %18, %cst_7 [1] : vector<32x128xf32> to vector<32xf32>
    %20 = vector.shape_cast %19 : vector<32xf32> to vector<32x1xf32>
    %cst_8 = arith.constant 9.99999993E-9 : f32
    %21 = vector.broadcast %cst_8 : f32 to vector<32x1xf32>
    %22 = arith.maximumf %20, %21 : vector<32x1xf32>
    %23 = tpu.reciprocal %22 {approx = true} : vector<32x1xf32> -> vector<32x1xf32>
    %cst_9 = arith.constant 1.270000e+02 : f32
    %24 = vector.broadcast %cst_9 : f32 to vector<32x1xf32>
    %25 = arith.mulf %24, %23 : vector<32x1xf32>
    %26 = vector.broadcast %25 : vector<32x1xf32> to vector<32x128xf32>
    %27 = arith.mulf %17, %26 : vector<32x128xf32>
    %28 = math.roundeven %27 : vector<32x128xf32>
    %cst_10 = arith.constant -1.270000e+02 : f32
    %cst_11 = arith.constant 1.270000e+02 : f32
    %29 = vector.broadcast %cst_10 : f32 to vector<32x128xf32>
    %30 = arith.maximumf %29, %28 : vector<32x128xf32>
    %31 = vector.broadcast %cst_11 : f32 to vector<32x128xf32>
    %32 = arith.minimumf %31, %30 : vector<32x128xf32>
    %33 = arith.truncf %32 : vector<32x128xf32> to vector<32x128xbf16>
    %cst_12 = arith.constant 0.00787401571 : f32
    %34 = vector.broadcast %cst_12 : f32 to vector<32x1xf32>
    %35 = arith.mulf %22, %34 : vector<32x1xf32>
    %c0_13 = arith.constant 0 : index
    %c0_14 = arith.constant 0 : index
    %36 = vector.load %arg5[%c0_13, %c0_14] : memref<128x384xbf16, #tpu.memory_space<vmem>>, vector<128x384xbf16>
    %cst_15 = arith.constant dense<0.000000e+00> : vector<32x384xf32>
    %37 = tpu.matmul %33, %36, %cst_15 {dimension_numbers = #tpu.dot_dimension_numbers<[1], [0], [0], [1], [0, 0, 1, 1], [], []>} : vector<32x128xbf16>, vector<128x384xbf16>, vector<32x384xf32> -> vector<32x384xf32>
    %38 = vector.broadcast %35 : vector<32x1xf32> to vector<32x384xf32>
    %39 = arith.mulf %37, %38 : vector<32x384xf32>
    %c0_16 = arith.constant 0 : index
    %c0_17 = arith.constant 0 : index
    %40 = vector.load %arg7[%c0_16, %c0_17] : memref<1x384xf32, #tpu.memory_space<vmem>>, vector<1x384xf32>
    %41 = vector.broadcast %40 : vector<1x384xf32> to vector<32x384xf32>
    %42 = arith.addf %39, %41 : vector<32x384xf32>
    %43 = arith.truncf %42 : vector<32x384xf32> to vector<32x384xbf16>
    %c0_18 = arith.constant 0 : index
    %c0_19 = arith.constant 0 : index
    %44 = vector.load %arg8[%c0_18, %c0_19] : memref<32x384xbf16, #tpu.memory_space<vmem>>, vector<32x384xbf16>
    tpu.vector_store %arg8[%c0_18, %c0_19], %43 {strides = array<i32>} : memref<32x384xbf16, #tpu.memory_space<vmem>>, vector<32x384xbf16>,
    return
  }
  func.func @transform_0(%arg0: i32, %arg1: i32) -> (i32, i32) {
    %c0_i32 = arith.constant 0 : i32
    %c0_i32_0 = arith.constant 0 : i32
    return %arg0, %c0_i32 : i32, i32
  }
  func.func @transform_1(%arg0: i32, %arg1: i32) -> (i32, i32) {
    %c0_i32 = arith.constant 0 : i32
    %c0_i32_0 = arith.constant 0 : i32
    %c0_i32_1 = arith.constant 0 : i32
    return %c0_i32, %c0_i32_0 : i32, i32
  }
  func.func @transform_2(%arg0: i32, %arg1: i32) -> (i32, i32) {
    %c0_i32 = arith.constant 0 : i32
    %c0_i32_0 = arith.constant 0 : i32
    %c0_i32_1 = arith.constant 0 : i32
    return %c0_i32, %c0_i32_0 : i32, i32
  }
  func.func @transform_3(%arg0: i32, %arg1: i32) -> (i32, i32) {
    %c0_i32 = arith.constant 0 : i32
    %c0_i32_0 = arith.constant 0 : i32
    return %c0_i32, %arg1 : i32, i32
  }
  func.func @transform_4(%arg0: i32, %arg1: i32) -> (i32, i32) {
    %c0_i32 = arith.constant 0 : i32
    %c0_i32_0 = arith.constant 0 : i32
    return %c0_i32, %arg1 : i32, i32
  }
  func.func @transform_5(%arg0: i32, %arg1: i32) -> (i32, i32) {
    %c0_i32 = arith.constant 0 : i32
    %c0_i32_0 = arith.constant 0 : i32
    return %c0_i32, %arg1 : i32, i32
  }
  func.func @transform_6(%arg0: i32, %arg1: i32) -> (i32, i32) {
    %c0_i32 = arith.constant 0 : i32
    return %arg0, %arg1 : i32, i32
  }
}

module attributes {stable_mosaic.version = 11 : i64} {
  func.func @act_quant_gemm_kernel(%arg0: i32, %arg1: i32, %arg2: memref<32x128xbf16, #tpu.memory_space<vmem>>, %arg3: memref<128x128xbf16, #tpu.memory_space<vmem>>, %arg4: memref<1x128xf32, #tpu.memory_space<vmem>>, %arg5: memref<1x128xf32, #tpu.memory_space<vmem>>, %arg6: memref<32x128xbf16, #tpu.memory_space<vmem>>, %arg7: memref<32x128xbf16, #tpu.memory_space<vmem>>) attributes {dimension_semantics = [#tpu.dimension_semantics<parallel>, #tpu.dimension_semantics<parallel>], iteration_bounds = array<i64: 1, 1>, scalar_prefetch = 0 : i64, scratch_operands = 0 : i64, tpu.core_type = #tpu.core_type<tc>, window_params = [{transform_indices = @transform_0, window_bounds = array<i64: 32, 128>}, {transform_indices = @transform_1, window_bounds = array<i64: 128, 128>}, {transform_indices = @transform_2, window_bounds = array<i64: 1, 128>}, {transform_indices = @transform_3, window_bounds = array<i64: 1, 128>}, {transform_indices = @transform_4, window_bounds = array<i64: 32, 128>}, {transform_indices = @transform_5, window_bounds = array<i64: 32, 128>}]} {
    %c0 = arith.constant 0 : index
    %c0_0 = arith.constant 0 : index
    %0 = vector.load %arg2[%c0, %c0_0] : memref<32x128xbf16, #tpu.memory_space<vmem>>, vector<32x128xbf16>
    %1 = arith.extf %0 : vector<32x128xbf16> to vector<32x128xf32>
    %2 = math.absf %1 : vector<32x128xf32>
    %cst = arith.constant dense<0xFF800000> : vector<32xf32>
    %3 = vector.multi_reduction <maximumf>, %2, %cst [1] : vector<32x128xf32> to vector<32xf32>
    %4 = vector.shape_cast %3 : vector<32xf32> to vector<32x1xf32>
    %cst_1 = arith.constant 9.99999993E-9 : f32
    %5 = vector.broadcast %cst_1 : f32 to vector<32x1xf32>
    %6 = arith.maximumf %4, %5 : vector<32x1xf32>
    %7 = tpu.reciprocal %6 {approx = true} : vector<32x1xf32> -> vector<32x1xf32>
    %cst_2 = arith.constant 1.270000e+02 : f32
    %8 = vector.broadcast %cst_2 : f32 to vector<32x1xf32>
    %9 = arith.mulf %8, %7 : vector<32x1xf32>
    %10 = vector.broadcast %9 : vector<32x1xf32> to vector<32x128xf32>
    %11 = arith.mulf %1, %10 : vector<32x128xf32>
    %12 = math.roundeven %11 : vector<32x128xf32>
    %cst_3 = arith.constant -1.270000e+02 : f32
    %cst_4 = arith.constant 1.270000e+02 : f32
    %13 = vector.broadcast %cst_3 : f32 to vector<32x128xf32>
    %14 = arith.maximumf %13, %12 : vector<32x128xf32>
    %15 = vector.broadcast %cst_4 : f32 to vector<32x128xf32>
    %16 = arith.minimumf %15, %14 : vector<32x128xf32>
    %17 = arith.truncf %16 : vector<32x128xf32> to vector<32x128xbf16>
    %cst_5 = arith.constant 0.00787401571 : f32
    %18 = vector.broadcast %cst_5 : f32 to vector<32x1xf32>
    %19 = arith.mulf %6, %18 : vector<32x1xf32>
    %c0_6 = arith.constant 0 : index
    %c0_7 = arith.constant 0 : index
    %20 = vector.load %arg3[%c0_6, %c0_7] : memref<128x128xbf16, #tpu.memory_space<vmem>>, vector<128x128xbf16>
    %cst_8 = arith.constant dense<0.000000e+00> : vector<32x128xf32>
    %21 = tpu.matmul %17, %20, %cst_8 {dimension_numbers = #tpu.dot_dimension_numbers<[1], [0], [0], [1], [0, 0, 1, 1], [], []>} : vector<32x128xbf16>, vector<128x128xbf16>, vector<32x128xf32> -> vector<32x128xf32>
    %22 = vector.broadcast %19 : vector<32x1xf32> to vector<32x128xf32>
    %23 = arith.mulf %21, %22 : vector<32x128xf32>
    %c0_9 = arith.constant 0 : index
    %c0_10 = arith.constant 0 : index
    %24 = vector.load %arg5[%c0_9, %c0_10] : memref<1x128xf32, #tpu.memory_space<vmem>>, vector<1x128xf32>
    %25 = vector.broadcast %24 : vector<1x128xf32> to vector<32x128xf32>
    %26 = arith.addf %23, %25 : vector<32x128xf32>
    %c0_11 = arith.constant 0 : index
    %c0_12 = arith.constant 0 : index
    %27 = vector.load %arg6[%c0_11, %c0_12] : memref<32x128xbf16, #tpu.memory_space<vmem>>, vector<32x128xbf16>
    %28 = arith.extf %27 : vector<32x128xbf16> to vector<32x128xf32>
    %29 = arith.addf %26, %28 : vector<32x128xf32>
    %30 = arith.truncf %29 : vector<32x128xf32> to vector<32x128xbf16>
    %c0_13 = arith.constant 0 : index
    %c0_14 = arith.constant 0 : index
    %31 = vector.load %arg7[%c0_13, %c0_14] : memref<32x128xbf16, #tpu.memory_space<vmem>>, vector<32x128xbf16>
    tpu.vector_store %arg7[%c0_13, %c0_14], %30 {strides = array<i32>} : memref<32x128xbf16, #tpu.memory_space<vmem>>, vector<32x128xbf16>,
    return
  }
  func.func @transform_0(%arg0: i32, %arg1: i32) -> (i32, i32) {
    %c0_i32 = arith.constant 0 : i32
    %c0_i32_0 = arith.constant 0 : i32
    return %arg0, %c0_i32 : i32, i32
  }
  func.func @transform_1(%arg0: i32, %arg1: i32) -> (i32, i32) {
    %c0_i32 = arith.constant 0 : i32
    %c0_i32_0 = arith.constant 0 : i32
    return %c0_i32, %arg1 : i32, i32
  }
  func.func @transform_2(%arg0: i32, %arg1: i32) -> (i32, i32) {
    %c0_i32 = arith.constant 0 : i32
    %c0_i32_0 = arith.constant 0 : i32
    return %c0_i32, %arg1 : i32, i32
  }
  func.func @transform_3(%arg0: i32, %arg1: i32) -> (i32, i32) {
    %c0_i32 = arith.constant 0 : i32
    %c0_i32_0 = arith.constant 0 : i32
    return %c0_i32, %arg1 : i32, i32
  }
  func.func @transform_4(%arg0: i32, %arg1: i32) -> (i32, i32) {
    %c0_i32 = arith.constant 0 : i32
    return %arg0, %arg1 : i32, i32
  }
  func.func @transform_5(%arg0: i32, %arg1: i32) -> (i32, i32) {
    %c0_i32 = arith.constant 0 : i32
    return %arg0, %arg1 : i32, i32
  }
}

module attributes {stable_mosaic.version = 11 : i64} {
  func.func @norm_quant_gemm_kernel(%arg0: i32, %arg1: i32, %arg2: memref<32x128xbf16, #tpu.memory_space<vmem>>, %arg3: memref<1x128xf32, #tpu.memory_space<vmem>>, %arg4: memref<1x128xf32, #tpu.memory_space<vmem>>, %arg5: memref<128x256xbf16, #tpu.memory_space<vmem>>, %arg6: memref<1x256xf32, #tpu.memory_space<vmem>>, %arg7: memref<1x256xf32, #tpu.memory_space<vmem>>, %arg8: memref<32x256xbf16, #tpu.memory_space<vmem>>) attributes {dimension_semantics = [#tpu.dimension_semantics<parallel>, #tpu.dimension_semantics<parallel>], iteration_bounds = array<i64: 1, 1>, scalar_prefetch = 0 : i64, scratch_operands = 0 : i64, tpu.core_type = #tpu.core_type<tc>, window_params = [{transform_indices = @transform_0, window_bounds = array<i64: 32, 128>}, {pipeline_mode = #tpu.pipeline_mode<synchronous>, transform_indices = @transform_1, window_bounds = array<i64: 1, 128>}, {pipeline_mode = #tpu.pipeline_mode<synchronous>, transform_indices = @transform_2, window_bounds = array<i64: 1, 128>}, {transform_indices = @transform_3, window_bounds = array<i64: 128, 256>}, {transform_indices = @transform_4, window_bounds = array<i64: 1, 256>}, {transform_indices = @transform_5, window_bounds = array<i64: 1, 256>}, {transform_indices = @transform_6, window_bounds = array<i64: 32, 256>}]} {
    %c0 = arith.constant 0 : index
    %c0_0 = arith.constant 0 : index
    %0 = vector.load %arg2[%c0, %c0_0] : memref<32x128xbf16, #tpu.memory_space<vmem>>, vector<32x128xbf16>
    %1 = arith.extf %0 : vector<32x128xbf16> to vector<32x128xf32>
    %2 = arith.mulf %1, %1 : vector<32x128xf32>
    %cst = arith.constant dense<0.000000e+00> : vector<32xf32>
    %3 = vector.multi_reduction <add>, %2, %cst [1] : vector<32x128xf32> to vector<32xf32>
    %4 = vector.shape_cast %3 : vector<32xf32> to vector<32x1xf32>
    %cst_1 = arith.constant 1.280000e+02 : f32
    %5 = vector.broadcast %cst_1 : f32 to vector<32x1xf32>
    %6 = arith.divf %4, %5 : vector<32x1xf32>
    %cst_2 = arith.constant 9.99999997E-7 : f32
    %7 = vector.broadcast %cst_2 : f32 to vector<32x1xf32>
    %8 = arith.addf %6, %7 : vector<32x1xf32>
    %9 = math.rsqrt %8 : vector<32x1xf32>
    %10 = vector.broadcast %9 : vector<32x1xf32> to vector<32x128xf32>
    %11 = arith.mulf %1, %10 : vector<32x128xf32>
    %c0_3 = arith.constant 0 : index
    %c0_4 = arith.constant 0 : index
    %12 = vector.load %arg3[%c0_3, %c0_4] : memref<1x128xf32, #tpu.memory_space<vmem>>, vector<1x128xf32>
    %13 = vector.broadcast %12 : vector<1x128xf32> to vector<32x128xf32>
    %14 = arith.mulf %11, %13 : vector<32x128xf32>
    %c0_5 = arith.constant 0 : index
    %c0_6 = arith.constant 0 : index
    %15 = vector.load %arg4[%c0_5, %c0_6] : memref<1x128xf32, #tpu.memory_space<vmem>>, vector<1x128xf32>
    %16 = vector.broadcast %15 : vector<1x128xf32> to vector<32x128xf32>
    %17 = arith.addf %14, %16 : vector<32x128xf32>
    %18 = math.absf %17 : vector<32x128xf32>
    %cst_7 = arith.constant dense<0xFF800000> : vector<32xf32>
    %19 = vector.multi_reduction <maximumf>, %18, %cst_7 [1] : vector<32x128xf32> to vector<32xf32>
    %20 = vector.shape_cast %19 : vector<32xf32> to vector<32x1xf32>
    %cst_8 = arith.constant 9.99999993E-9 : f32
    %21 = vector.broadcast %cst_8 : f32 to vector<32x1xf32>
    %22 = arith.maximumf %20, %21 : vector<32x1xf32>
    %23 = tpu.reciprocal %22 {approx = true} : vector<32x1xf32> -> vector<32x1xf32>
    %cst_9 = arith.constant 1.270000e+02 : f32
    %24 = vector.broadcast %cst_9 : f32 to vector<32x1xf32>
    %25 = arith.mulf %24, %23 : vector<32x1xf32>
    %26 = vector.broadcast %25 : vector<32x1xf32> to vector<32x128xf32>
    %27 = arith.mulf %17, %26 : vector<32x128xf32>
    %28 = math.roundeven %27 : vector<32x128xf32>
    %cst_10 = arith.constant -1.270000e+02 : f32
    %cst_11 = arith.constant 1.270000e+02 : f32
    %29 = vector.broadcast %cst_10 : f32 to vector<32x128xf32>
    %30 = arith.maximumf %29, %28 : vector<32x128xf32>
    %31 = vector.broadcast %cst_11 : f32 to vector<32x128xf32>
    %32 = arith.minimumf %31, %30 : vector<32x128xf32>
    %33 = arith.truncf %32 : vector<32x128xf32> to vector<32x128xbf16>
    %cst_12 = arith.constant 0.00787401571 : f32
    %34 = vector.broadcast %cst_12 : f32 to vector<32x1xf32>
    %35 = arith.mulf %22, %34 : vector<32x1xf32>
    %c0_13 = arith.constant 0 : index
    %c0_14 = arith.constant 0 : index
    %36 = vector.load %arg5[%c0_13, %c0_14] : memref<128x256xbf16, #tpu.memory_space<vmem>>, vector<128x256xbf16>
    %cst_15 = arith.constant dense<0.000000e+00> : vector<32x256xf32>
    %37 = tpu.matmul %33, %36, %cst_15 {dimension_numbers = #tpu.dot_dimension_numbers<[1], [0], [0], [1], [0, 0, 1, 1], [], []>} : vector<32x128xbf16>, vector<128x256xbf16>, vector<32x256xf32> -> vector<32x256xf32>
    %38 = vector.broadcast %35 : vector<32x1xf32> to vector<32x256xf32>
    %39 = arith.mulf %37, %38 : vector<32x256xf32>
    %c0_16 = arith.constant 0 : index
    %c0_17 = arith.constant 0 : index
    %40 = vector.load %arg7[%c0_16, %c0_17] : memref<1x256xf32, #tpu.memory_space<vmem>>, vector<1x256xf32>
    %41 = vector.broadcast %40 : vector<1x256xf32> to vector<32x256xf32>
    %42 = arith.addf %39, %41 : vector<32x256xf32>
    %43 = arith.truncf %42 : vector<32x256xf32> to vector<32x256xbf16>
    %c0_18 = arith.constant 0 : index
    %c0_19 = arith.constant 0 : index
    %44 = vector.load %arg8[%c0_18, %c0_19] : memref<32x256xbf16, #tpu.memory_space<vmem>>, vector<32x256xbf16>
    tpu.vector_store %arg8[%c0_18, %c0_19], %43 {strides = array<i32>} : memref<32x256xbf16, #tpu.memory_space<vmem>>, vector<32x256xbf16>,
    return
  }
  func.func @transform_0(%arg0: i32, %arg1: i32) -> (i32, i32) {
    %c0_i32 = arith.constant 0 : i32
    %c0_i32_0 = arith.constant 0 : i32
    return %arg0, %c0_i32 : i32, i32
  }
  func.func @transform_1(%arg0: i32, %arg1: i32) -> (i32, i32) {
    %c0_i32 = arith.constant 0 : i32
    %c0_i32_0 = arith.constant 0 : i32
    %c0_i32_1 = arith.constant 0 : i32
    return %c0_i32, %c0_i32_0 : i32, i32
  }
  func.func @transform_2(%arg0: i32, %arg1: i32) -> (i32, i32) {
    %c0_i32 = arith.constant 0 : i32
    %c0_i32_0 = arith.constant 0 : i32
    %c0_i32_1 = arith.constant 0 : i32
    return %c0_i32, %c0_i32_0 : i32, i32
  }
  func.func @transform_3(%arg0: i32, %arg1: i32) -> (i32, i32) {
    %c0_i32 = arith.constant 0 : i32
    %c0_i32_0 = arith.constant 0 : i32
    return %c0_i32, %arg1 : i32, i32
  }
  func.func @transform_4(%arg0: i32, %arg1: i32) -> (i32, i32) {
    %c0_i32 = arith.constant 0 : i32
    %c0_i32_0 = arith.constant 0 : i32
    return %c0_i32, %arg1 : i32, i32
  }
  func.func @transform_5(%arg0: i32, %arg1: i32) -> (i32, i32) {
    %c0_i32 = arith.constant 0 : i32
    %c0_i32_0 = arith.constant 0 : i32
    return %c0_i32, %arg1 : i32, i32
  }
  func.func @transform_6(%arg0: i32, %arg1: i32) -> (i32, i32) {
    %c0_i32 = arith.constant 0 : i32
    return %arg0, %arg1 : i32, i32
  }
}

module attributes {stable_mosaic.version = 11 : i64} {
  func.func @act_quant_gemm_kernel(%arg0: i32, %arg1: i32, %arg2: memref<32x256xbf16, #tpu.memory_space<vmem>>, %arg3: memref<256x128xbf16, #tpu.memory_space<vmem>>, %arg4: memref<1x128xf32, #tpu.memory_space<vmem>>, %arg5: memref<1x128xf32, #tpu.memory_space<vmem>>, %arg6: memref<32x128xbf16, #tpu.memory_space<vmem>>, %arg7: memref<32x128xbf16, #tpu.memory_space<vmem>>) attributes {dimension_semantics = [#tpu.dimension_semantics<parallel>, #tpu.dimension_semantics<parallel>], iteration_bounds = array<i64: 1, 1>, scalar_prefetch = 0 : i64, scratch_operands = 0 : i64, tpu.core_type = #tpu.core_type<tc>, window_params = [{transform_indices = @transform_0, window_bounds = array<i64: 32, 256>}, {transform_indices = @transform_1, window_bounds = array<i64: 256, 128>}, {transform_indices = @transform_2, window_bounds = array<i64: 1, 128>}, {transform_indices = @transform_3, window_bounds = array<i64: 1, 128>}, {transform_indices = @transform_4, window_bounds = array<i64: 32, 128>}, {transform_indices = @transform_5, window_bounds = array<i64: 32, 128>}]} {
    %c0 = arith.constant 0 : index
    %c0_0 = arith.constant 0 : index
    %0 = vector.load %arg2[%c0, %c0_0] : memref<32x256xbf16, #tpu.memory_space<vmem>>, vector<32x256xbf16>
    %1 = arith.extf %0 : vector<32x256xbf16> to vector<32x256xf32>
    %cst = arith.constant 5.000000e-01 : f32
    %2 = vector.broadcast %cst : f32 to vector<32x256xf32>
    %3 = arith.mulf %2, %1 : vector<32x256xf32>
    %cst_1 = arith.constant 4.471500e-02 : f32
    %4 = vector.broadcast %cst_1 : f32 to vector<32x256xf32>
    %5 = arith.mulf %4, %1 : vector<32x256xf32>
    %6 = arith.mulf %5, %1 : vector<32x256xf32>
    %7 = arith.mulf %6, %1 : vector<32x256xf32>
    %8 = arith.addf %1, %7 : vector<32x256xf32>
    %cst_2 = arith.constant 0.797884583 : f32
    %9 = vector.broadcast %cst_2 : f32 to vector<32x256xf32>
    %10 = arith.mulf %9, %8 : vector<32x256xf32>
    %11 = math.tanh %10 : vector<32x256xf32>
    %cst_3 = arith.constant 1.000000e+00 : f32
    %12 = vector.broadcast %cst_3 : f32 to vector<32x256xf32>
    %13 = arith.addf %12, %11 : vector<32x256xf32>
    %14 = arith.mulf %3, %13 : vector<32x256xf32>
    %15 = math.absf %14 : vector<32x256xf32>
    %cst_4 = arith.constant dense<0xFF800000> : vector<32xf32>
    %16 = vector.multi_reduction <maximumf>, %15, %cst_4 [1] : vector<32x256xf32> to vector<32xf32>
    %17 = vector.shape_cast %16 : vector<32xf32> to vector<32x1xf32>
    %cst_5 = arith.constant 9.99999993E-9 : f32
    %18 = vector.broadcast %cst_5 : f32 to vector<32x1xf32>
    %19 = arith.maximumf %17, %18 : vector<32x1xf32>
    %20 = tpu.reciprocal %19 {approx = true} : vector<32x1xf32> -> vector<32x1xf32>
    %cst_6 = arith.constant 1.270000e+02 : f32
    %21 = vector.broadcast %cst_6 : f32 to vector<32x1xf32>
    %22 = arith.mulf %21, %20 : vector<32x1xf32>
    %23 = vector.broadcast %22 : vector<32x1xf32> to vector<32x256xf32>
    %24 = arith.mulf %14, %23 : vector<32x256xf32>
    %25 = math.roundeven %24 : vector<32x256xf32>
    %cst_7 = arith.constant -1.270000e+02 : f32
    %cst_8 = arith.constant 1.270000e+02 : f32
    %26 = vector.broadcast %cst_7 : f32 to vector<32x256xf32>
    %27 = arith.maximumf %26, %25 : vector<32x256xf32>
    %28 = vector.broadcast %cst_8 : f32 to vector<32x256xf32>
    %29 = arith.minimumf %28, %27 : vector<32x256xf32>
    %30 = arith.truncf %29 : vector<32x256xf32> to vector<32x256xbf16>
    %cst_9 = arith.constant 0.00787401571 : f32
    %31 = vector.broadcast %cst_9 : f32 to vector<32x1xf32>
    %32 = arith.mulf %19, %31 : vector<32x1xf32>
    %c0_10 = arith.constant 0 : index
    %c0_11 = arith.constant 0 : index
    %33 = vector.load %arg3[%c0_10, %c0_11] : memref<256x128xbf16, #tpu.memory_space<vmem>>, vector<256x128xbf16>
    %cst_12 = arith.constant dense<0.000000e+00> : vector<32x128xf32>
    %34 = tpu.matmul %30, %33, %cst_12 {dimension_numbers = #tpu.dot_dimension_numbers<[1], [0], [0], [1], [0, 0, 1, 1], [], []>} : vector<32x256xbf16>, vector<256x128xbf16>, vector<32x128xf32> -> vector<32x128xf32>
    %35 = vector.broadcast %32 : vector<32x1xf32> to vector<32x128xf32>
    %36 = arith.mulf %34, %35 : vector<32x128xf32>
    %c0_13 = arith.constant 0 : index
    %c0_14 = arith.constant 0 : index
    %37 = vector.load %arg5[%c0_13, %c0_14] : memref<1x128xf32, #tpu.memory_space<vmem>>, vector<1x128xf32>
    %38 = vector.broadcast %37 : vector<1x128xf32> to vector<32x128xf32>
    %39 = arith.addf %36, %38 : vector<32x128xf32>
    %c0_15 = arith.constant 0 : index
    %c0_16 = arith.constant 0 : index
    %40 = vector.load %arg6[%c0_15, %c0_16] : memref<32x128xbf16, #tpu.memory_space<vmem>>, vector<32x128xbf16>
    %41 = arith.extf %40 : vector<32x128xbf16> to vector<32x128xf32>
    %42 = arith.addf %39, %41 : vector<32x128xf32>
    %43 = arith.truncf %42 : vector<32x128xf32> to vector<32x128xbf16>
    %c0_17 = arith.constant 0 : index
    %c0_18 = arith.constant 0 : index
    %44 = vector.load %arg7[%c0_17, %c0_18] : memref<32x128xbf16, #tpu.memory_space<vmem>>, vector<32x128xbf16>
    tpu.vector_store %arg7[%c0_17, %c0_18], %43 {strides = array<i32>} : memref<32x128xbf16, #tpu.memory_space<vmem>>, vector<32x128xbf16>,
    return
  }
  func.func @transform_0(%arg0: i32, %arg1: i32) -> (i32, i32) {
    %c0_i32 = arith.constant 0 : i32
    %c0_i32_0 = arith.constant 0 : i32
    return %arg0, %c0_i32 : i32, i32
  }
  func.func @transform_1(%arg0: i32, %arg1: i32) -> (i32, i32) {
    %c0_i32 = arith.constant 0 : i32
    %c0_i32_0 = arith.constant 0 : i32
    return %c0_i32, %arg1 : i32, i32
  }
  func.func @transform_2(%arg0: i32, %arg1: i32) -> (i32, i32) {
    %c0_i32 = arith.constant 0 : i32
    %c0_i32_0 = arith.constant 0 : i32
    return %c0_i32, %arg1 : i32, i32
  }
  func.func @transform_3(%arg0: i32, %arg1: i32) -> (i32, i32) {
    %c0_i32 = arith.constant 0 : i32
    %c0_i32_0 = arith.constant 0 : i32
    return %c0_i32, %arg1 : i32, i32
  }
  func.func @transform_4(%arg0: i32, %arg1: i32) -> (i32, i32) {
    %c0_i32 = arith.constant 0 : i32
    return %arg0, %arg1 : i32, i32
  }
  func.func @transform_5(%arg0: i32, %arg1: i32) -> (i32, i32) {
    %c0_i32 = arith.constant 0 : i32
    return %arg0, %arg1 : i32, i32
  }
}

module attributes {stable_mosaic.version = 11 : i64} {
  func.func @norm_quant_gemm_kernel(%arg0: i32, %arg1: i32, %arg2: memref<32x128xbf16, #tpu.memory_space<vmem>>, %arg3: memref<1x128xf32, #tpu.memory_space<vmem>>, %arg4: memref<1x128xf32, #tpu.memory_space<vmem>>, %arg5: memref<128x384xbf16, #tpu.memory_space<vmem>>, %arg6: memref<1x384xf32, #tpu.memory_space<vmem>>, %arg7: memref<1x384xf32, #tpu.memory_space<vmem>>, %arg8: memref<32x384xbf16, #tpu.memory_space<vmem>>) attributes {dimension_semantics = [#tpu.dimension_semantics<parallel>, #tpu.dimension_semantics<parallel>], iteration_bounds = array<i64: 1, 1>, scalar_prefetch = 0 : i64, scratch_operands = 0 : i64, tpu.core_type = #tpu.core_type<tc>, window_params = [{transform_indices = @transform_0, window_bounds = array<i64: 32, 128>}, {pipeline_mode = #tpu.pipeline_mode<synchronous>, transform_indices = @transform_1, window_bounds = array<i64: 1, 128>}, {pipeline_mode = #tpu.pipeline_mode<synchronous>, transform_indices = @transform_2, window_bounds = array<i64: 1, 128>}, {transform_indices = @transform_3, window_bounds = array<i64: 128, 384>}, {transform_indices = @transform_4, window_bounds = array<i64: 1, 384>}, {transform_indices = @transform_5, window_bounds = array<i64: 1, 384>}, {transform_indices = @transform_6, window_bounds = array<i64: 32, 384>}]} {
    %c0 = arith.constant 0 : index
    %c0_0 = arith.constant 0 : index
    %0 = vector.load %arg2[%c0, %c0_0] : memref<32x128xbf16, #tpu.memory_space<vmem>>, vector<32x128xbf16>
    %1 = arith.extf %0 : vector<32x128xbf16> to vector<32x128xf32>
    %2 = arith.mulf %1, %1 : vector<32x128xf32>
    %cst = arith.constant dense<0.000000e+00> : vector<32xf32>
    %3 = vector.multi_reduction <add>, %2, %cst [1] : vector<32x128xf32> to vector<32xf32>
    %4 = vector.shape_cast %3 : vector<32xf32> to vector<32x1xf32>
    %cst_1 = arith.constant 1.280000e+02 : f32
    %5 = vector.broadcast %cst_1 : f32 to vector<32x1xf32>
    %6 = arith.divf %4, %5 : vector<32x1xf32>
    %cst_2 = arith.constant 9.99999997E-7 : f32
    %7 = vector.broadcast %cst_2 : f32 to vector<32x1xf32>
    %8 = arith.addf %6, %7 : vector<32x1xf32>
    %9 = math.rsqrt %8 : vector<32x1xf32>
    %10 = vector.broadcast %9 : vector<32x1xf32> to vector<32x128xf32>
    %11 = arith.mulf %1, %10 : vector<32x128xf32>
    %c0_3 = arith.constant 0 : index
    %c0_4 = arith.constant 0 : index
    %12 = vector.load %arg3[%c0_3, %c0_4] : memref<1x128xf32, #tpu.memory_space<vmem>>, vector<1x128xf32>
    %13 = vector.broadcast %12 : vector<1x128xf32> to vector<32x128xf32>
    %14 = arith.mulf %11, %13 : vector<32x128xf32>
    %c0_5 = arith.constant 0 : index
    %c0_6 = arith.constant 0 : index
    %15 = vector.load %arg4[%c0_5, %c0_6] : memref<1x128xf32, #tpu.memory_space<vmem>>, vector<1x128xf32>
    %16 = vector.broadcast %15 : vector<1x128xf32> to vector<32x128xf32>
    %17 = arith.addf %14, %16 : vector<32x128xf32>
    %18 = math.absf %17 : vector<32x128xf32>
    %cst_7 = arith.constant dense<0xFF800000> : vector<32xf32>
    %19 = vector.multi_reduction <maximumf>, %18, %cst_7 [1] : vector<32x128xf32> to vector<32xf32>
    %20 = vector.shape_cast %19 : vector<32xf32> to vector<32x1xf32>
    %cst_8 = arith.constant 9.99999993E-9 : f32
    %21 = vector.broadcast %cst_8 : f32 to vector<32x1xf32>
    %22 = arith.maximumf %20, %21 : vector<32x1xf32>
    %23 = tpu.reciprocal %22 {approx = true} : vector<32x1xf32> -> vector<32x1xf32>
    %cst_9 = arith.constant 1.270000e+02 : f32
    %24 = vector.broadcast %cst_9 : f32 to vector<32x1xf32>
    %25 = arith.mulf %24, %23 : vector<32x1xf32>
    %26 = vector.broadcast %25 : vector<32x1xf32> to vector<32x128xf32>
    %27 = arith.mulf %17, %26 : vector<32x128xf32>
    %28 = math.roundeven %27 : vector<32x128xf32>
    %cst_10 = arith.constant -1.270000e+02 : f32
    %cst_11 = arith.constant 1.270000e+02 : f32
    %29 = vector.broadcast %cst_10 : f32 to vector<32x128xf32>
    %30 = arith.maximumf %29, %28 : vector<32x128xf32>
    %31 = vector.broadcast %cst_11 : f32 to vector<32x128xf32>
    %32 = arith.minimumf %31, %30 : vector<32x128xf32>
    %33 = arith.truncf %32 : vector<32x128xf32> to vector<32x128xbf16>
    %cst_12 = arith.constant 0.00787401571 : f32
    %34 = vector.broadcast %cst_12 : f32 to vector<32x1xf32>
    %35 = arith.mulf %22, %34 : vector<32x1xf32>
    %c0_13 = arith.constant 0 : index
    %c0_14 = arith.constant 0 : index
    %36 = vector.load %arg5[%c0_13, %c0_14] : memref<128x384xbf16, #tpu.memory_space<vmem>>, vector<128x384xbf16>
    %cst_15 = arith.constant dense<0.000000e+00> : vector<32x384xf32>
    %37 = tpu.matmul %33, %36, %cst_15 {dimension_numbers = #tpu.dot_dimension_numbers<[1], [0], [0], [1], [0, 0, 1, 1], [], []>} : vector<32x128xbf16>, vector<128x384xbf16>, vector<32x384xf32> -> vector<32x384xf32>
    %38 = vector.broadcast %35 : vector<32x1xf32> to vector<32x384xf32>
    %39 = arith.mulf %37, %38 : vector<32x384xf32>
    %c0_16 = arith.constant 0 : index
    %c0_17 = arith.constant 0 : index
    %40 = vector.load %arg7[%c0_16, %c0_17] : memref<1x384xf32, #tpu.memory_space<vmem>>, vector<1x384xf32>
    %41 = vector.broadcast %40 : vector<1x384xf32> to vector<32x384xf32>
    %42 = arith.addf %39, %41 : vector<32x384xf32>
    %43 = arith.truncf %42 : vector<32x384xf32> to vector<32x384xbf16>
    %c0_18 = arith.constant 0 : index
    %c0_19 = arith.constant 0 : index
    %44 = vector.load %arg8[%c0_18, %c0_19] : memref<32x384xbf16, #tpu.memory_space<vmem>>, vector<32x384xbf16>
    tpu.vector_store %arg8[%c0_18, %c0_19], %43 {strides = array<i32>} : memref<32x384xbf16, #tpu.memory_space<vmem>>, vector<32x384xbf16>,
    return
  }
  func.func @transform_0(%arg0: i32, %arg1: i32) -> (i32, i32) {
    %c0_i32 = arith.constant 0 : i32
    %c0_i32_0 = arith.constant 0 : i32
    return %arg0, %c0_i32 : i32, i32
  }
  func.func @transform_1(%arg0: i32, %arg1: i32) -> (i32, i32) {
    %c0_i32 = arith.constant 0 : i32
    %c0_i32_0 = arith.constant 0 : i32
    %c0_i32_1 = arith.constant 0 : i32
    return %c0_i32, %c0_i32_0 : i32, i32
  }
  func.func @transform_2(%arg0: i32, %arg1: i32) -> (i32, i32) {
    %c0_i32 = arith.constant 0 : i32
    %c0_i32_0 = arith.constant 0 : i32
    %c0_i32_1 = arith.constant 0 : i32
    return %c0_i32, %c0_i32_0 : i32, i32
  }
  func.func @transform_3(%arg0: i32, %arg1: i32) -> (i32, i32) {
    %c0_i32 = arith.constant 0 : i32
    %c0_i32_0 = arith.constant 0 : i32
    return %c0_i32, %arg1 : i32, i32
  }
  func.func @transform_4(%arg0: i32, %arg1: i32) -> (i32, i32) {
    %c0_i32 = arith.constant 0 : i32
    %c0_i32_0 = arith.constant 0 : i32
    return %c0_i32, %arg1 : i32, i32
  }
  func.func @transform_5(%arg0: i32, %arg1: i32) -> (i32, i32) {
    %c0_i32 = arith.constant 0 : i32
    %c0_i32_0 = arith.constant 0 : i32
    return %c0_i32, %arg1 : i32, i32
  }
  func.func @transform_6(%arg0: i32, %arg1: i32) -> (i32, i32) {
    %c0_i32 = arith.constant 0 : i32
    return %arg0, %arg1 : i32, i32
  }
}

module attributes {stable_mosaic.version = 11 : i64} {
  func.func @act_quant_gemm_kernel(%arg0: i32, %arg1: i32, %arg2: memref<32x256xbf16, #tpu.memory_space<vmem>>, %arg3: memref<256x128xbf16, #tpu.memory_space<vmem>>, %arg4: memref<1x128xf32, #tpu.memory_space<vmem>>, %arg5: memref<1x128xf32, #tpu.memory_space<vmem>>, %arg6: memref<32x128xbf16, #tpu.memory_space<vmem>>, %arg7: memref<32x128xbf16, #tpu.memory_space<vmem>>) attributes {dimension_semantics = [#tpu.dimension_semantics<parallel>, #tpu.dimension_semantics<parallel>], iteration_bounds = array<i64: 1, 1>, scalar_prefetch = 0 : i64, scratch_operands = 0 : i64, tpu.core_type = #tpu.core_type<tc>, window_params = [{transform_indices = @transform_0, window_bounds = array<i64: 32, 256>}, {transform_indices = @transform_1, window_bounds = array<i64: 256, 128>}, {transform_indices = @transform_2, window_bounds = array<i64: 1, 128>}, {transform_indices = @transform_3, window_bounds = array<i64: 1, 128>}, {transform_indices = @transform_4, window_bounds = array<i64: 32, 128>}, {transform_indices = @transform_5, window_bounds = array<i64: 32, 128>}]} {
    %c0 = arith.constant 0 : index
    %c0_0 = arith.constant 0 : index
    %0 = vector.load %arg2[%c0, %c0_0] : memref<32x256xbf16, #tpu.memory_space<vmem>>, vector<32x256xbf16>
    %1 = arith.extf %0 : vector<32x256xbf16> to vector<32x256xf32>
    %cst = arith.constant 5.000000e-01 : f32
    %2 = vector.broadcast %cst : f32 to vector<32x256xf32>
    %3 = arith.mulf %2, %1 : vector<32x256xf32>
    %cst_1 = arith.constant 4.471500e-02 : f32
    %4 = vector.broadcast %cst_1 : f32 to vector<32x256xf32>
    %5 = arith.mulf %4, %1 : vector<32x256xf32>
    %6 = arith.mulf %5, %1 : vector<32x256xf32>
    %7 = arith.mulf %6, %1 : vector<32x256xf32>
    %8 = arith.addf %1, %7 : vector<32x256xf32>
    %cst_2 = arith.constant 0.797884583 : f32
    %9 = vector.broadcast %cst_2 : f32 to vector<32x256xf32>
    %10 = arith.mulf %9, %8 : vector<32x256xf32>
    %11 = math.tanh %10 : vector<32x256xf32>
    %cst_3 = arith.constant 1.000000e+00 : f32
    %12 = vector.broadcast %cst_3 : f32 to vector<32x256xf32>
    %13 = arith.addf %12, %11 : vector<32x256xf32>
    %14 = arith.mulf %3, %13 : vector<32x256xf32>
    %15 = math.absf %14 : vector<32x256xf32>
    %cst_4 = arith.constant dense<0xFF800000> : vector<32xf32>
    %16 = vector.multi_reduction <maximumf>, %15, %cst_4 [1] : vector<32x256xf32> to vector<32xf32>
    %17 = vector.shape_cast %16 : vector<32xf32> to vector<32x1xf32>
    %cst_5 = arith.constant 9.99999993E-9 : f32
    %18 = vector.broadcast %cst_5 : f32 to vector<32x1xf32>
    %19 = arith.maximumf %17, %18 : vector<32x1xf32>
    %20 = tpu.reciprocal %19 {approx = true} : vector<32x1xf32> -> vector<32x1xf32>
    %cst_6 = arith.constant 1.270000e+02 : f32
    %21 = vector.broadcast %cst_6 : f32 to vector<32x1xf32>
    %22 = arith.mulf %21, %20 : vector<32x1xf32>
    %23 = vector.broadcast %22 : vector<32x1xf32> to vector<32x256xf32>
    %24 = arith.mulf %14, %23 : vector<32x256xf32>
    %25 = math.roundeven %24 : vector<32x256xf32>
    %cst_7 = arith.constant -1.270000e+02 : f32
    %cst_8 = arith.constant 1.270000e+02 : f32
    %26 = vector.broadcast %cst_7 : f32 to vector<32x256xf32>
    %27 = arith.maximumf %26, %25 : vector<32x256xf32>
    %28 = vector.broadcast %cst_8 : f32 to vector<32x256xf32>
    %29 = arith.minimumf %28, %27 : vector<32x256xf32>
    %30 = arith.truncf %29 : vector<32x256xf32> to vector<32x256xbf16>
    %cst_9 = arith.constant 0.00787401571 : f32
    %31 = vector.broadcast %cst_9 : f32 to vector<32x1xf32>
    %32 = arith.mulf %19, %31 : vector<32x1xf32>
    %c0_10 = arith.constant 0 : index
    %c0_11 = arith.constant 0 : index
    %33 = vector.load %arg3[%c0_10, %c0_11] : memref<256x128xbf16, #tpu.memory_space<vmem>>, vector<256x128xbf16>
    %cst_12 = arith.constant dense<0.000000e+00> : vector<32x128xf32>
    %34 = tpu.matmul %30, %33, %cst_12 {dimension_numbers = #tpu.dot_dimension_numbers<[1], [0], [0], [1], [0, 0, 1, 1], [], []>} : vector<32x256xbf16>, vector<256x128xbf16>, vector<32x128xf32> -> vector<32x128xf32>
    %35 = vector.broadcast %32 : vector<32x1xf32> to vector<32x128xf32>
    %36 = arith.mulf %34, %35 : vector<32x128xf32>
    %c0_13 = arith.constant 0 : index
    %c0_14 = arith.constant 0 : index
    %37 = vector.load %arg5[%c0_13, %c0_14] : memref<1x128xf32, #tpu.memory_space<vmem>>, vector<1x128xf32>
    %38 = vector.broadcast %37 : vector<1x128xf32> to vector<32x128xf32>
    %39 = arith.addf %36, %38 : vector<32x128xf32>
    %c0_15 = arith.constant 0 : index
    %c0_16 = arith.constant 0 : index
    %40 = vector.load %arg6[%c0_15, %c0_16] : memref<32x128xbf16, #tpu.memory_space<vmem>>, vector<32x128xbf16>
    %41 = arith.extf %40 : vector<32x128xbf16> to vector<32x128xf32>
    %42 = arith.addf %39, %41 : vector<32x128xf32>
    %43 = arith.truncf %42 : vector<32x128xf32> to vector<32x128xbf16>
    %c0_17 = arith.constant 0 : index
    %c0_18 = arith.constant 0 : index
    %44 = vector.load %arg7[%c0_17, %c0_18] : memref<32x128xbf16, #tpu.memory_space<vmem>>, vector<32x128xbf16>
    tpu.vector_store %arg7[%c0_17, %c0_18], %43 {strides = array<i32>} : memref<32x128xbf16, #tpu.memory_space<vmem>>, vector<32x128xbf16>,
    return
  }
  func.func @transform_0(%arg0: i32, %arg1: i32) -> (i32, i32) {
    %c0_i32 = arith.constant 0 : i32
    %c0_i32_0 = arith.constant 0 : i32
    return %arg0, %c0_i32 : i32, i32
  }
  func.func @transform_1(%arg0: i32, %arg1: i32) -> (i32, i32) {
    %c0_i32 = arith.constant 0 : i32
    %c0_i32_0 = arith.constant 0 : i32
    return %c0_i32, %arg1 : i32, i32
  }
  func.func @transform_2(%arg0: i32, %arg1: i32) -> (i32, i32) {
    %c0_i32 = arith.constant 0 : i32
    %c0_i32_0 = arith.constant 0 : i32
    return %c0_i32, %arg1 : i32, i32
  }
  func.func @transform_3(%arg0: i32, %arg1: i32) -> (i32, i32) {
    %c0_i32 = arith.constant 0 : i32
    %c0_i32_0 = arith.constant 0 : i32
    return %c0_i32, %arg1 : i32, i32
  }
  func.func @transform_4(%arg0: i32, %arg1: i32) -> (i32, i32) {
    %c0_i32 = arith.constant 0 : i32
    return %arg0, %arg1 : i32, i32
  }
  func.func @transform_5(%arg0: i32, %arg1: i32) -> (i32, i32) {
    %c0_i32 = arith.constant 0 : i32
    return %arg0, %arg1 : i32, i32
  }
}

</mosaic_0001>

<bundles_post_ra>
// kernel: encoder_forward.12
= control target key start
LH: loop header
LB: loop body
LE: loop exit
PB: predicated region body
PF: predicated region fallthrough
CT: control target
= control target key end

     0   :  { %s478_s0 = inlined_call_operand.vmem [shape: bf16[32,128], index: 0, kind: input, shape index: {}]   ;;  %s479_s2 = inlined_call_operand.vmem [shape: f32[1,128], index: 2, kind: input, shape index: {}]   ;;  %s480_s1 = inlined_call_operand.vmem [shape: bf16[128,128], index: 1, kind: input, shape index: {}]   ;;  %s481_s3 = inlined_call_operand.vmem [shape: f32[1,128], index: 3, kind: input, shape index: {}]   ;;  %s482_s4 = inlined_call_operand.vmem [shape: bf16[32,128], index: 4, kind: input, shape index: {}]   ;;  %s483_s5 = inlined_call_operand.vmem [shape: bf16[32,128], index: 5, kind: output, shape index: {}]  }
   0x1   :  { %v400_v0 = vld [vmem:[%s478_s0 + $0x8] sm:$0xff]   ;;  %v405_v1 = vld [vmem:[%s478_s0] sm:$0xff]   ;;  %v351_v10 = vld [vmem:[%s480_s1 + $0x38] sm:$0xff]  }
   0x2   :  { %v266_v2 = vunpack.c.l.bf16 %v400_v0  ;;  %v262_v3 = vunpack.c.l.bf16 %v405_v1  ;;  %v267_v4 = vunpack.c.h.bf16 %v400_v0  ;;  %v263_v5 = vunpack.c.h.bf16 %v405_v1  ;;  %299 = vmatprep.subr.bf16.mxu0 %v351_v10  ;;  %v352_v11 = vld [vmem:[%s480_s1 + $0x30] sm:$0xff]   ;;  %v353_v12 = vld [vmem:[%s480_s1 + $0x28] sm:$0xff]   ;;  %v354_v13 = vld [vmem:[%s480_s1 + $0x20] sm:$0xff]  }
   0x3   :  { %300 = vmatpush3.bf16.msra.mxu0 %v351_v10  ;;  %v355_v14 = vld [vmem:[%s480_s1 + $0x18] sm:$0xff]   ;;  %v356_v15 = vld [vmem:[%s480_s1 + $0x10] sm:$0xff]   ;;  %v357_v16 = vld [vmem:[%s480_s1 + $0x8] sm:$0xff]  }
   0x4   :  { %v31_v6 = vand.u32 2147483647, %v266_v2  ;;  %v29_v7 = vand.u32 2147483647, %v262_v3  ;;  %v32_v8 = vand.u32 2147483647, %v267_v4  ;;  %301 = vmatprep.subr.bf16.mxu0 %v352_v11 }
   0x5   :  { %v30_v9 = vand.u32 2147483647, %v263_v5  ;;  %v358_v17 = vld [vmem:[%s480_s1] sm:$0xff]  }
   0x6   :  { %37 = vmax.xlane.f32.xlu1 %v31_v6  ;;  %33 = vmax.xlane.f32.xlu0 %v29_v7 }
   0x7   :  { %302 = vmatpush3.bf16.msra.mxu0 %v352_v11 }
   0x8   :  { %303 = vmatprep.subr.bf16.mxu0 %v353_v12 }
   0xa   :  { %39 = vmax.xlane.f32.xlu1 %v32_v8  ;;  %35 = vmax.xlane.f32.xlu0 %v30_v9 }
   0xb   :  { %304 = vmatpush3.bf16.msra.mxu0 %v353_v12  ;;  %v251_v12 = vld [vmem:[%s481_s3] ss:$0 sm:$0xff] }
   0xc   :  { %305 = vmatprep.subr.bf16.mxu0 %v354_v13 }
   0xf   :  { %306 = vmatpush3.bf16.msra.mxu0 %v354_v13  ;;  %v287_v13 = vld [vmem:[%s482_s4 + $0x8] sm:$0xff]  }
  0x10   :  { %307 = vmatprep.subr.bf16.mxu0 %v355_v14 }
  0x13   :  { %308 = vmatpush3.bf16.msra.mxu0 %v355_v14 }
  0x14   :  { %309 = vmatprep.subr.bf16.mxu0 %v356_v15 }
  0x17   :  { %310 = vmatpush3.bf16.msra.mxu0 %v356_v15 }
  0x18   :  { %311 = vmatprep.subr.bf16.mxu0 %v357_v16 }
  0x1b   :  { %312 = vmatpush3.bf16.msra.mxu0 %v357_v16 }
  0x1c   :  { %313 = vmatprep.subr.bf16.mxu0 %v358_v17 }
  0x1f   :  { %314 = vmatpush3.bf16.msra.mxu0 %v358_v17  ;;  %v269_v17 = vld [vmem:[%s482_s4] sm:$0xff]  }
  0x8f   :  { %v435_v18 = vpop.xlane.xlu1 %37  ;;  %v437_v19 = vpop.xlane.xlu0 %33 }
  0x90   :  { %v43_v20 = vmax.f32 %v435_v18, 1e-08  ;;  %v41_v21 = vmax.f32 %v437_v19, 1e-08 }
  0x92   :  { %359 = vrcp.f32 %v43_v20  ;;  %v73_v8 = vmul.f32 0.007874016, %v43_v20  ;;  %v71_v11 = vmul.f32 0.007874016, %v41_v21 }
  0x93   :  { %361 = vrcp.f32 %v41_v21  ;;  %v445_v22 = vpop.xlane.xlu1 %39  ;;  %v447_v23 = vpop.xlane.xlu0 %35  ;;  %v274_v21 = vunpack.c.l.bf16 %v287_v13 }
  0x94   :  { %v44_v24 = vmax.f32 %v445_v22, 1e-08  ;;  %v42_v25 = vmax.f32 %v447_v23, 1e-08  ;;  %v271_v22 = vunpack.c.h.bf16 %v269_v17 }
  0x96   :  { %363 = vrcp.f32 %v44_v24  ;;  %v74_v15 = vmul.f32 0.007874016, %v44_v24  ;;  %v72_v18 = vmul.f32 0.007874016, %v42_v25 }
  0x97   :  { %365 = vrcp.f32 %v42_v25 }
  0x9f   :  { %v360_v26 = vpop.eup %359 }
  0xa0   :  { %v362_v27 = vpop.eup %361  ;;  %v51_v28 = vmul.f32 127.0, %v360_v26 }
  0xa1   :  { %v49_v29 = vmul.f32 127.0, %v362_v27  ;;  %v275_v27 = vunpack.c.h.bf16 %v287_v13 }
  0xa2   :  { %v55_v30 = vmul.f32 %v266_v2, %v51_v28  ;;  %v270_v28 = vunpack.c.l.bf16 %v269_v17 }
  0xa3   :  { %v364_v31 = vpop.eup %363  ;;  %v53_v32 = vmul.f32 %v262_v3, %v49_v29 }
  0xa4   :  { %v366_v33 = vpop.eup %365  ;;  %v52_v34 = vmul.f32 127.0, %v364_v31  ;;  %v337_v35 = vcvt.f32.s32 %v55_v30  ;;  %v340_v43 = vand.u32 2147483648, %v55_v30  ;;  %v335_v48 = vand.u32 2147483647, %v55_v30 }
  0xa5   :  { %v50_v36 = vmul.f32 127.0, %v366_v33  ;;  %v321_v37 = vcvt.f32.s32 %v53_v32  ;;  %v324_v46 = vand.u32 2147483648, %v53_v32  ;;  %v319_v49 = vand.u32 2147483647, %v53_v32 }
  0xa6   :  { %v56_v38 = vmul.f32 %v267_v4, %v52_v34  ;;  %v338_v39 = vcvt.s32.f32 %v337_v35  ;;  %vm336_vm0 = vcmp.lt.f32.partialorder %v335_v48, 8388608.0 }
  0xa7   :  { %v54_v40 = vmul.f32 %v263_v5, %v50_v36  ;;  %v322_v41 = vcvt.s32.f32 %v321_v37  ;;  %vm320_vm1 = vcmp.lt.f32.partialorder %v319_v49, 8388608.0 }
  0xa8   :  { %v339_v42 = vand.u32 2147483647, %v338_v39  ;;  %v345_v44 = vcvt.f32.s32 %v56_v38  ;;  %v343_v54 = vand.u32 2147483647, %v56_v38  ;;  %v348_v57 = vand.u32 2147483648, %v56_v38 }
  0xa9   :  { %v323_v45 = vand.u32 2147483647, %v322_v41  ;;  %v329_v47 = vcvt.f32.s32 %v54_v40  ;;  %v327_v55 = vand.u32 2147483647, %v54_v40  ;;  %v332_v59 = vand.u32 2147483648, %v54_v40 }
  0xaa   :  { %v341_v50 = vor.u32 %v340_v43, %v339_v42  ;;  %v346_v51 = vcvt.s32.f32 %v345_v44  ;;  %vm344_vm2 = vcmp.lt.f32.partialorder %v343_v54, 8388608.0 }
  0xab   :  { %v325_v52 = vor.u32 %v324_v46, %v323_v45  ;;  %v330_v53 = vcvt.s32.f32 %v329_v47  ;;  %vm328_vm3 = vcmp.lt.f32.partialorder %v327_v55, 8388608.0 }
  0xac   :  { %v347_v56 = vand.u32 2147483647, %v346_v51  ;;  %v342_v60 = vsel %vm336_vm0, %v341_v50, %v55_v30 }
  0xad   :  { %v331_v58 = vand.u32 2147483647, %v330_v53  ;;  %v326_v62 = vsel %vm320_vm1, %v325_v52, %v53_v32  ;;  %v241_v2 = vclamps-f32 %v342_v60, 127.0 }
  0xae   :  { %v349_v61 = vor.u32 %v348_v57, %v347_v56  ;;  %v239_v4 = vclamps-f32 %v326_v62, 127.0 }
  0xaf   :  { %v333_v63 = vor.u32 %v332_v59, %v331_v58 }
  0xb0   :  { %v350_v0 = vsel %vm344_vm2, %v349_v61, %v56_v38 }
  0xb1   :  { %v334_v1 = vsel %vm328_vm3, %v333_v63, %v54_v40  ;;  %v242_v3 = vclamps-f32 %v350_v0, 127.0 }
  0xb2   :  { %v240_v5 = vclamps-f32 %v334_v1, 127.0 }
  0xb3   :  { %v70_v6 = vpack.c.bf16 %v242_v3, %v241_v2 }
  0xb4   :  { %v69_v7 = vpack.c.bf16 %v240_v5, %v239_v4 }
  0xb6   :  { %315 = vmatprep.mubr.bf16.mxu0 %v69_v7 }
  0xb7   :  { %316 = vmatmul.mubr.bf16.vlgmr.msra.gmra.mxu0 %v70_v6 }
 0x177   :  { %v317_v9 = vpop.f32.mrf.mxu0 }
 0x178   :  { %v190_v10 = vmul.f32 %v317_v9, %v73_v8 }
 0x179   :  { %v173_v14 = vpop.f32.mrf.mxu0 }
 0x17a   :  { %v188_v16 = vmul.f32 %v173_v14, %v71_v11  ;;  %v201_v20 = vadd.f32 %v251_v12, %v190_v10 }
 0x17b   :  { %v318_v19 = vpop.f32.mrf.mxu0 }
 0x17c   :  { %v191_v26 = vmul.f32 %v318_v19, %v74_v15  ;;  %v199_v30 = vadd.f32 %v251_v12, %v188_v16  ;;  %v213_v24 = vadd.f32 %v274_v21, %v201_v20 }
 0x17d   :  { %v176_v29 = vpop.f32.mrf.mxu0 }
 0x17e   :  { %v202_v31 = vadd.f32 %v251_v12, %v191_v26  ;;  %v189_v32 = vmul.f32 %v176_v29, %v72_v18  ;;  %v211_v35 = vadd.f32 %v270_v28, %v199_v30 }
 0x180   :  { %v214_v33 = vadd.f32 %v275_v27, %v202_v31  ;;  %v200_v34 = vadd.f32 %v251_v12, %v189_v32 }
 0x182   :  { %v284_v36 = vpack.c.bf16 %v214_v33, %v213_v24  ;;  %v212_v37 = vadd.f32 %v271_v22, %v200_v34 }
 0x184   :  { %288 = vst [vmem:[%s483_s5 + $0x8] sm:$0xff] %v284_v36   ;;  %v279_v23 = vpack.c.bf16 %v212_v37, %v211_v35 }
 0x186   :  { %280 = vst [vmem:[%s483_s5] sm:$0xff] %v279_v23  }

// kernel: encoder_forward.11
= control target key start
LH: loop header
LB: loop body
LE: loop exit
PB: predicated region body
PF: predicated region fallthrough
CT: control target
= control target key end

     0   :  { %s909_s6 = smov 0   ;;  %s1018_s0 = inlined_call_operand.vmem [shape: bf16[2,16,384], index: 0, kind: input, shape index: {}]   ;;  %s1019_s1 = inlined_call_operand.vmem [shape: bf16[2,16,128], index: 1, kind: output, shape index: {}]  }
   0x1 LB: > { %s734_s7 = sadd.s32 4294967295, %s892_s6   ;;  %p738_p0 = scmp.ge.s32.totalorder %s892_s6, 1  ;;  %s892_s6 = sphi %s909_s6, %s11_s6  }
   0x2   : > { %p87_p1 = scmp.lt.s32.totalorder %s892_s6, 3 }
   0x4   : > { %p88_p2 = pnand %p738_p0, %p87_p1 }
   0x5   : > { %p107_p3 = scmp.lt.s32.totalorder (!%p88_p2), %s734_s7, 1  ;;  %s896_s12 = smov (!%p88_p2), 96  }
   0x6   : > { %91 = sbr.rel (%p88_p2) target bundleno = 1434 (0x59a), region = 24  ;;  %s897_s13 = smov (!%p88_p2), 32  }
   0x7   : > { %s898_s14 = smov (!%p88_p2), 64  }
   0xb   : > { %v894_v0 = vmov 0.0   ;;  %vm895_vm0 = vmmov 0   ;;  %s1021_s7 = smov (!%p107_p3, %s734_s7), 1  ;;  %vm130_vm1 = vcmask 261120   ;;  %vm180_vm2 = vcmask 130048  }
   0xc   : > { %788 = vmatprep.subr.bf16.mxu0 %v894_v0  ;;  %790 = vmatprep.mubr.msk.bf16.mxu0 %vm895_vm0, %v894_v0  ;;  %s836_s8 = smul.u32 24, %s1021_s7  ;;  %s763_s15 = sshll.u32 %s1021_s7, 3  ;;  %vm262_vm3 = vcmask 257024   ;;  %vm400_vm4 = vcmask 519424   ;;  %vm538_vm5 = vcmask 781824   ;;  %vm676_vm6 = vcmask 1044224  }
   0xd   : > { %794 = vmatprep.subr.bf16.mxu1 %v894_v0  ;;  %796 = vmatprep.mubr.msk.bf16.mxu1 %vm895_vm0, %v894_v0  ;;  %s972_s18 = scalar_lea.vmem %s1019_s1, %s763_s15 }
   0xe   : > { %s929_s11 = scalar_lea.vmem %s1018_s0, %s836_s8 }
   0xf   : > { %v850_v1 = vld [vmem:[%s929_s11 + $0x4] ss:$12 sps:$4 sm:$0xff]   ;;  %v852_v3 = vld [vmem:[%s929_s11] ss:$12 sps:$4 sm:$0xff]   ;;  %v945_v22 = vld [vmem:[%s929_s11 + $0x8] ss:$12 sps:$4 sm:$0xff]  }
  0x10   : > { %v135_v2 = vsel %vm130_vm1, %v850_v1, 0  ;;  %795 = vmatpush3.bf16.msra.mxu1 %v945_v22 }
  0x11   : > { %789 = vmatpush3.bf16.xpose.msra.mxu0 %v135_v2  ;;  %800 = vmatprep.subr.bf16.mxu1 %v894_v0 }
  0x12   : > { %806 = vmatprep.subr.bf16.mxu0 %v894_v0 }
  0x18   : > { %791 = vmatmul.mubr.msk.bf16.vlgmr.msra.gmra.mxu0 %vm130_vm1, %v852_v3 }
  0x19   : > { %808 = vmatprep.mubr.msk.bf16.mxu0 %vm895_vm0, %v894_v0 }
  0xd8   : > { %v171_v4 = vpop.f32.mrf.mxu0 }
  0xd9   : > { %v178_v5 = vmul.f32 0.17677669, %v171_v4 }
  0xda   : > { %v792_v6 = vpop.f32.mrf.mxu0 }
  0xdb   : > { %v181_v7 = vsel %vm180_vm2, %v178_v5, -inf }
  0xdc   : > { %182 = vmax.xlane.f32.xlu0 %v181_v7  ;;  %v174_v8 = vpop.f32.mrf.mxu0 }
  0xdd   : > { %v179_v9 = vmul.f32 0.17677669, %v174_v8 }
  0xde   : > { %v793_v10 = vpop.f32.mrf.mxu0 }
  0xdf   : > { %v184_v11 = vsel %vm180_vm2, %v179_v9, -inf }
  0xe0   : > { %185 = vmax.xlane.f32.xlu0 %v184_v11 }
  0xf6   : > { %267 = vrot.lane.b32.xlu0 %v850_v1, %s896_s12 }
  0xfa   : > { %543 = vrot.lane.b32.xlu0 %v850_v1, %s897_s13 }
 0x165   : > { %v183_v12 = vpop.xlane.xlu0 %182 }
 0x166   : > { %v187_v13 = vsub.f32 %v178_v5, %v183_v12 }
 0x168   : > { %v189_v14 = vmul.f32 1.442695, %v187_v13 }
 0x169   : > { %v186_v15 = vpop.xlane.xlu0 %185 }
 0x16a   : > { %854 = vpow2.f32 %v189_v14  ;;  %v188_v16 = vsub.f32 %v179_v9, %v186_v15 }
 0x16c   : > { %v191_v17 = vmul.f32 1.442695, %v188_v16 }
 0x16d   : > { %v268_v27 = vpop.permute.xlu0 %267 }
 0x16e   : > { %856 = vpow2.f32 %v191_v17  ;;  %v273_v31 = vsel %vm130_vm1, %v268_v27, 0 }
 0x171   : > { %v544_v35 = vpop.permute.xlu0 %543 }
 0x172   : > { %v549_v37 = vsel %vm130_vm1, %v544_v35, 0 }
 0x177   : > { %v855_v18 = vpop.eup %854 }
 0x178   : > { %v193_v19 = vsel %vm180_vm2, %v855_v18, 0.0 }
 0x179   : > { %194 = vadd.xlane.f32.xlu1 %v193_v19 }
 0x17b   : > { %v857_v20 = vpop.eup %856 }
 0x17c   : > { %v196_v21 = vsel %vm180_vm2, %v857_v20, 0.0 }
 0x17d   : > { %197 = vadd.xlane.f32.xlu1 %v196_v21 }
 0x18e   : > { %265 = vrot.lane.b32.xlu1 %v852_v3, %s896_s12 }
 0x192   : > { %405 = vrot.lane.b32.xlu1 %v850_v1, %s898_s14 }
 0x196   : > { %403 = vrot.lane.b32.xlu1 %v852_v3, %s898_s14 }
 0x19a   : > { %541 = vrot.lane.b32.xlu1 %v852_v3, %s897_s13 }
 0x202   : > { %v195_v23 = vpop.xlane.xlu1 %194 }
 0x203   : > { %858 = vrcp.f32 %v195_v23 }
 0x206   : > { %v198_v24 = vpop.xlane.xlu1 %197 }
 0x207   : > { %860 = vrcp.f32 %v198_v24 }
 0x20a   : > { %v266_v30 = vpop.permute.xlu1 %265 }
 0x20e   : > { %v406_v33 = vpop.permute.xlu1 %405 }
 0x20f   : > { %v411_v34 = vsel %vm130_vm1, %v406_v33, 0 }
 0x210   : > { %v859_v25 = vpop.eup %858 }
 0x211   : > { %v201_v28 = vmul.f32 %v859_v25, %v855_v18 }
 0x212   : > { %v404_v36 = vpop.permute.xlu1 %403 }
 0x214   : > { %v861_v26 = vpop.eup %860 }
 0x215   : > { %v202_v29 = vmul.f32 %v861_v26, %v857_v20 }
 0x216   : > { %v542_v38 = vpop.permute.xlu1 %541 }
 0x217   : > { %v203_v32 = vpack.c.bf16 %v202_v29, %v201_v28 }
 0x219   : > { %797 = vmatmul.mubr.msk.bf16.vlgmr.msra.gmra.mxu1 %vm180_vm2, %v203_v32 }
 0x21a   : > { %801 = vmatpush3.bf16.xpose.msra.mxu1 %v273_v31  ;;  %802 = vmatprep.mubr.msk.bf16.mxu1 %vm895_vm0, %v894_v0 }
 0x21b   : > { %812 = vmatprep.subr.bf16.mxu1 %v894_v0 }
 0x221   : > { %803 = vmatmul.mubr.msk.bf16.vlgmr.msra.gmra.mxu1 %vm130_vm1, %v266_v30 }
 0x222   : > { %813 = vmatpush3.bf16.xpose.msra.mxu1 %v411_v34  ;;  %814 = vmatprep.mubr.msk.bf16.mxu1 %vm895_vm0, %v894_v0 }
 0x223   : > { %824 = vmatprep.subr.bf16.mxu1 %v894_v0 }
 0x229   : > { %815 = vmatmul.mubr.msk.bf16.vlgmr.msra.gmra.mxu1 %vm130_vm1, %v404_v36 }
 0x22a   : > { %825 = vmatpush3.bf16.xpose.msra.mxu1 %v549_v37  ;;  %826 = vmatprep.mubr.msk.bf16.mxu1 %vm895_vm0, %v894_v0 }
 0x231   : > { %827 = vmatmul.mubr.msk.bf16.vlgmr.msra.gmra.mxu1 %vm130_vm1, %v542_v38 }
 0x2d9   : > { %v247_v39 = vpop.f32.mrf.mxu1 }
 0x2da   : > { %v764_v40 = vpack.c.bf16 %v247_v39, %v247_v39 }
 0x2db   : > { %v798_v41 = vpop.f32.mrf.mxu1 }
 0x2dc   : > { %263 = vst.msk [vmem:[%s972_s18] sm:$0xf] %vm262_vm3, %v764_v40 }
 0x2dd   : > { %v250_v42 = vpop.f32.mrf.mxu1 }
 0x2de   : > { %v765_v43 = vpack.c.bf16 %v250_v42, %v250_v42 }
 0x2df   : > { %v799_v44 = vpop.f32.mrf.mxu1 }
 0x2e0   : > { %264 = vst.msk [vmem:[%s972_s18 + $0x4] sm:$0xf] %vm262_vm3, %v765_v43 }
 0x2e1   : > { %v309_v45 = vpop.f32.mrf.mxu1 }
 0x2e2   : > { %v316_v46 = vmul.f32 0.17677669, %v309_v45 }
 0x2e3   : > { %v804_v47 = vpop.f32.mrf.mxu1 }
 0x2e4   : > { %v318_v48 = vsel %vm180_vm2, %v316_v46, -inf }
 0x2e5   : > { %319 = vmax.xlane.f32.xlu0 %v318_v48  ;;  %v312_v49 = vpop.f32.mrf.mxu1 }
 0x2e6   : > { %v317_v50 = vmul.f32 0.17677669, %v312_v49 }
 0x2e7   : > { %v805_v51 = vpop.f32.mrf.mxu1 }
 0x2e8   : > { %v321_v52 = vsel %vm180_vm2, %v317_v50, -inf }
 0x2e9   : > { %322 = vmax.xlane.f32.xlu1 %v321_v52  ;;  %v447_v53 = vpop.f32.mrf.mxu1 }
 0x2ea   : > { %v454_v54 = vmul.f32 0.17677669, %v447_v53 }
 0x2eb   : > { %v816_v55 = vpop.f32.mrf.mxu1 }
 0x2ec   : > { %v456_v56 = vsel %vm180_vm2, %v454_v54, -inf }
 0x2ed   : > { %457 = vmax.xlane.f32.xlu0 %v456_v56  ;;  %v450_v57 = vpop.f32.mrf.mxu1 }
 0x2ee   : > { %v455_v58 = vmul.f32 0.17677669, %v450_v57 }
 0x2ef   : > { %v817_v59 = vpop.f32.mrf.mxu1 }
 0x2f0   : > { %v459_v60 = vsel %vm180_vm2, %v455_v58, -inf }
 0x2f1   : > { %460 = vmax.xlane.f32.xlu0 %v459_v60  ;;  %v585_v61 = vpop.f32.mrf.mxu1 }
 0x2f2   : > { %v592_v62 = vmul.f32 0.17677669, %v585_v61 }
 0x2f3   : > { %v828_v63 = vpop.f32.mrf.mxu1 }
 0x2f4   : > { %v594_v1 = vsel %vm180_vm2, %v592_v62, -inf }
 0x2f5   : > { %595 = vmax.xlane.f32.xlu0 %v594_v1  ;;  %v588_v2 = vpop.f32.mrf.mxu1 }
 0x2f6   : > { %v593_v3 = vmul.f32 0.17677669, %v588_v2 }
 0x2f7   : > { %v829_v4 = vpop.f32.mrf.mxu1 }
 0x2f8   : > { %v597_v5 = vsel %vm180_vm2, %v593_v3, -inf }
 0x2f9   : > { %598 = vmax.xlane.f32.xlu1 %v597_v5 }
 0x36e   : > { %v320_v6 = vpop.xlane.xlu0 %319 }
 0x36f   : > { %v324_v7 = vsub.f32 %v316_v46, %v320_v6 }
 0x371   : > { %v326_v8 = vmul.f32 1.442695, %v324_v7 }
 0x372   : > { %v323_v9 = vpop.xlane.xlu1 %322 }
 0x373   : > { %862 = vpow2.f32 %v326_v8  ;;  %v325_v10 = vsub.f32 %v317_v50, %v323_v9 }
 0x375   : > { %v328_v11 = vmul.f32 1.442695, %v325_v10 }
 0x376   : > { %v458_v12 = vpop.xlane.xlu0 %457 }
 0x377   : > { %864 = vpow2.f32 %v328_v11  ;;  %v462_v13 = vsub.f32 %v454_v54, %v458_v12 }
 0x379   : > { %v464_v14 = vmul.f32 1.442695, %v462_v13 }
 0x37a   : > { %v461_v15 = vpop.xlane.xlu0 %460 }
 0x37b   : > { %866 = vpow2.f32 %v464_v14  ;;  %v463_v16 = vsub.f32 %v455_v58, %v461_v15 }
 0x37d   : > { %v466_v17 = vmul.f32 1.442695, %v463_v16 }
 0x37e   : > { %v596_v18 = vpop.xlane.xlu0 %595 }
 0x37f   : > { %868 = vpow2.f32 %v466_v17  ;;  %v600_v19 = vsub.f32 %v592_v62, %v596_v18 }
 0x380   : > { %v863_v20 = vpop.eup %862 }
 0x381   : > { %v602_v21 = vmul.f32 1.442695, %v600_v19  ;;  %v330_v23 = vsel %vm180_vm2, %v863_v20, 0.0 }
 0x382   : > { %331 = vadd.xlane.f32.xlu0 %v330_v23  ;;  %v599_v32 = vpop.xlane.xlu1 %598 }
 0x383   : > { %870 = vpow2.f32 %v602_v21  ;;  %v601_v33 = vsub.f32 %v593_v3, %v599_v32 }
 0x384   : > { %v865_v24 = vpop.eup %864 }
 0x385   : > { %v333_v25 = vsel %vm180_vm2, %v865_v24, 0.0  ;;  %v604_v34 = vmul.f32 1.442695, %v601_v33 }
 0x386   : > { %334 = vadd.xlane.f32.xlu1 %v333_v25 }
 0x387   : > { %872 = vpow2.f32 %v604_v34 }
 0x388   : > { %v867_v26 = vpop.eup %866 }
 0x389   : > { %v468_v27 = vsel %vm180_vm2, %v867_v26, 0.0 }
 0x38a   : > { %469 = vadd.xlane.f32.xlu0 %v468_v27 }
 0x38c   : > { %v869_v28 = vpop.eup %868 }
 0x38d   : > { %v471_v29 = vsel %vm180_vm2, %v869_v28, 0.0 }
 0x38e   : > { %472 = vadd.xlane.f32.xlu1 %v471_v29 }
 0x390   : > { %v871_v30 = vpop.eup %870 }
 0x391   : > { %v606_v31 = vsel %vm180_vm2, %v871_v30, 0.0 }
 0x392   : > { %607 = vadd.xlane.f32.xlu0 %v606_v31 }
 0x394   : > { %v873_v35 = vpop.eup %872 }
 0x395   : > { %v609_v36 = vsel %vm180_vm2, %v873_v35, 0.0 }
 0x39f   : > { %479 = vrot.lane.b32.xlu1 %v945_v22, %s898_s14 }
 0x3a8   : > { %341 = vrot.lane.b32.xlu0 %v945_v22, %s896_s12 }
 0x3c3   : > { %610 = vadd.xlane.f32.xlu1 %v609_v36 }
 0x3d4   : > { %617 = vrot.lane.b32.xlu1 %v945_v22, %s897_s13 }
 0x40b   : > { %v332_v37 = vpop.xlane.xlu0 %331 }
 0x40c   : > { %874 = vrcp.f32 %v332_v37 }
 0x40f   : > { %v335_v38 = vpop.xlane.xlu1 %334 }
 0x410   : > { %876 = vrcp.f32 %v335_v38 }
 0x413   : > { %v470_v39 = vpop.xlane.xlu0 %469 }
 0x414   : > { %878 = vrcp.f32 %v470_v39 }
 0x417   : > { %v473_v40 = vpop.xlane.xlu1 %472 }
 0x418   : > { %880 = vrcp.f32 %v473_v40 }
 0x419   : > { %v875_v41 = vpop.eup %874 }
 0x41a   : > { %v338_v44 = vmul.f32 %v875_v41, %v863_v20 }
 0x41b   : > { %v608_v42 = vpop.xlane.xlu0 %607  ;;  %v480_v22 = vpop.permute.xlu1 %479 }
 0x41c   : > { %882 = vrcp.f32 %v608_v42 }
 0x41d   : > { %v877_v43 = vpop.eup %876 }
 0x41e   : > { %v339_v45 = vmul.f32 %v877_v43, %v865_v24 }
 0x41f   : > { %v342_v46 = vpop.permute.xlu0 %341 }
 0x420   : > { %807 = vmatpush3.bf16.msra.mxu0 %v342_v46  ;;  %v340_v47 = vpack.c.bf16 %v339_v45, %v338_v44 }
 0x421   : > { %818 = vmatprep.subr.bf16.mxu0 %v894_v0  ;;  %v879_v48 = vpop.eup %878 }
 0x422   : > { %v476_v50 = vmul.f32 %v879_v48, %v867_v26 }
 0x423   : > { %809 = vmatmul.mubr.msk.bf16.vlgmr.msra.gmra.mxu0 %vm180_vm2, %v340_v47 }
 0x424   : > { %819 = vmatpush3.bf16.msra.mxu0 %v480_v22  ;;  %820 = vmatprep.mubr.msk.bf16.mxu0 %vm895_vm0, %v894_v0 }
 0x425   : > { %v881_v49 = vpop.eup %880  ;;  %830 = vmatprep.subr.bf16.mxu0 %v894_v0 }
 0x426   : > { %v477_v51 = vmul.f32 %v881_v49, %v869_v28 }
 0x428   : > { %v478_v52 = vpack.c.bf16 %v477_v51, %v476_v50 }
 0x429   : > { %v883_v55 = vpop.eup %882 }
 0x42a   : > { %v614_v57 = vmul.f32 %v883_v55, %v871_v30 }
 0x42b   : > { %821 = vmatmul.mubr.msk.bf16.vlgmr.msra.gmra.mxu0 %vm180_vm2, %v478_v52 }
 0x42c   : > { %832 = vmatprep.mubr.msk.bf16.mxu0 %vm895_vm0, %v894_v0 }
 0x44c   : > { %v611_v53 = vpop.xlane.xlu1 %610 }
 0x44d   : > { %884 = vrcp.f32 %v611_v53 }
 0x450   : > { %v618_v54 = vpop.permute.xlu1 %617 }
 0x451   : > { %831 = vmatpush3.bf16.msra.mxu0 %v618_v54 }
 0x45a   : > { %v885_v56 = vpop.eup %884 }
 0x45b   : > { %v615_v58 = vmul.f32 %v885_v56, %v873_v35 }
 0x45d   : > { %v616_v59 = vpack.c.bf16 %v615_v58, %v614_v57 }
 0x45f   : > { %833 = vmatmul.mubr.msk.bf16.vlgmr.msra.gmra.mxu0 %vm180_vm2, %v616_v59 }
 0x4e3   : > { %v381_v60 = vpop.f32.mrf.mxu0 }
 0x4e4   : > { %v766_v61 = vpack.c.bf16 %v381_v60, %v381_v60 }
 0x4e5   : > { %v810_v62 = vpop.f32.mrf.mxu0 }
 0x4e6   : > { %394 = vrot.lane.b32.xlu1 %v766_v61, %s897_s13 }
 0x4e7   : > { %v384_v63 = vpop.f32.mrf.mxu0 }
 0x4e8   : > { %v767_v1 = vpack.c.bf16 %v384_v63, %v384_v63 }
 0x4e9   : > { %v811_v0 = vpop.f32.mrf.mxu0 }
 0x4ea   : > { %396 = vrot.lane.b32.xlu0 %v767_v1, %s897_s13 }
 0x4eb   : > { %v519_v2 = vpop.f32.mrf.mxu0 }
 0x4ec   : > { %v768_v3 = vpack.c.bf16 %v519_v2, %v519_v2 }
 0x4ed   : > { %v822_v4 = vpop.f32.mrf.mxu0 }
 0x4ee   : > { %532 = vrot.lane.b32.xlu1 %v768_v3, %s898_s14 }
 0x4ef   : > { %v522_v5 = vpop.f32.mrf.mxu0 }
 0x4f0   : > { %v769_v6 = vpack.c.bf16 %v522_v5, %v522_v5 }
 0x4f1   : > { %v823_v7 = vpop.f32.mrf.mxu0 }
 0x4f2   : > { %534 = vrot.lane.b32.xlu0 %v769_v6, %s898_s14 }
 0x51f   : > { %v657_v8 = vpop.f32.mrf.mxu0 }
 0x520   : > { %v770_v9 = vpack.c.bf16 %v657_v8, %v657_v8 }
 0x521   : > { %v834_v10 = vpop.f32.mrf.mxu0 }
 0x522   : > { %670 = vrot.lane.b32.xlu1 %v770_v9, %s896_s12 }
 0x523   : > { %v660_v11 = vpop.f32.mrf.mxu0 }
 0x524   : > { %v771_v12 = vpack.c.bf16 %v660_v11, %v660_v11 }
 0x525   : > { %v835_v13 = vpop.f32.mrf.mxu0 }
 0x526   : > { %672 = vrot.lane.b32.xlu0 %v771_v12, %s896_s12 }
 0x558   : > { %v395_v14 = vpop.permute.xlu1 %394 }
 0x559   : > { %401 = vst.msk [vmem:[%s972_s18] sm:$0xf] %vm400_vm4, %v395_v14 }
 0x55c   : > { %v397_v15 = vpop.permute.xlu0 %396 }
 0x55d   : > { %402 = vst.msk [vmem:[%s972_s18 + $0x4] sm:$0xf] %vm400_vm4, %v397_v15 }
 0x560   : > { %v533_v16 = vpop.permute.xlu1 %532 }
 0x561   : > { %539 = vst.msk [vmem:[%s972_s18] sm:$0xf] %vm538_vm5, %v533_v16 }
 0x564   : > { %v535_v17 = vpop.permute.xlu0 %534 }
 0x565   : > { %540 = vst.msk [vmem:[%s972_s18 + $0x4] sm:$0xf] %vm538_vm5, %v535_v17 }
 0x594   : > { %v671_v18 = vpop.permute.xlu1 %670 }
 0x595   : > { %677 = vst.msk [vmem:[%s972_s18] sm:$0xf] %vm676_vm6, %v671_v18 }
 0x598   : > { %v673_v19 = vpop.permute.xlu0 %672 }
 0x599   : > { %678 = vst.msk [vmem:[%s972_s18 + $0x4] sm:$0xf] %vm676_vm6, %v673_v19 }
 0x59a PF: > { %s11_s6 = sadd.s32 1, %s892_s6  }
 0x59b   : > { %p8_p4 = scmp.ge.s32.totalorder %s11_s6, 4  }
 0x59d   :  { %10 = sbr.rel (!%p8_p4) target bundleno = 1 (0x1), region = 54 }

// kernel: encoder_forward.10
= control target key start
LH: loop header
LB: loop body
LE: loop exit
PB: predicated region body
PF: predicated region fallthrough
CT: control target
= control target key end

     0   :  { %11 = vsyncpa [#allocation3], 0  ;;  %s690_s21 = smov [#allocation2]   ;;  %s817_s0 = inlined_call_operand.vmem [shape: bf16[32,128], index: 0, kind: input, shape index: {}]   ;;  %s818_s1 = inlined_call_operand.vmem [shape: f32[1,128], index: 1, kind: input, shape index: {}]   ;;  %s819_s2 = inlined_call_operand.vmem [shape: f32[1,128], index: 2, kind: input, shape index: {}]   ;;  %s820_s3 = inlined_call_operand.hbm [shape: bf16[128,384], index: 3, kind: input, shape index: {}]   ;;  %s821_s4 = inlined_call_operand.vmem [shape: f32[1,384], index: 4, kind: input, shape index: {}]   ;;  %s822_s5 = inlined_call_operand.vmem [shape: f32[1,384], index: 5, kind: input, shape index: {}]   ;;  %s823_s6 = inlined_call_operand.vmem [shape: bf16[32,384], index: 6, kind: output, shape index: {}]  }
   0x1   :  { %s23_s22 = sshll.u32 %s690_s21, 4  ;;  %s24_s22 = int_to_ptr.vmem [resolvable:$true] %s23_s22 }
   0x2   :  { %s676_s23 = scalar_lea.vmem %s24_s22, 3072  ;;  %p681_p1 = scmp.lt.s32.totalorder %s24_s22, %s24_s22 }
   0x3   :  { %p677_p0 = scmp.ne.s32.totalorder %s24_s22, %s676_s23  ;;  %p682_p2 = scmp.lt.s32.totalorder %s676_s23, %s676_s23 }
   0x5   :  { %p683_p3 = por %p682_p2, %p681_p1 }
   0x7   :  { %p684_p4 = pnand %p683_p3, %p677_p0 }
   0x9   :  { %687 = shalt.err (!%p684_p4)
}
   0xa   :  { %s691_s24 = smov 192   ;;  %s692_s25 = smov 12  }
   0xb   :  { %29 = dma.hbm_to_vmem [thread:$0]  %s820_s3, 3072, %s24_s22, [#allocation3], %s691_s24, %s691_s24, %s692_s25  }
   0xc   :  { %688 = dma.done.wait [#allocation3], 3072  }
   0xd   :  { %689 = vsyncadd [#allocation3], 4294964224  ;;  %v546_v0 = vld [vmem:[%s817_s0] sm:$0xff]   ;;  %v553_v1 = vld [vmem:[%s817_s0 + $0x8] sm:$0xff]  }
   0xe   :  { %v547_v2 = vunpack.c.l.bf16 %v546_v0  ;;  %v551_v3 = vunpack.c.l.bf16 %v553_v1  ;;  %v548_v4 = vunpack.c.h.bf16 %v546_v0  ;;  %v552_v5 = vunpack.c.h.bf16 %v553_v1  ;;  %v499_v23 = vld [vmem:[%s818_s1] ss:$0 sm:$0xff]  ;;  %v620_v44 = vld [vmem:[#allocation2 + $0xac] ss:$12 sps:$4 sm:$0xff]   ;;  %v622_v45 = vld [vmem:[#allocation2 + $0xa8] ss:$12 sps:$4 sm:$0xff]  }
   0xf   :  { %v500_v26 = vld [vmem:[%s819_s2] ss:$0 sm:$0xff]  ;;  %303 = vmatprep.subr.bf16.mxu0 %v620_v44  ;;  %v625_v47 = vld [vmem:[#allocation2 + $0xb0] ss:$12 sps:$4 sm:$0xff]   ;;  %v629_v50 = vld [vmem:[#allocation2 + $0x98] ss:$12 sps:$4 sm:$0xff]  }
  0x10   :  { %v46_v6 = vmul.f32 %v547_v2, %v547_v2  ;;  %v48_v7 = vmul.f32 %v551_v3, %v551_v3  ;;  %v47_v8 = vmul.f32 %v548_v4, %v548_v4  ;;  %v49_v9 = vmul.f32 %v552_v5, %v552_v5  ;;  %304 = vmatpush1.bf16.msra.mxu0 %v622_v45  ;;  %v623_v46 = vld [vmem:[#allocation2 + $0x94] ss:$12 sps:$4 sm:$0xff]   ;;  %v626_v48 = vld [vmem:[#allocation2 + $0x90] ss:$12 sps:$4 sm:$0xff]   ;;  %v630_v51 = vld [vmem:[#allocation2 + $0x78] ss:$12 sps:$4 sm:$0xff]  }
  0x11   :  { %305 = vmatprep.subr.bf16.mxu0 %v623_v46  ;;  %564 = vmatprep.subr.bf16.mxu1 %v625_v47  ;;  %v627_v49 = vld [vmem:[#allocation2 + $0x7c] ss:$12 sps:$4 sm:$0xff]   ;;  %v631_v52 = vld [vmem:[#allocation2 + $0x64] ss:$12 sps:$4 sm:$0xff]   ;;  %v633_v53 = vld [vmem:[#allocation2 + $0x80] ss:$12 sps:$4 sm:$0xff]  }
  0x12   :  { %50 = vadd.xlane.f32.xlu0 %v46_v6  ;;  %54 = vadd.xlane.f32.xlu1 %v48_v7  ;;  %v634_v54 = vld [vmem:[#allocation2 + $0x60] ss:$12 sps:$4 sm:$0xff]   ;;  %v637_v56 = vld [vmem:[#allocation2 + $0x68] ss:$12 sps:$4 sm:$0xff]   ;;  %v641_v59 = vld [vmem:[#allocation2 + $0x50] ss:$12 sps:$4 sm:$0xff]  }
  0x13   :  { %565 = vmatpush3.bf16.msra.mxu1 %v625_v47  ;;  %v635_v55 = vld [vmem:[#allocation2 + $0x4c] ss:$12 sps:$4 sm:$0xff]   ;;  %v638_v57 = vld [vmem:[#allocation2 + $0x48] ss:$12 sps:$4 sm:$0xff]   ;;  %v642_v60 = vld [vmem:[#allocation2 + $0x30] ss:$12 sps:$4 sm:$0xff]  }
  0x14   :  { %306 = vmatpush1.bf16.msra.mxu0 %v626_v48  ;;  %566 = vmatprep.subr.bf16.mxu1 %v629_v50  ;;  %v639_v58 = vld [vmem:[#allocation2 + $0x34] ss:$12 sps:$4 sm:$0xff]   ;;  %v643_v61 = vld [vmem:[#allocation2 + $0x1c] ss:$12 sps:$4 sm:$0xff]   ;;  %v645_v62 = vld [vmem:[#allocation2 + $0x38] ss:$12 sps:$4 sm:$0xff]  }
  0x15   :  { %307 = vmatprep.subr.bf16.mxu0 %v627_v49  ;;  %v646_v63 = vld [vmem:[#allocation2 + $0x18] ss:$12 sps:$4 sm:$0xff]   ;;  %v649_v1 = vld [vmem:[#allocation2 + $0x20] ss:$12 sps:$4 sm:$0xff]  }
  0x16   :  { %52 = vadd.xlane.f32.xlu0 %v47_v8  ;;  %56 = vadd.xlane.f32.xlu1 %v49_v9  ;;  %v647_v0 = vld [vmem:[#allocation2 + $0x4] ss:$12 sps:$4 sm:$0xff]  }
  0x17   :  { %567 = vmatpush3.bf16.msra.mxu1 %v629_v50 }
  0x18   :  { %308 = vmatpush1.bf16.msra.mxu0 %v630_v51  ;;  %568 = vmatprep.subr.bf16.mxu1 %v633_v53 }
  0x19   :  { %309 = vmatprep.subr.bf16.mxu0 %v631_v52 }
  0x1b   :  { %569 = vmatpush3.bf16.msra.mxu1 %v633_v53 }
  0x1c   :  { %310 = vmatpush1.bf16.msra.mxu0 %v634_v54  ;;  %570 = vmatprep.subr.bf16.mxu1 %v637_v56 }
  0x1d   :  { %311 = vmatprep.subr.bf16.mxu0 %v635_v55 }
  0x1f   :  { %571 = vmatpush3.bf16.msra.mxu1 %v637_v56 }
  0x20   :  { %312 = vmatpush1.bf16.msra.mxu0 %v638_v57  ;;  %572 = vmatprep.subr.bf16.mxu1 %v641_v59 }
  0x21   :  { %313 = vmatprep.subr.bf16.mxu0 %v639_v58 }
  0x23   :  { %573 = vmatpush3.bf16.msra.mxu1 %v641_v59  ;;  %v419_v59 = vlaneseq }
  0x24   :  { %314 = vmatpush1.bf16.msra.mxu0 %v642_v60  ;;  %574 = vmatprep.subr.bf16.mxu1 %v645_v62 }
  0x25   :  { %315 = vmatprep.subr.bf16.mxu0 %v643_v61  ;;  %v420_v60 = vshrl.u32 %v419_v59, 7 }
  0x27   :  { %575 = vmatpush3.bf16.msra.mxu1 %v645_v62  ;;  %v421_v61 = vsub.s32 0, %v420_v60  ;;  %v425_v62 = vsub.s32 1, %v420_v60 }
  0x28   :  { %316 = vmatpush1.bf16.msra.mxu0 %v646_v63  ;;  %576 = vmatprep.subr.bf16.mxu1 %v649_v1  ;;  %v417_v63 = vld [vmem:[%s822_s5] sm:$0x7] }
  0x29   :  { %317 = vmatprep.subr.bf16.mxu0 %v647_v0 }
  0x2b   :  { %577 = vmatpush3.bf16.msra.mxu1 %v649_v1  ;;  %v429_v1 = vsub.s32 2, %v420_v60 }
  0x9b   :  { %v51_v10 = vpop.xlane.xlu0 %50  ;;  %v55_v11 = vpop.xlane.xlu1 %54 }
  0x9c   :  { %v59_v12 = vmul.f32 0.0078125, %v51_v10  ;;  %v61_v13 = vmul.f32 0.0078125, %v55_v11 }
  0x9e   :  { %v63_v14 = vadd.f32 1e-06, %v59_v12  ;;  %v65_v15 = vadd.f32 1e-06, %v61_v13 }
  0x9f   :  { %v53_v16 = vpop.xlane.xlu0 %52  ;;  %v57_v17 = vpop.xlane.xlu1 %56 }
  0xa0   :  { %652 = vrsqrt.f32 %v63_v14  ;;  %v60_v18 = vmul.f32 0.0078125, %v53_v16  ;;  %v62_v19 = vmul.f32 0.0078125, %v57_v17 }
  0xa1   :  { %654 = vrsqrt.f32 %v65_v15 }
  0xa2   :  { %v64_v20 = vadd.f32 1e-06, %v60_v18  ;;  %v66_v21 = vadd.f32 1e-06, %v62_v19 }
  0xa4   :  { %656 = vrsqrt.f32 %v64_v20 }
  0xa5   :  { %658 = vrsqrt.f32 %v66_v21 }
  0xad   :  { %v653_v22 = vpop.eup %652 }
  0xae   :  { %v655_v24 = vpop.eup %654  ;;  %v71_v25 = vmul.f32 %v653_v22, %v547_v2  ;;  %v693_v2 = vmov 0  }
  0xaf   :  { %v73_v27 = vmul.f32 %v655_v24, %v551_v3  ;;  %335 = vmatprep.mubr.bf16.mxu0 %v693_v2  ;;  %v650_v3 = vld [vmem:[#allocation2] ss:$12 sps:$4 sm:$0xff]  }
  0xb0   :  { %v82_v28 = vmul.f32 %v499_v23, %v71_v25  ;;  %318 = vmatpush1.bf16.msra.mxu0 %v650_v3 }
  0xb1   :  { %v657_v29 = vpop.eup %656  ;;  %v84_v30 = vmul.f32 %v499_v23, %v73_v27 }
  0xb2   :  { %v659_v31 = vpop.eup %658  ;;  %v744_v32 = vadd.f32 %v500_v26, %v82_v28  ;;  %v72_v33 = vmul.f32 %v657_v29, %v548_v4  ;;  %v651_v4 = vld [vmem:[#allocation2 + $0x8] ss:$12 sps:$4 sm:$0xff]  }
  0xb3   :  { %v746_v34 = vadd.f32 %v500_v26, %v84_v30  ;;  %v74_v35 = vmul.f32 %v659_v31, %v552_v5  ;;  %578 = vmatprep.subr.bf16.mxu1 %v651_v4 }
  0xb4   :  { %v97_v36 = vand.u32 2147483647, %v744_v32  ;;  %v83_v37 = vmul.f32 %v499_v23, %v72_v33  ;;  %579 = vmatpush3.bf16.msra.mxu1 %v651_v4 }
  0xb5   :  { %v85_v38 = vmul.f32 %v499_v23, %v74_v35  ;;  %v99_v39 = vand.u32 2147483647, %v746_v34 }
  0xb6   :  { %101 = vmax.xlane.f32.xlu0 %v97_v36  ;;  %v750_v40 = vadd.f32 %v500_v26, %v83_v37 }
  0xb7   :  { %v752_v41 = vadd.f32 %v500_v26, %v85_v38 }
  0xb8   :  { %v98_v42 = vand.u32 2147483647, %v750_v40 }
  0xb9   :  { %v100_v43 = vand.u32 2147483647, %v752_v41 }
  0xba   :  { %105 = vmax.xlane.f32.xlu0 %v99_v39  ;;  %103 = vmax.xlane.f32.xlu1 %v98_v42 }
  0xbe   :  { %107 = vmax.xlane.f32.xlu1 %v100_v43 }
 0x13f   :  { %v757_v5 = vpop.xlane.xlu0 %101 }
 0x140   :  { %v109_v6 = vmax.f32 %v757_v5, 1e-08 }
 0x142   :  { %660 = vrcp.f32 %v109_v6  ;;  %v139_v0 = vmul.f32 0.007874016, %v109_v6 }
 0x143   :  { %v762_v7 = vpop.xlane.xlu1 %103  ;;  %v764_v8 = vpop.xlane.xlu0 %105 }
 0x144   :  { %v110_v9 = vmax.f32 %v762_v7, 1e-08  ;;  %v111_v10 = vmax.f32 %v764_v8, 1e-08 }
 0x146   :  { %662 = vrcp.f32 %v110_v9 }
 0x147   :  { %664 = vrcp.f32 %v111_v10  ;;  %v772_v11 = vpop.xlane.xlu1 %107 }
 0x148   :  { %v112_v12 = vmax.f32 %v772_v11, 1e-08 }
 0x14a   :  { %666 = vrcp.f32 %v112_v12 }
 0x14f   :  { %v661_v13 = vpop.eup %660 }
 0x150   :  { %v117_v14 = vmul.f32 127.0, %v661_v13  ;;  %v422_v13 = vrot.slane %v417_v63, %v421_v61 }
 0x152   :  { %v121_v15 = vmul.f32 %v117_v14, %v744_v32  ;;  %v426_v14 = vrot.slane %v417_v63, %v425_v62 }
 0x153   :  { %v663_v16 = vpop.eup %662 }
 0x154   :  { %v665_v17 = vpop.eup %664  ;;  %v118_v18 = vmul.f32 127.0, %v663_v16  ;;  %v586_v19 = vcvt.f32.s32 %v121_v15  ;;  %v589_v27 = vand.u32 2147483648, %v121_v15  ;;  %v584_v29 = vand.u32 2147483647, %v121_v15 }
 0x155   :  { %v119_v20 = vmul.f32 127.0, %v665_v17  ;;  %v141_v16 = vmul.f32 0.007874016, %v111_v10 }
 0x156   :  { %v122_v21 = vmul.f32 %v118_v18, %v750_v40  ;;  %v587_v22 = vcvt.s32.f32 %v586_v19  ;;  %vm585_vm0 = vcmp.lt.f32.partialorder %v584_v29, 8388608.0  ;;  %v430_v18 = vrot.slane %v417_v63, %v429_v1 }
 0x157   :  { %v667_v23 = vpop.eup %666  ;;  %v123_v24 = vmul.f32 %v119_v20, %v746_v34 }
 0x158   :  { %v120_v25 = vmul.f32 127.0, %v667_v23  ;;  %v588_v26 = vand.u32 2147483647, %v587_v22  ;;  %v594_v28 = vcvt.f32.s32 %v122_v21  ;;  %v592_v35 = vand.u32 2147483647, %v122_v21 }
 0x159   :  { %v602_v30 = vcvt.f32.s32 %v123_v24  ;;  %v597_v38 = vand.u32 2147483648, %v122_v21  ;;  %v600_v40 = vand.u32 2147483647, %v123_v24  ;;  %v605_v43 = vand.u32 2147483648, %v123_v24 }
 0x15a   :  { %v124_v31 = vmul.f32 %v120_v25, %v752_v41  ;;  %v590_v32 = vor.u32 %v589_v27, %v588_v26  ;;  %v595_v33 = vcvt.s32.f32 %v594_v28  ;;  %vm593_vm1 = vcmp.lt.f32.partialorder %v592_v35, 8388608.0 }
 0x15b   :  { %v603_v36 = vcvt.s32.f32 %v602_v30  ;;  %vm601_vm2 = vcmp.lt.f32.partialorder %v600_v40, 8388608.0  ;;  %v142_v25 = vmul.f32 0.007874016, %v112_v12 }
 0x15c   :  { %v596_v37 = vand.u32 2147483647, %v595_v33  ;;  %v610_v39 = vcvt.f32.s32 %v124_v31  ;;  %v591_v34 = vsel %vm585_vm0, %v590_v32, %v121_v15  ;;  %v608_v47 = vand.u32 2147483647, %v124_v31 }
 0x15d   :  { %v604_v42 = vand.u32 2147483647, %v603_v36  ;;  %v613_v41 = vand.u32 2147483648, %v124_v31  ;;  %v501_v50 = vclamps-f32 %v591_v34, 127.0  ;;  %v140_v15 = vmul.f32 0.007874016, %v110_v9 }
 0x15e   :  { %v598_v44 = vor.u32 %v597_v38, %v596_v37  ;;  %v611_v45 = vcvt.s32.f32 %v610_v39  ;;  %vm609_vm3 = vcmp.lt.f32.partialorder %v608_v47, 8388608.0 }
 0x15f   :  { %v606_v46 = vor.u32 %v605_v43, %v604_v42 }
 0x160   :  { %v599_v48 = vsel %vm593_vm1, %v598_v44, %v122_v21  ;;  %v612_v49 = vand.u32 2147483647, %v611_v45 }
 0x161   :  { %v502_v51 = vclamps-f32 %v599_v48, 127.0  ;;  %v607_v52 = vsel %vm601_vm2, %v606_v46, %v123_v24 }
 0x162   :  { %v614_v53 = vor.u32 %v613_v41, %v612_v49  ;;  %v503_v56 = vclamps-f32 %v607_v52, 127.0 }
 0x163   :  { %v137_v54 = vpack.c.bf16 %v502_v51, %v501_v50 }
 0x164   :  { %v615_v55 = vsel %vm609_vm3, %v614_v53, %v124_v31 }
 0x165   :  { %336 = vmatmul.mubr.bf16.vlgmr.msra.gmra.mxu0 %v137_v54  ;;  %580 = vmatprep.mubr.bf16.mxu1 %v137_v54  ;;  %v504_v57 = vclamps-f32 %v615_v55, 127.0 }
 0x166   :  { %345 = vmatprep.mubr.bf16.mxu0 %v693_v2 }
 0x167   :  { %v138_v58 = vpack.c.bf16 %v504_v57, %v503_v56 }
 0x169   :  { %581 = vmatmul.mubr.bf16.vlgmr.msra.gmra.mxu1 %v138_v58 }
 0x16d   :  { %346 = vmatmul.mubr.bf16.gmra.mxu0 %v138_v58 }
 0x225   :  { %v337_v3 = vpop.f32.mrf.mxu0 }
 0x226   :  { %v405_v4 = vmul.f32 %v337_v3, %v139_v0 }
 0x227   :  { %v339_v2 = vpop.f32.mrf.mxu0 }
 0x228   :  { %v406_v17 = vmul.f32 %v339_v2, %v139_v0  ;;  %v434_v21 = vadd.f32 %v422_v13, %v405_v4 }
 0x229   :  { %v341_v19 = vpop.f32.mrf.mxu0  ;;  %v582_v20 = vpop.f32.mrf.mxu1 }
 0x22a   :  { %v435_v22 = vadd.f32 %v426_v14, %v406_v17  ;;  %v408_v5 = vmul.f32 %v341_v19, %v140_v15  ;;  %v413_v6 = vmul.f32 %v582_v20, %v141_v16 }
 0x22b   :  { %v343_v23 = vpop.f32.mrf.mxu0  ;;  %v390_v24 = vpop.f32.mrf.mxu1 }
 0x22c   :  { %v537_v26 = vpack.c.bf16 %v435_v22, %v434_v21  ;;  %v442_v27 = vadd.f32 %v430_v18, %v413_v6  ;;  %v409_v7 = vmul.f32 %v343_v23, %v140_v15  ;;  %v437_v9 = vadd.f32 %v422_v13, %v408_v5 }
 0x22d   :  { %v407_v28 = vmul.f32 %v390_v24, %v139_v0  ;;  %v347_v8 = vpop.f32.mrf.mxu0  ;;  %v583_v10 = vpop.f32.mrf.mxu1 }
 0x22e   :  { %486 = vst [vmem:[%s823_s6] sm:$0xff] %v537_v26  ;;  %v542_v29 = vpack.c.bf16 %v442_v27, %v442_v27  ;;  %v438_v30 = vadd.f32 %v426_v14, %v409_v7  ;;  %v411_v31 = vmul.f32 %v347_v8, %v141_v16  ;;  %v416_v32 = vmul.f32 %v583_v10, %v142_v25 }
 0x22f   :  { %v436_v33 = vadd.f32 %v430_v18, %v407_v28  ;;  %v349_v35 = vpop.f32.mrf.mxu0  ;;  %v393_v36 = vpop.f32.mrf.mxu1 }
 0x230   :  { %491 = vst [vmem:[%s823_s6 + $0x20] sm:$0xf] %v542_v29  ;;  %v539_v11 = vpack.c.bf16 %v438_v30, %v437_v9  ;;  %v445_v12 = vadd.f32 %v430_v18, %v416_v32  ;;  %v412_v37 = vmul.f32 %v349_v35, %v141_v16  ;;  %v410_v39 = vmul.f32 %v393_v36, %v140_v15 }
 0x231   :  { %v538_v38 = vpack.c.bf16 %v436_v33, %v436_v33  ;;  %v351_v40 = vpop.f32.mrf.mxu0  ;;  %v440_v42 = vadd.f32 %v422_v13, %v411_v31 }
 0x232   :  { %488 = vst [vmem:[%s823_s6 + $0xc] sm:$0xff] %v539_v11  ;;  %v544_v43 = vpack.c.bf16 %v445_v12, %v445_v12  ;;  %v441_v34 = vadd.f32 %v426_v14, %v412_v37  ;;  %v414_v44 = vmul.f32 %v351_v40, %v142_v25  ;;  %v439_v45 = vadd.f32 %v430_v18, %v410_v39 }
 0x233   :  { %487 = vst [vmem:[%s823_s6 + $0x8] sm:$0xf] %v538_v38  ;;  %v353_v46 = vpop.f32.mrf.mxu0 }
 0x234   :  { %493 = vst [vmem:[%s823_s6 + $0x2c] sm:$0xf] %v544_v43  ;;  %v541_v47 = vpack.c.bf16 %v441_v34, %v440_v42  ;;  %v415_v48 = vmul.f32 %v353_v46, %v142_v25  ;;  %v540_v49 = vpack.c.bf16 %v439_v45, %v439_v45  ;;  %v443_v41 = vadd.f32 %v422_v13, %v414_v44 }
 0x236   :  { %490 = vst [vmem:[%s823_s6 + $0x18] sm:$0xff] %v541_v47  ;;  %v444_v50 = vadd.f32 %v426_v14, %v415_v48  ;;  %489 = vst [vmem:[%s823_s6 + $0x14] sm:$0xf] %v540_v49 }
 0x238   :  { %v543_v51 = vpack.c.bf16 %v444_v50, %v443_v41 }
 0x23a   :  { %492 = vst [vmem:[%s823_s6 + $0x24] sm:$0xff] %v543_v51 }
 0x23b   :  { %498 = vsyncpa [#allocation3], 1 }

// kernel: encoder_forward.13
= control target key start
LH: loop header
LB: loop body
LE: loop exit
PB: predicated region body
PF: predicated region fallthrough
CT: control target
= control target key end

     0   :  { %v466_v59 = vmov 0   ;;  %s621_s0 = inlined_call_operand.vmem [shape: bf16[32,128], index: 0, kind: input, shape index: {}]   ;;  %s622_s4 = inlined_call_operand.vmem [shape: f32[1,256], index: 4, kind: input, shape index: {}]   ;;  %s623_s1 = inlined_call_operand.vmem [shape: f32[1,128], index: 1, kind: input, shape index: {}]   ;;  %s624_s2 = inlined_call_operand.vmem [shape: f32[1,128], index: 2, kind: input, shape index: {}]   ;;  %s625_s3 = inlined_call_operand.vmem [shape: bf16[128,256], index: 3, kind: input, shape index: {}]   ;;  %s626_s5 = inlined_call_operand.vmem [shape: f32[1,256], index: 5, kind: input, shape index: {}]   ;;  %s627_s6 = inlined_call_operand.vmem [shape: bf16[32,256], index: 6, kind: output, shape index: {}]  }
   0x1   :  { %v369_v0 = vld [vmem:[%s621_s0] sm:$0xff]   ;;  %v376_v1 = vld [vmem:[%s621_s0 + $0x8] sm:$0xff]   ;;  %v426_v44 = vld [vmem:[%s625_s3 + $0x74] ss:$8 sps:$4 sm:$0xff]   ;;  %257 = vmatprep.mubr.bf16.mxu0 %v466_v59  ;;  %267 = vmatprep.mubr.bf16.mxu1 %v466_v59 }
   0x2   :  { %v370_v2 = vunpack.c.l.bf16 %v369_v0  ;;  %v374_v3 = vunpack.c.l.bf16 %v376_v1  ;;  %v371_v4 = vunpack.c.h.bf16 %v369_v0  ;;  %v375_v5 = vunpack.c.h.bf16 %v376_v1  ;;  %v338_v23 = vld [vmem:[%s623_s1] ss:$0 sm:$0xff]  ;;  %v428_v45 = vld [vmem:[%s625_s3 + $0x70] ss:$8 sps:$4 sm:$0xff]   ;;  %225 = vmatprep.subr.bf16.mxu0 %v426_v44  ;;  %377 = vmatprep.subr.bf16.mxu1 %v426_v44  ;;  %v429_v46 = vld [vmem:[%s625_s3 + $0x64] ss:$8 sps:$4 sm:$0xff]  }
   0x3   :  { %v339_v26 = vld [vmem:[%s624_s2] ss:$0 sm:$0xff]  ;;  %226 = vmatpush1.bf16.msra.mxu0 %v428_v45  ;;  %385 = vmatpush1.bf16.msra.mxu1 %v428_v45  ;;  %v432_v48 = vld [vmem:[%s625_s3 + $0x54] ss:$8 sps:$4 sm:$0xff]   ;;  %v434_v49 = vld [vmem:[%s625_s3 + $0x50] ss:$8 sps:$4 sm:$0xff]  }
   0x4   :  { %v32_v6 = vmul.f32 %v370_v2, %v370_v2  ;;  %v34_v7 = vmul.f32 %v374_v3, %v374_v3  ;;  %v33_v8 = vmul.f32 %v371_v4, %v371_v4  ;;  %v35_v9 = vmul.f32 %v375_v5, %v375_v5  ;;  %v431_v47 = vld [vmem:[%s625_s3 + $0x60] ss:$8 sps:$4 sm:$0xff]   ;;  %227 = vmatprep.subr.bf16.mxu0 %v429_v46  ;;  %v435_v50 = vld [vmem:[%s625_s3 + $0x44] ss:$8 sps:$4 sm:$0xff]   ;;  %v438_v52 = vld [vmem:[%s625_s3 + $0x34] ss:$8 sps:$4 sm:$0xff]  }
   0x5   :  { %378 = vmatprep.subr.bf16.mxu1 %v429_v46  ;;  %v437_v51 = vld [vmem:[%s625_s3 + $0x40] ss:$8 sps:$4 sm:$0xff]   ;;  %v440_v53 = vld [vmem:[%s625_s3 + $0x30] ss:$8 sps:$4 sm:$0xff]   ;;  %v441_v54 = vld [vmem:[%s625_s3 + $0x24] ss:$8 sps:$4 sm:$0xff]  }
   0x6   :  { %36 = vadd.xlane.f32.xlu0 %v32_v6  ;;  %40 = vadd.xlane.f32.xlu1 %v34_v7  ;;  %v443_v55 = vld [vmem:[%s625_s3 + $0x20] ss:$8 sps:$4 sm:$0xff]   ;;  %v444_v56 = vld [vmem:[%s625_s3 + $0x14] ss:$8 sps:$4 sm:$0xff]   ;;  %v446_v57 = vld [vmem:[%s625_s3 + $0x10] ss:$8 sps:$4 sm:$0xff]  }
   0x7   :  { %228 = vmatpush1.bf16.msra.mxu0 %v431_v47  ;;  %386 = vmatpush1.bf16.msra.mxu1 %v431_v47  ;;  %v447_v58 = vld [vmem:[%s625_s3 + $0x4] ss:$8 sps:$4 sm:$0xff]   ;;  %v449_v60 = vld [vmem:[%s625_s3] ss:$8 sps:$4 sm:$0xff]  }
   0x8   :  { %229 = vmatprep.subr.bf16.mxu0 %v432_v48  ;;  %379 = vmatprep.subr.bf16.mxu1 %v432_v48 }
   0xa   :  { %38 = vadd.xlane.f32.xlu0 %v33_v8  ;;  %42 = vadd.xlane.f32.xlu1 %v35_v9 }
   0xb   :  { %230 = vmatpush1.bf16.msra.mxu0 %v434_v49  ;;  %387 = vmatpush1.bf16.msra.mxu1 %v434_v49 }
   0xc   :  { %231 = vmatprep.subr.bf16.mxu0 %v435_v50  ;;  %380 = vmatprep.subr.bf16.mxu1 %v435_v50 }
   0xf   :  { %232 = vmatpush1.bf16.msra.mxu0 %v437_v51  ;;  %388 = vmatpush1.bf16.msra.mxu1 %v437_v51  ;;  %v288_v51 = vlaneseq }
  0x10   :  { %233 = vmatprep.subr.bf16.mxu0 %v438_v52  ;;  %381 = vmatprep.subr.bf16.mxu1 %v438_v52 }
  0x11   :  { %v289_v52 = vshrl.u32 %v288_v51, 7 }
  0x13   :  { %234 = vmatpush1.bf16.msra.mxu0 %v440_v53  ;;  %389 = vmatpush1.bf16.msra.mxu1 %v440_v53  ;;  %v290_v53 = vsub.s32 0, %v289_v52 }
  0x14   :  { %235 = vmatprep.subr.bf16.mxu0 %v441_v54  ;;  %382 = vmatprep.subr.bf16.mxu1 %v441_v54  ;;  %v294_v54 = vsub.s32 1, %v289_v52 }
  0x17   :  { %236 = vmatpush1.bf16.msra.mxu0 %v443_v55  ;;  %390 = vmatpush1.bf16.msra.mxu1 %v443_v55  ;;  %v286_v55 = vld [vmem:[%s626_s5] sm:$0x3] }
  0x18   :  { %237 = vmatprep.subr.bf16.mxu0 %v444_v56  ;;  %383 = vmatprep.subr.bf16.mxu1 %v444_v56  ;;  %v291_v59 = vrot.slane %v286_v55, %v290_v53 }
  0x1b   :  { %238 = vmatpush1.bf16.msra.mxu0 %v446_v57  ;;  %391 = vmatpush1.bf16.msra.mxu1 %v446_v57 }
  0x1c   :  { %239 = vmatprep.subr.bf16.mxu0 %v447_v58  ;;  %384 = vmatprep.subr.bf16.mxu1 %v447_v58 }
  0x1f   :  { %240 = vmatpush1.bf16.msra.mxu0 %v449_v60  ;;  %392 = vmatpush1.bf16.msra.mxu1 %v449_v60  ;;  %v295_v60 = vrot.slane %v286_v55, %v294_v54 }
  0x8f   :  { %v37_v10 = vpop.xlane.xlu0 %36  ;;  %v41_v11 = vpop.xlane.xlu1 %40 }
  0x90   :  { %v45_v12 = vmul.f32 0.0078125, %v37_v10  ;;  %v47_v13 = vmul.f32 0.0078125, %v41_v11 }
  0x92   :  { %v49_v14 = vadd.f32 1e-06, %v45_v12  ;;  %v51_v15 = vadd.f32 1e-06, %v47_v13 }
  0x93   :  { %v39_v16 = vpop.xlane.xlu0 %38  ;;  %v43_v17 = vpop.xlane.xlu1 %42 }
  0x94   :  { %450 = vrsqrt.f32 %v49_v14  ;;  %v46_v18 = vmul.f32 0.0078125, %v39_v16  ;;  %v48_v19 = vmul.f32 0.0078125, %v43_v17 }
  0x95   :  { %452 = vrsqrt.f32 %v51_v15 }
  0x96   :  { %v50_v20 = vadd.f32 1e-06, %v46_v18  ;;  %v52_v21 = vadd.f32 1e-06, %v48_v19 }
  0x98   :  { %454 = vrsqrt.f32 %v50_v20 }
  0x99   :  { %456 = vrsqrt.f32 %v52_v21 }
  0xa1   :  { %v451_v22 = vpop.eup %450 }
  0xa2   :  { %v453_v24 = vpop.eup %452  ;;  %v57_v25 = vmul.f32 %v451_v22, %v370_v2 }
  0xa3   :  { %v59_v27 = vmul.f32 %v453_v24, %v374_v3 }
  0xa4   :  { %v68_v28 = vmul.f32 %v338_v23, %v57_v25 }
  0xa5   :  { %v455_v29 = vpop.eup %454  ;;  %v70_v30 = vmul.f32 %v338_v23, %v59_v27 }
  0xa6   :  { %v457_v31 = vpop.eup %456  ;;  %v514_v32 = vadd.f32 %v339_v26, %v68_v28  ;;  %v58_v33 = vmul.f32 %v455_v29, %v371_v4 }
  0xa7   :  { %v516_v34 = vadd.f32 %v339_v26, %v70_v30  ;;  %v60_v35 = vmul.f32 %v457_v31, %v375_v5 }
  0xa8   :  { %v83_v36 = vand.u32 2147483647, %v514_v32  ;;  %v69_v37 = vmul.f32 %v338_v23, %v58_v33 }
  0xa9   :  { %v71_v38 = vmul.f32 %v338_v23, %v60_v35  ;;  %v85_v39 = vand.u32 2147483647, %v516_v34 }
  0xaa   :  { %87 = vmax.xlane.f32.xlu0 %v83_v36  ;;  %v520_v40 = vadd.f32 %v339_v26, %v69_v37 }
  0xab   :  { %v522_v41 = vadd.f32 %v339_v26, %v71_v38 }
  0xac   :  { %v84_v42 = vand.u32 2147483647, %v520_v40 }
  0xad   :  { %v86_v43 = vand.u32 2147483647, %v522_v41 }
  0xae   :  { %91 = vmax.xlane.f32.xlu0 %v85_v39  ;;  %89 = vmax.xlane.f32.xlu1 %v84_v42 }
  0xb2   :  { %93 = vmax.xlane.f32.xlu1 %v86_v43 }
 0x133   :  { %v574_v61 = vpop.xlane.xlu0 %87 }
 0x134   :  { %v95_v62 = vmax.f32 %v574_v61, 1e-08 }
 0x136   :  { %458 = vrcp.f32 %v95_v62  ;;  %v125_v56 = vmul.f32 0.007874016, %v95_v62 }
 0x137   :  { %v579_v63 = vpop.xlane.xlu1 %89  ;;  %v581_v0 = vpop.xlane.xlu0 %91 }
 0x138   :  { %v96_v1 = vmax.f32 %v579_v63, 1e-08  ;;  %v97_v2 = vmax.f32 %v581_v0, 1e-08 }
 0x13a   :  { %460 = vrcp.f32 %v96_v1 }
 0x13b   :  { %462 = vrcp.f32 %v97_v2  ;;  %v589_v3 = vpop.xlane.xlu1 %93 }
 0x13c   :  { %v98_v4 = vmax.f32 %v589_v3, 1e-08 }
 0x13e   :  { %464 = vrcp.f32 %v98_v4 }
 0x143   :  { %v459_v5 = vpop.eup %458 }
 0x144   :  { %v103_v6 = vmul.f32 127.0, %v459_v5 }
 0x146   :  { %v107_v7 = vmul.f32 %v103_v6, %v514_v32 }
 0x147   :  { %v461_v8 = vpop.eup %460 }
 0x148   :  { %v463_v9 = vpop.eup %462  ;;  %v104_v10 = vmul.f32 127.0, %v461_v8  ;;  %v395_v11 = vcvt.f32.s32 %v107_v7  ;;  %v398_v19 = vand.u32 2147483648, %v107_v7  ;;  %v393_v21 = vand.u32 2147483647, %v107_v7 }
 0x149   :  { %v105_v12 = vmul.f32 127.0, %v463_v9  ;;  %v127_v8 = vmul.f32 0.007874016, %v97_v2 }
 0x14a   :  { %v108_v13 = vmul.f32 %v104_v10, %v520_v40  ;;  %v396_v14 = vcvt.s32.f32 %v395_v11  ;;  %vm394_vm0 = vcmp.lt.f32.partialorder %v393_v21, 8388608.0 }
 0x14b   :  { %v465_v15 = vpop.eup %464  ;;  %v109_v16 = vmul.f32 %v105_v12, %v516_v34 }
 0x14c   :  { %v106_v17 = vmul.f32 127.0, %v465_v15  ;;  %v397_v18 = vand.u32 2147483647, %v396_v14  ;;  %v403_v20 = vcvt.f32.s32 %v108_v13  ;;  %v401_v26 = vand.u32 2147483647, %v108_v13 }
 0x14d   :  { %v411_v22 = vcvt.f32.s32 %v109_v16  ;;  %v406_v29 = vand.u32 2147483648, %v108_v13  ;;  %v409_v31 = vand.u32 2147483647, %v109_v16  ;;  %v414_v33 = vand.u32 2147483648, %v109_v16 }
 0x14e   :  { %v110_v23 = vmul.f32 %v106_v17, %v522_v41  ;;  %v399_v24 = vor.u32 %v398_v19, %v397_v18  ;;  %v404_v25 = vcvt.s32.f32 %v403_v20  ;;  %vm402_vm1 = vcmp.lt.f32.partialorder %v401_v26, 8388608.0 }
 0x14f   :  { %v412_v27 = vcvt.s32.f32 %v411_v22  ;;  %vm410_vm2 = vcmp.lt.f32.partialorder %v409_v31, 8388608.0  ;;  %v128_v15 = vmul.f32 0.007874016, %v98_v4 }
 0x150   :  { %v405_v28 = vand.u32 2147483647, %v404_v25  ;;  %v419_v30 = vcvt.f32.s32 %v110_v23  ;;  %v400_v34 = vsel %vm394_vm0, %v399_v24, %v107_v7  ;;  %v417_v38 = vand.u32 2147483647, %v110_v23 }
 0x151   :  { %v413_v32 = vand.u32 2147483647, %v412_v27  ;;  %v422_v41 = vand.u32 2147483648, %v110_v23  ;;  %v340_v42 = vclamps-f32 %v400_v34, 127.0  ;;  %v126_v7 = vmul.f32 0.007874016, %v96_v1 }
 0x152   :  { %v407_v35 = vor.u32 %v406_v29, %v405_v28  ;;  %v420_v36 = vcvt.s32.f32 %v419_v30  ;;  %vm418_vm3 = vcmp.lt.f32.partialorder %v417_v38, 8388608.0 }
 0x153   :  { %v415_v37 = vor.u32 %v414_v33, %v413_v32 }
 0x154   :  { %v408_v39 = vsel %vm402_vm1, %v407_v35, %v108_v13  ;;  %v421_v40 = vand.u32 2147483647, %v420_v36 }
 0x155   :  { %v341_v43 = vclamps-f32 %v408_v39, 127.0  ;;  %v416_v44 = vsel %vm410_vm2, %v415_v37, %v109_v16 }
 0x156   :  { %v423_v45 = vor.u32 %v422_v41, %v421_v40  ;;  %v342_v48 = vclamps-f32 %v416_v44, 127.0 }
 0x157   :  { %v123_v46 = vpack.c.bf16 %v341_v43, %v340_v42 }
 0x158   :  { %v424_v47 = vsel %vm418_vm3, %v423_v45, %v110_v23 }
 0x159   :  { %258 = vmatmul.mubr.bf16.vlgmr.msra.gmra.mxu0 %v123_v46  ;;  %v343_v49 = vclamps-f32 %v424_v47, 127.0 }
 0x15b   :  { %v124_v50 = vpack.c.bf16 %v343_v49, %v342_v48 }
 0x15d   :  { %268 = vmatmul.mubr.bf16.vlgmr.msra.gmra.mxu1 %v124_v50 }
 0x219   :  { %v259_v57 = vpop.f32.mrf.mxu0 }
 0x21a   :  { %v278_v58 = vmul.f32 %v259_v57, %v125_v56 }
 0x21b   :  { %v261_v5 = vpop.f32.mrf.mxu0 }
 0x21c   :  { %v279_v6 = vmul.f32 %v261_v5, %v125_v56  ;;  %v298_v11 = vadd.f32 %v291_v59, %v278_v58 }
 0x21d   :  { %v263_v9 = vpop.f32.mrf.mxu0  ;;  %v269_v10 = vpop.f32.mrf.mxu1 }
 0x21e   :  { %v299_v12 = vadd.f32 %v295_v60, %v279_v6  ;;  %v280_v13 = vmul.f32 %v263_v9, %v126_v7  ;;  %v282_v14 = vmul.f32 %v269_v10, %v127_v8 }
 0x21f   :  { %v265_v61 = vpop.f32.mrf.mxu0  ;;  %v271_v62 = vpop.f32.mrf.mxu1 }
 0x220   :  { %v364_v16 = vpack.c.bf16 %v299_v12, %v298_v11  ;;  %v281_v17 = vmul.f32 %v265_v61, %v126_v7  ;;  %v283_v18 = vmul.f32 %v271_v62, %v127_v8  ;;  %v300_v63 = vadd.f32 %v291_v59, %v280_v13 }
 0x221   :  { %v273_v19 = vpop.f32.mrf.mxu1  ;;  %v302_v2 = vadd.f32 %v291_v59, %v282_v14 }
 0x222   :  { %330 = vst [vmem:[%s627_s6] sm:$0xff] %v364_v16  ;;  %v301_v0 = vadd.f32 %v295_v60, %v281_v17  ;;  %v284_v1 = vmul.f32 %v273_v19, %v128_v15  ;;  %v303_v20 = vadd.f32 %v295_v60, %v283_v18 }
 0x223   :  { %v275_v21 = vpop.f32.mrf.mxu1 }
 0x224   :  { %v365_v22 = vpack.c.bf16 %v301_v0, %v300_v63  ;;  %v285_v23 = vmul.f32 %v275_v21, %v128_v15  ;;  %v366_v24 = vpack.c.bf16 %v303_v20, %v302_v2  ;;  %v304_v3 = vadd.f32 %v291_v59, %v284_v1 }
 0x226   :  { %331 = vst [vmem:[%s627_s6 + $0x8] sm:$0xff] %v365_v22  ;;  %v305_v4 = vadd.f32 %v295_v60, %v285_v23  ;;  %332 = vst [vmem:[%s627_s6 + $0x10] sm:$0xff] %v366_v24 }
 0x228   :  { %v367_v25 = vpack.c.bf16 %v305_v4, %v304_v3 }
 0x22a   :  { %333 = vst [vmem:[%s627_s6 + $0x18] sm:$0xff] %v367_v25 }

// kernel: encoder_forward.14
= control target key start
LH: loop header
LB: loop body
LE: loop exit
PB: predicated region body
PF: predicated region fallthrough
CT: control target
= control target key end

     0   :  { %s841_s0 = inlined_call_operand.vmem [shape: bf16[32,256], index: 0, kind: input, shape index: {}]   ;;  %s842_s2 = inlined_call_operand.vmem [shape: f32[1,128], index: 2, kind: input, shape index: {}]   ;;  %s843_s1 = inlined_call_operand.vmem [shape: bf16[256,128], index: 1, kind: input, shape index: {}]   ;;  %s844_s3 = inlined_call_operand.vmem [shape: f32[1,128], index: 3, kind: input, shape index: {}]   ;;  %s845_s4 = inlined_call_operand.vmem [shape: bf16[32,128], index: 4, kind: input, shape index: {}]   ;;  %s846_s5 = inlined_call_operand.vmem [shape: bf16[32,128], index: 5, kind: output, shape index: {}]  }
   0x1   :  { %v23_v0 = vld [vmem:[%s841_s0 + $0x10] sm:$0xff]  ;;  %v21_v1 = vld [vmem:[%s841_s0] sm:$0xff]  ;;  %v24_v2 = vld [vmem:[%s841_s0 + $0x18] sm:$0xff] }
   0x2   :  { %v29_v3 = vunpack.c.l.bf16 %v23_v0  ;;  %v30_v4 = vunpack.c.h.bf16 %v23_v0  ;;  %v25_v5 = vunpack.c.l.bf16 %v21_v1  ;;  %v26_v6 = vunpack.c.h.bf16 %v21_v1  ;;  %v22_v9 = vld [vmem:[%s841_s0 + $0x8] sm:$0xff] }
   0x3   :  { %v645_v7 = vunpack.c.l.bf16 %v24_v2  ;;  %v647_v8 = vunpack.c.h.bf16 %v24_v2  ;;  %v652_v16 = vunpack.c.l.bf16 %v22_v9  ;;  %v654_v17 = vunpack.c.h.bf16 %v22_v9 }
   0x4   :  { %v45_v10 = vmul.f32 0.044715, %v29_v3  ;;  %v46_v11 = vmul.f32 0.044715, %v30_v4  ;;  %v41_v12 = vmul.f32 0.044715, %v25_v5 }
   0x5   :  { %v42_v13 = vmul.f32 0.044715, %v26_v6  ;;  %v47_v20 = vmul.f32 0.044715, %v645_v7  ;;  %v48_v21 = vmul.f32 0.044715, %v647_v8 }
   0x6   :  { %v53_v14 = vmul.f32 %v45_v10, %v29_v3  ;;  %v54_v15 = vmul.f32 %v46_v11, %v30_v4  ;;  %v49_v18 = vmul.f32 %v41_v12, %v25_v5  ;;  %v43_v30 = vmul.f32 0.044715, %v652_v16 }
   0x7   :  { %v50_v19 = vmul.f32 %v42_v13, %v26_v6  ;;  %v55_v26 = vmul.f32 %v47_v20, %v645_v7  ;;  %v56_v27 = vmul.f32 %v48_v21, %v647_v8  ;;  %v44_v31 = vmul.f32 0.044715, %v654_v17 }
   0x8   :  { %v61_v22 = vmul.f32 %v53_v14, %v29_v3  ;;  %v62_v23 = vmul.f32 %v54_v15, %v30_v4  ;;  %v57_v24 = vmul.f32 %v49_v18, %v25_v5  ;;  %v51_v38 = vmul.f32 %v43_v30, %v652_v16 }
   0x9   :  { %v58_v25 = vmul.f32 %v50_v19, %v26_v6  ;;  %v63_v34 = vmul.f32 %v55_v26, %v645_v7  ;;  %v64_v35 = vmul.f32 %v56_v27, %v647_v8  ;;  %v52_v39 = vmul.f32 %v44_v31, %v654_v17 }
   0xa   :  { %v69_v28 = vadd.f32 %v61_v22, %v29_v3  ;;  %v70_v29 = vadd.f32 %v62_v23, %v30_v4  ;;  %v65_v32 = vadd.f32 %v57_v24, %v25_v5  ;;  %v59_v44 = vmul.f32 %v51_v38, %v652_v16  ;;  %v572_v38 = vld [vmem:[%s843_s1 + $0x60] sm:$0xff]  }
   0xb   :  { %v66_v33 = vadd.f32 %v58_v25, %v26_v6  ;;  %v71_v42 = vadd.f32 %v63_v34, %v645_v7  ;;  %v72_v43 = vadd.f32 %v64_v35, %v647_v8  ;;  %v60_v45 = vmul.f32 %v52_v39, %v654_v17  ;;  %v568_v34 = vld [vmem:[%s843_s1 + $0x70] sm:$0xff]   ;;  %v573_v39 = vld [vmem:[%s843_s1 + $0x20] sm:$0xff]  }
   0xc   :  { %v77_v36 = vmul.f32 0.7978846, %v69_v28  ;;  %v78_v37 = vmul.f32 0.7978846, %v70_v29  ;;  %v73_v40 = vmul.f32 0.7978846, %v65_v32  ;;  %v67_v48 = vadd.f32 %v59_v44, %v652_v16 }
   0xd   :  { %v74_v41 = vmul.f32 0.7978846, %v66_v33  ;;  %v79_v46 = vmul.f32 0.7978846, %v71_v42  ;;  %v80_v47 = vmul.f32 0.7978846, %v72_v43  ;;  %v68_v49 = vadd.f32 %v60_v45, %v654_v17 }
   0xe   :  { %582 = vtanh.f32 %v77_v36  ;;  %v75_v50 = vmul.f32 0.7978846, %v67_v48  ;;  %v37_v52 = vmul.f32 0.5, %v29_v3  ;;  %v38_v54 = vmul.f32 0.5, %v30_v4  ;;  %v566_v32 = vld [vmem:[%s843_s1 + $0x78] sm:$0xff]   ;;  %v569_v35 = vld [vmem:[%s843_s1 + $0x30] sm:$0xff]  }
   0xf   :  { %584 = vtanh.f32 %v78_v37  ;;  %v76_v51 = vmul.f32 0.7978846, %v68_v49  ;;  %v33_v57 = vmul.f32 0.5, %v25_v5  ;;  %v34_v60 = vmul.f32 0.5, %v26_v6  ;;  %v567_v33 = vld [vmem:[%s843_s1 + $0x38] sm:$0xff]   ;;  %458 = vmatprep.subr.bf16.mxu0 %v566_v32  ;;  %486 = vmatprep.subr.bf16.mxu1 %v566_v32  ;;  %v570_v36 = vld [vmem:[%s843_s1 + $0x68] sm:$0xff]  }
  0x10   :  { %586 = vtanh.f32 %v73_v40  ;;  %v39_v0 = vmul.f32 0.5, %v645_v7  ;;  %v40_v3 = vmul.f32 0.5, %v647_v8  ;;  %v35_v6 = vmul.f32 0.5, %v652_v16  ;;  %459 = vmatpush3.bf16.msra.mxu0 %v567_v33  ;;  %494 = vmatpush3.bf16.msra.mxu1 %v567_v33  ;;  %v571_v37 = vld [vmem:[%s843_s1 + $0x28] sm:$0xff]   ;;  %v574_v40 = vld [vmem:[%s843_s1 + $0x58] sm:$0xff]   ;;  %v576_v42 = vld [vmem:[%s843_s1 + $0x50] sm:$0xff]  }
  0x11   :  { %588 = vtanh.f32 %v74_v41  ;;  %v36_v15 = vmul.f32 0.5, %v654_v17  ;;  %460 = vmatprep.subr.bf16.mxu0 %v568_v34  ;;  %487 = vmatprep.subr.bf16.mxu1 %v568_v34  ;;  %v575_v41 = vld [vmem:[%s843_s1 + $0x18] sm:$0xff]   ;;  %v577_v43 = vld [vmem:[%s843_s1 + $0x10] sm:$0xff]   ;;  %v578_v44 = vld [vmem:[%s843_s1 + $0x48] sm:$0xff]  }
  0x12   :  { %590 = vtanh.f32 %v79_v46  ;;  %v579_v45 = vld [vmem:[%s843_s1 + $0x8] sm:$0xff]   ;;  %v580_v46 = vld [vmem:[%s843_s1 + $0x40] sm:$0xff]  }
  0x13   :  { %592 = vtanh.f32 %v80_v47  ;;  %v581_v47 = vld [vmem:[%s843_s1] sm:$0xff]  }
  0x14   :  { %594 = vtanh.f32 %v75_v50  ;;  %461 = vmatpush3.bf16.msra.mxu0 %v569_v35  ;;  %495 = vmatpush3.bf16.msra.mxu1 %v569_v35 }
  0x15   :  { %596 = vtanh.f32 %v76_v51  ;;  %462 = vmatprep.subr.bf16.mxu0 %v570_v36  ;;  %488 = vmatprep.subr.bf16.mxu1 %v570_v36 }
  0x18   :  { %463 = vmatpush3.bf16.msra.mxu0 %v571_v37  ;;  %496 = vmatpush3.bf16.msra.mxu1 %v571_v37 }
  0x19   :  { %464 = vmatprep.subr.bf16.mxu0 %v572_v38  ;;  %489 = vmatprep.subr.bf16.mxu1 %v572_v38 }
  0x1b   :  { %v583_v53 = vpop.eup %582 }
  0x1c   :  { %v585_v55 = vpop.eup %584  ;;  %v93_v56 = vadd.f32 1.0, %v583_v53  ;;  %465 = vmatpush3.bf16.msra.mxu0 %v573_v39  ;;  %497 = vmatpush3.bf16.msra.mxu1 %v573_v39 }
  0x1d   :  { %v587_v58 = vpop.eup %586  ;;  %v94_v59 = vadd.f32 1.0, %v585_v55  ;;  %466 = vmatprep.subr.bf16.mxu0 %v574_v40  ;;  %490 = vmatprep.subr.bf16.mxu1 %v574_v40 }
  0x1e   :  { %v589_v61 = vpop.eup %588  ;;  %v672_v62 = vmul.f32 %v93_v56, %v37_v52  ;;  %v89_v63 = vadd.f32 1.0, %v587_v58 }
  0x1f   :  { %v591_v1 = vpop.eup %590  ;;  %v675_v2 = vmul.f32 %v94_v59, %v38_v54  ;;  %v90_v9 = vadd.f32 1.0, %v589_v61 }
  0x20   :  { %v593_v10 = vpop.eup %592  ;;  %v109_v4 = vand.u32 2147483647, %v672_v62  ;;  %v679_v11 = vmul.f32 %v89_v63, %v33_v57  ;;  %v95_v5 = vadd.f32 1.0, %v591_v1  ;;  %467 = vmatpush3.bf16.msra.mxu0 %v575_v41  ;;  %498 = vmatpush3.bf16.msra.mxu1 %v575_v41 }
  0x21   :  { %v595_v12 = vpop.eup %594  ;;  %v110_v13 = vand.u32 2147483647, %v675_v2  ;;  %v683_v14 = vmul.f32 %v90_v9, %v34_v60  ;;  %v96_v7 = vadd.f32 1.0, %v593_v10  ;;  %468 = vmatprep.subr.bf16.mxu0 %v576_v42  ;;  %491 = vmatprep.subr.bf16.mxu1 %v576_v42 }
  0x22   :  { %v597_v18 = vpop.eup %596  ;;  %v105_v19 = vand.u32 2147483647, %v679_v11  ;;  %v687_v8 = vmul.f32 %v95_v5, %v39_v0  ;;  %v91_v20 = vadd.f32 1.0, %v595_v12 }
  0x23   :  { %v119_v21 = vmax.f32.f32 %v109_v4, %v110_v13  ;;  %v106_v22 = vand.u32 2147483647, %v683_v14  ;;  %v690_v23 = vmul.f32 %v96_v7, %v40_v3  ;;  %v92_v16 = vadd.f32 1.0, %v597_v18 }
  0x24   :  { %v111_v24 = vand.u32 2147483647, %v687_v8  ;;  %v693_v25 = vmul.f32 %v91_v20, %v35_v6  ;;  %469 = vmatpush3.bf16.msra.mxu0 %v577_v43  ;;  %499 = vmatpush3.bf16.msra.mxu1 %v577_v43 }
  0x25   :  { %120 = vmax.xlane.f32.xlu1 %v119_v21  ;;  %v113_v26 = vmax.f32.f32 %v105_v19, %v106_v22  ;;  %v112_v17 = vand.u32 2147483647, %v690_v23  ;;  %v696_v27 = vmul.f32 %v92_v16, %v36_v15  ;;  %470 = vmatprep.subr.bf16.mxu0 %v578_v44 }
  0x26   :  { %v107_v28 = vand.u32 2147483647, %v693_v25  ;;  %492 = vmatprep.subr.bf16.mxu1 %v578_v44 }
  0x27   :  { %114 = vmax.xlane.f32.xlu0 %v113_v26  ;;  %v122_v29 = vmax.f32.f32 %v111_v24, %v112_v17  ;;  %v108_v30 = vand.u32 2147483647, %v696_v27 }
  0x28   :  { %471 = vmatpush3.bf16.msra.mxu0 %v579_v45  ;;  %500 = vmatpush3.bf16.msra.mxu1 %v579_v45 }
  0x29   :  { %123 = vmax.xlane.f32.xlu1 %v122_v29  ;;  %v116_v31 = vmax.f32.f32 %v107_v28, %v108_v30  ;;  %472 = vmatprep.subr.bf16.mxu0 %v580_v46 }
  0x2a   :  { %493 = vmatprep.subr.bf16.mxu1 %v580_v46 }
  0x2b   :  { %117 = vmax.xlane.f32.xlu0 %v116_v31 }
  0x2c   :  { %473 = vmatpush3.bf16.msra.mxu0 %v581_v47  ;;  %501 = vmatpush3.bf16.msra.mxu1 %v581_v47 }
  0xae   :  { %v748_v48 = vpop.xlane.xlu1 %120 }
  0xaf   :  { %v127_v49 = vmax.f32 %v748_v48, 1e-08 }
  0xb0   :  { %v751_v50 = vpop.xlane.xlu0 %114 }
  0xb1   :  { %598 = vrcp.f32 %v127_v49  ;;  %v125_v51 = vmax.f32 %v751_v50, 1e-08  ;;  %v175_v50 = vmul.f32 0.007874016, %v127_v49 }
  0xb2   :  { %v756_v52 = vpop.xlane.xlu1 %123 }
  0xb3   :  { %600 = vrcp.f32 %v125_v51  ;;  %v128_v53 = vmax.f32 %v756_v52, 1e-08 }
  0xb4   :  { %v761_v54 = vpop.xlane.xlu0 %117 }
  0xb5   :  { %602 = vrcp.f32 %v128_v53  ;;  %v126_v55 = vmax.f32 %v761_v54, 1e-08  ;;  %v176_v54 = vmul.f32 0.007874016, %v128_v53 }
  0xb7   :  { %604 = vrcp.f32 %v126_v55 }
  0xbe   :  { %v599_v56 = vpop.eup %598 }
  0xbf   :  { %v135_v57 = vmul.f32 127.0, %v599_v56 }
  0xc0   :  { %v601_v58 = vpop.eup %600 }
  0xc1   :  { %v142_v59 = vmul.f32 %v135_v57, %v675_v2  ;;  %v133_v60 = vmul.f32 127.0, %v601_v58  ;;  %v770_v63 = vmul.f32 %v135_v57, %v672_v62 }
  0xc2   :  { %v603_v61 = vpop.eup %602 }
  0xc3   :  { %v138_v0 = vmul.f32 %v133_v60, %v683_v14  ;;  %v136_v1 = vmul.f32 127.0, %v603_v61  ;;  %v544_v3 = vcvt.f32.s32 %v142_v59  ;;  %v774_v10 = vmul.f32 %v133_v60, %v679_v11 }
  0xc4   :  { %v605_v9 = vpop.eup %604  ;;  %v542_v6 = vand.u32 2147483647, %v142_v59  ;;  %v547_v7 = vand.u32 2147483648, %v142_v59  ;;  %v536_v18 = vcvt.f32.s32 %v770_v63 }
  0xc5   :  { %v144_v4 = vmul.f32 %v136_v1, %v690_v23  ;;  %v134_v5 = vmul.f32 127.0, %v605_v9  ;;  %v510_v12 = vand.u32 2147483647, %v138_v0  ;;  %v512_v13 = vcvt.f32.s32 %v138_v0 }
  0xc6   :  { %v545_v2 = vcvt.s32.f32 %v544_v3  ;;  %v778_v15 = vmul.f32 %v136_v1, %v687_v8  ;;  %v515_v14 = vand.u32 2147483648, %v138_v0  ;;  %vm783_vm0 = vcmp.lt.f32.partialorder %v542_v6, 8388608.0 }
  0xc7   :  { %v140_v62 = vmul.f32 %v134_v5, %v696_v27  ;;  %v513_v19 = vcvt.s32.f32 %v512_v13  ;;  %v558_v11 = vand.u32 2147483647, %v144_v4  ;;  %v560_v21 = vcvt.f32.s32 %v144_v4 }
  0xc8   :  { %v546_v20 = vand.u32 2147483647, %v545_v2  ;;  %v139_v22 = vmul.f32 %v134_v5, %v693_v25  ;;  %vm787_vm1 = vcmp.lt.f32.partialorder %v510_v12, 8388608.0  ;;  %v563_v30 = vand.u32 2147483648, %v144_v4 }
  0xc9   :  { %v526_v23 = vand.u32 2147483647, %v140_v62  ;;  %v528_v16 = vcvt.f32.s32 %v140_v62  ;;  %v514_v26 = vand.u32 2147483647, %v513_v19  ;;  %v561_v27 = vcvt.s32.f32 %v560_v21 }
  0xca   :  { %v548_v17 = vor.u32 %v547_v7, %v546_v20  ;;  %v531_v29 = vand.u32 2147483648, %v140_v62  ;;  %v504_v31 = vcvt.f32.s32 %v774_v10  ;;  %vm794_vm2 = vcmp.lt.f32.partialorder %v558_v11, 8388608.0 }
  0xcb   :  { %v529_v28 = vcvt.s32.f32 %v528_v16  ;;  %v516_v32 = vor.u32 %v515_v14, %v514_v26  ;;  %v562_v34 = vand.u32 2147483647, %v561_v27  ;;  %vm798_vm3 = vcmp.lt.f32.partialorder %v526_v23, 8388608.0 }
  0xcc   :  { %v549_v25 = vsel %vm783_vm0, %v548_v17, %v142_v59  ;;  %v502_v37 = vand.u32 2147483647, %v774_v10  ;;  %v505_v38 = vcvt.s32.f32 %v504_v31  ;;  %v507_v41 = vand.u32 2147483648, %v774_v10 }
  0xcd   :  { %v530_v36 = vand.u32 2147483647, %v529_v28  ;;  %v517_v39 = vsel %vm787_vm1, %v516_v32, %v138_v0  ;;  %v564_v40 = vor.u32 %v563_v30, %v562_v34  ;;  %v520_v42 = vcvt.f32.s32 %v139_v22 }
  0xce   :  { %v410_v44 = vclamps-f32 %v549_v25, 127.0  ;;  %v506_v45 = vand.u32 2147483647, %v505_v38  ;;  %v518_v46 = vand.u32 2147483647, %v139_v22  ;;  %v523_v57 = vand.u32 2147483648, %v139_v22 }
  0xcf   :  { %v532_v43 = vor.u32 %v531_v29, %v530_v36  ;;  %v565_v47 = vsel %vm794_vm2, %v564_v40, %v144_v4  ;;  %v521_v56 = vcvt.s32.f32 %v520_v42  ;;  %v537_v58 = vcvt.s32.f32 %v536_v18 }
  0xd0   :  { %v406_v60 = vclamps-f32 %v517_v39, 127.0  ;;  %v412_v61 = vclamps-f32 %v565_v47, 127.0  ;;  %v508_v0 = vor.u32 %v507_v41, %v506_v45  ;;  %v552_v5 = vcvt.f32.s32 %v778_v15 }
  0xd1   :  { %v533_v59 = vsel %vm798_vm3, %v532_v43, %v140_v62  ;;  %v522_v9 = vand.u32 2147483647, %v521_v56  ;;  %v538_v3 = vand.u32 2147483647, %v537_v58  ;;  %vm503_vm4 = vcmp.lt.f32.partialorder %v502_v37, 8388608.0  ;;  %v456_v43 = vld [vmem:[%s845_s4 + $0x8] sm:$0xff]  }
  0xd2   :  { %v408_v1 = vclamps-f32 %v533_v59, 127.0  ;;  %v172_v6 = vpack.c.bf16 %v412_v61, %v410_v44  ;;  %v539_v12 = vand.u32 2147483648, %v770_v63  ;;  %v509_v4 = vsel %vm503_vm4, %v508_v0, %v774_v10 }
  0xd3   :  { %v524_v2 = vor.u32 %v523_v57, %v522_v9  ;;  %v534_v7 = vand.u32 2147483647, %v770_v63  ;;  %vm519_vm5 = vcmp.lt.f32.partialorder %v518_v46, 8388608.0  ;;  %v553_v14 = vcvt.s32.f32 %v552_v5 }
  0xd4   :  { %v170_v13 = vpack.c.bf16 %v408_v1, %v406_v60  ;;  %345 = vmatprep.mubr.bf16.mxu1 %v172_v6  ;;  %v540_v62 = vor.u32 %v539_v12, %v538_v3  ;;  %v550_v19 = vand.u32 2147483647, %v778_v15  ;;  %v405_v20 = vclamps-f32 %v509_v4, 127.0 }
  0xd5   :  { %v525_v18 = vsel %vm519_vm5, %v524_v2, %v139_v22  ;;  %v554_v21 = vand.u32 2147483647, %v553_v14  ;;  %v555_v23 = vand.u32 2147483648, %v778_v15  ;;  %vm535_vm6 = vcmp.lt.f32.partialorder %v534_v7, 8388608.0 }
  0xd6   :  { %337 = vmatprep.mubr.bf16.mxu0 %v170_v13  ;;  %v407_v11 = vclamps-f32 %v525_v18, 127.0  ;;  %v541_v10 = vsel %vm535_vm6, %v540_v62, %v770_v63  ;;  %vm551_vm7 = vcmp.lt.f32.partialorder %v550_v19, 8388608.0  ;;  %v173_v29 = vmul.f32 0.007874016, %v125_v51  ;;  %v429_v63 = vld [vmem:[%s844_s3] ss:$0 sm:$0xff] }
  0xd7   :  { %v556_v24 = vor.u32 %v555_v23, %v554_v21  ;;  %v409_v26 = vclamps-f32 %v541_v10, 127.0  ;;  %v174_v34 = vmul.f32 0.007874016, %v126_v55  ;;  %v444_v47 = vunpack.c.l.bf16 %v456_v43 }
  0xd8   :  { %v169_v16 = vpack.c.bf16 %v407_v11, %v405_v20  ;;  %v445_v57 = vunpack.c.h.bf16 %v456_v43 }
  0xd9   :  { %v557_v8 = vsel %vm551_vm7, %v556_v24, %v778_v15  ;;  %v439_v15 = vld [vmem:[%s845_s4] sm:$0xff]  }
  0xda   :  { %338 = vmatmul.mubr.bf16.vlgmr.msra.gmra.mxu0 %v169_v16  ;;  %v411_v17 = vclamps-f32 %v557_v8, 127.0  ;;  %v440_v38 = vunpack.c.l.bf16 %v439_v15  ;;  %v441_v41 = vunpack.c.h.bf16 %v439_v15 }
  0xdc   :  { %v171_v27 = vpack.c.bf16 %v411_v17, %v409_v26 }
  0xde   :  { %346 = vmatmul.mubr.bf16.vlgmr.msra.gmra.mxu1 %v171_v27 }
 0x19a   :  { %v474_v22 = vpop.f32.mrf.mxu0 }
 0x19c   :  { %v475_v28 = vpop.f32.mrf.mxu0 }
 0x19d   :  { %v476_v30 = vadd.f32 %v475_v28, %v474_v22 }
 0x19e   :  { %v477_v31 = vpop.f32.mrf.mxu0  ;;  %v480_v32 = vpop.f32.mrf.mxu1 }
 0x19f   :  { %v354_v25 = vmul.f32 %v476_v30, %v173_v29 }
 0x1a0   :  { %v478_v33 = vpop.f32.mrf.mxu0  ;;  %v481_v35 = vpop.f32.mrf.mxu1 }
 0x1a1   :  { %v479_v36 = vadd.f32 %v478_v33, %v477_v31  ;;  %v482_v51 = vadd.f32 %v481_v35, %v480_v32  ;;  %v365_v37 = vadd.f32 %v429_v63, %v354_v25 }
 0x1a2   :  { %v483_v39 = vpop.f32.mrf.mxu1 }
 0x1a3   :  { %v355_v40 = vmul.f32 %v479_v36, %v174_v34  ;;  %v356_v42 = vmul.f32 %v482_v51, %v175_v50  ;;  %v377_v46 = vadd.f32 %v440_v38, %v365_v37 }
 0x1a4   :  { %v484_v45 = vpop.f32.mrf.mxu1 }
 0x1a5   :  { %v366_v44 = vadd.f32 %v429_v63, %v355_v40  ;;  %v485_v55 = vadd.f32 %v484_v45, %v483_v39  ;;  %v367_v49 = vadd.f32 %v429_v63, %v356_v42 }
 0x1a7   :  { %v378_v48 = vadd.f32 %v441_v41, %v366_v44  ;;  %v357_v56 = vmul.f32 %v485_v55, %v176_v54  ;;  %v379_v60 = vadd.f32 %v444_v47, %v367_v49 }
 0x1a9   :  { %v449_v58 = vpack.c.bf16 %v378_v48, %v377_v46  ;;  %v368_v59 = vadd.f32 %v429_v63, %v357_v56 }
 0x1ab   :  { %450 = vst [vmem:[%s846_s5] sm:$0xff] %v449_v58   ;;  %v380_v61 = vadd.f32 %v445_v57, %v368_v59 }
 0x1ad   :  { %v454_v0 = vpack.c.bf16 %v380_v61, %v379_v60 }
 0x1af   :  { %457 = vst [vmem:[%s846_s5 + $0x8] sm:$0xff] %v454_v0  }

// kernel: encoder_forward.15
= control target key start
LH: loop header
LB: loop body
LE: loop exit
PB: predicated region body
PF: predicated region fallthrough
CT: control target
= control target key end

     0   :  { %s843_s0 = inlined_call_operand.vmem [shape: bf16[32,128], index: 0, kind: input, shape index: {}]   ;;  %s844_s4 = inlined_call_operand.vmem [shape: f32[1,384], index: 4, kind: input, shape index: {}]   ;;  %s845_s1 = inlined_call_operand.vmem [shape: f32[1,128], index: 1, kind: input, shape index: {}]   ;;  %s846_s2 = inlined_call_operand.vmem [shape: f32[1,128], index: 2, kind: input, shape index: {}]   ;;  %s847_s3 = inlined_call_operand.vmem [shape: bf16[128,384], index: 3, kind: input, shape index: {}]   ;;  %s848_s5 = inlined_call_operand.vmem [shape: f32[1,384], index: 5, kind: input, shape index: {}]   ;;  %s849_s6 = inlined_call_operand.vmem [shape: bf16[32,384], index: 6, kind: output, shape index: {}]  }
   0x1   :  { %v531_v0 = vld [vmem:[%s843_s0] sm:$0xff]   ;;  %v538_v1 = vld [vmem:[%s843_s0 + $0x8] sm:$0xff]   ;;  %v607_v47 = vld [vmem:[%s847_s3 + $0xb0] ss:$12 sps:$4 sm:$0xff]  }
   0x2   :  { %v532_v2 = vunpack.c.l.bf16 %v531_v0  ;;  %v536_v3 = vunpack.c.l.bf16 %v538_v1  ;;  %v533_v4 = vunpack.c.h.bf16 %v531_v0  ;;  %v537_v5 = vunpack.c.h.bf16 %v538_v1  ;;  %v484_v23 = vld [vmem:[%s845_s1] ss:$0 sm:$0xff]  ;;  %v602_v44 = vld [vmem:[%s847_s3 + $0xac] ss:$12 sps:$4 sm:$0xff]   ;;  %v604_v45 = vld [vmem:[%s847_s3 + $0xa8] ss:$12 sps:$4 sm:$0xff]   ;;  %549 = vmatprep.subr.bf16.mxu1 %v607_v47 }
   0x3   :  { %v485_v26 = vld [vmem:[%s846_s2] ss:$0 sm:$0xff]  ;;  %289 = vmatprep.subr.bf16.mxu0 %v602_v44  ;;  %v608_v48 = vld [vmem:[%s847_s3 + $0x90] ss:$12 sps:$4 sm:$0xff]   ;;  %550 = vmatpush3.bf16.msra.mxu1 %v607_v47  ;;  %v611_v50 = vld [vmem:[%s847_s3 + $0x98] ss:$12 sps:$4 sm:$0xff]  }
   0x4   :  { %v32_v6 = vmul.f32 %v532_v2, %v532_v2  ;;  %v34_v7 = vmul.f32 %v536_v3, %v536_v3  ;;  %v33_v8 = vmul.f32 %v533_v4, %v533_v4  ;;  %v35_v9 = vmul.f32 %v537_v5, %v537_v5  ;;  %290 = vmatpush1.bf16.msra.mxu0 %v604_v45  ;;  %v605_v46 = vld [vmem:[%s847_s3 + $0x94] ss:$12 sps:$4 sm:$0xff]   ;;  %v609_v49 = vld [vmem:[%s847_s3 + $0x7c] ss:$12 sps:$4 sm:$0xff]   ;;  %v612_v51 = vld [vmem:[%s847_s3 + $0x78] ss:$12 sps:$4 sm:$0xff]  }
   0x5   :  { %291 = vmatprep.subr.bf16.mxu0 %v605_v46  ;;  %551 = vmatprep.subr.bf16.mxu1 %v611_v50  ;;  %v613_v52 = vld [vmem:[%s847_s3 + $0x64] ss:$12 sps:$4 sm:$0xff]   ;;  %v615_v53 = vld [vmem:[%s847_s3 + $0x80] ss:$12 sps:$4 sm:$0xff]   ;;  %v619_v56 = vld [vmem:[%s847_s3 + $0x68] ss:$12 sps:$4 sm:$0xff]  }
   0x6   :  { %36 = vadd.xlane.f32.xlu0 %v32_v6  ;;  %40 = vadd.xlane.f32.xlu1 %v34_v7  ;;  %v616_v54 = vld [vmem:[%s847_s3 + $0x60] ss:$12 sps:$4 sm:$0xff]   ;;  %v620_v57 = vld [vmem:[%s847_s3 + $0x48] ss:$12 sps:$4 sm:$0xff]   ;;  %v623_v59 = vld [vmem:[%s847_s3 + $0x50] ss:$12 sps:$4 sm:$0xff]  }
   0x7   :  { %552 = vmatpush3.bf16.msra.mxu1 %v611_v50  ;;  %v617_v55 = vld [vmem:[%s847_s3 + $0x4c] ss:$12 sps:$4 sm:$0xff]   ;;  %v621_v58 = vld [vmem:[%s847_s3 + $0x34] ss:$12 sps:$4 sm:$0xff]   ;;  %v624_v60 = vld [vmem:[%s847_s3 + $0x30] ss:$12 sps:$4 sm:$0xff]  }
   0x8   :  { %292 = vmatpush1.bf16.msra.mxu0 %v608_v48  ;;  %553 = vmatprep.subr.bf16.mxu1 %v615_v53  ;;  %v625_v61 = vld [vmem:[%s847_s3 + $0x1c] ss:$12 sps:$4 sm:$0xff]   ;;  %v627_v62 = vld [vmem:[%s847_s3 + $0x38] ss:$12 sps:$4 sm:$0xff]   ;;  %v631_v1 = vld [vmem:[%s847_s3 + $0x20] ss:$12 sps:$4 sm:$0xff]  }
   0x9   :  { %293 = vmatprep.subr.bf16.mxu0 %v609_v49  ;;  %v628_v63 = vld [vmem:[%s847_s3 + $0x18] ss:$12 sps:$4 sm:$0xff]  }
   0xa   :  { %38 = vadd.xlane.f32.xlu0 %v33_v8  ;;  %42 = vadd.xlane.f32.xlu1 %v35_v9  ;;  %v629_v0 = vld [vmem:[%s847_s3 + $0x4] ss:$12 sps:$4 sm:$0xff]  }
   0xb   :  { %554 = vmatpush3.bf16.msra.mxu1 %v615_v53 }
   0xc   :  { %294 = vmatpush1.bf16.msra.mxu0 %v612_v51  ;;  %555 = vmatprep.subr.bf16.mxu1 %v619_v56 }
   0xd   :  { %295 = vmatprep.subr.bf16.mxu0 %v613_v52 }
   0xf   :  { %556 = vmatpush3.bf16.msra.mxu1 %v619_v56 }
  0x10   :  { %296 = vmatpush1.bf16.msra.mxu0 %v616_v54  ;;  %557 = vmatprep.subr.bf16.mxu1 %v623_v59 }
  0x11   :  { %297 = vmatprep.subr.bf16.mxu0 %v617_v55 }
  0x13   :  { %558 = vmatpush3.bf16.msra.mxu1 %v623_v59  ;;  %v405_v59 = vlaneseq }
  0x14   :  { %298 = vmatpush1.bf16.msra.mxu0 %v620_v57  ;;  %559 = vmatprep.subr.bf16.mxu1 %v627_v62 }
  0x15   :  { %299 = vmatprep.subr.bf16.mxu0 %v621_v58 }
  0x17   :  { %560 = vmatpush3.bf16.msra.mxu1 %v627_v62 }
  0x18   :  { %300 = vmatpush1.bf16.msra.mxu0 %v624_v60  ;;  %561 = vmatprep.subr.bf16.mxu1 %v631_v1  ;;  %v406_v60 = vshrl.u32 %v405_v59, 7 }
  0x19   :  { %301 = vmatprep.subr.bf16.mxu0 %v625_v61 }
  0x1a   :  { %v407_v61 = vsub.s32 0, %v406_v60  ;;  %v411_v62 = vsub.s32 1, %v406_v60 }
  0x1b   :  { %562 = vmatpush3.bf16.msra.mxu1 %v631_v1  ;;  %v415_v1 = vsub.s32 2, %v406_v60 }
  0x1c   :  { %302 = vmatpush1.bf16.msra.mxu0 %v628_v63  ;;  %v403_v63 = vld [vmem:[%s848_s5] sm:$0x7] }
  0x1d   :  { %303 = vmatprep.subr.bf16.mxu0 %v629_v0 }
  0x8f   :  { %v37_v10 = vpop.xlane.xlu0 %36  ;;  %v41_v11 = vpop.xlane.xlu1 %40 }
  0x90   :  { %v45_v12 = vmul.f32 0.0078125, %v37_v10  ;;  %v47_v13 = vmul.f32 0.0078125, %v41_v11 }
  0x92   :  { %v49_v14 = vadd.f32 1e-06, %v45_v12  ;;  %v51_v15 = vadd.f32 1e-06, %v47_v13 }
  0x93   :  { %v39_v16 = vpop.xlane.xlu0 %38  ;;  %v43_v17 = vpop.xlane.xlu1 %42 }
  0x94   :  { %634 = vrsqrt.f32 %v49_v14  ;;  %v46_v18 = vmul.f32 0.0078125, %v39_v16  ;;  %v48_v19 = vmul.f32 0.0078125, %v43_v17 }
  0x95   :  { %636 = vrsqrt.f32 %v51_v15 }
  0x96   :  { %v50_v20 = vadd.f32 1e-06, %v46_v18  ;;  %v52_v21 = vadd.f32 1e-06, %v48_v19 }
  0x98   :  { %638 = vrsqrt.f32 %v50_v20 }
  0x99   :  { %640 = vrsqrt.f32 %v52_v21 }
  0xa1   :  { %v635_v22 = vpop.eup %634 }
  0xa2   :  { %v637_v24 = vpop.eup %636  ;;  %v57_v25 = vmul.f32 %v635_v22, %v532_v2  ;;  %v650_v2 = vmov 0  }
  0xa3   :  { %v59_v27 = vmul.f32 %v637_v24, %v536_v3  ;;  %321 = vmatprep.mubr.bf16.mxu0 %v650_v2  ;;  %v632_v3 = vld [vmem:[%s847_s3] ss:$12 sps:$4 sm:$0xff]  }
  0xa4   :  { %v68_v28 = vmul.f32 %v484_v23, %v57_v25  ;;  %304 = vmatpush1.bf16.msra.mxu0 %v632_v3 }
  0xa5   :  { %v639_v29 = vpop.eup %638  ;;  %v70_v30 = vmul.f32 %v484_v23, %v59_v27 }
  0xa6   :  { %v641_v31 = vpop.eup %640  ;;  %v698_v32 = vadd.f32 %v485_v26, %v68_v28  ;;  %v58_v33 = vmul.f32 %v639_v29, %v533_v4  ;;  %v633_v4 = vld [vmem:[%s847_s3 + $0x8] ss:$12 sps:$4 sm:$0xff]  }
  0xa7   :  { %v700_v34 = vadd.f32 %v485_v26, %v70_v30  ;;  %v60_v35 = vmul.f32 %v641_v31, %v537_v5  ;;  %563 = vmatprep.subr.bf16.mxu1 %v633_v4 }
  0xa8   :  { %v83_v36 = vand.u32 2147483647, %v698_v32  ;;  %v69_v37 = vmul.f32 %v484_v23, %v58_v33  ;;  %564 = vmatpush3.bf16.msra.mxu1 %v633_v4 }
  0xa9   :  { %v71_v38 = vmul.f32 %v484_v23, %v60_v35  ;;  %v85_v39 = vand.u32 2147483647, %v700_v34 }
  0xaa   :  { %87 = vmax.xlane.f32.xlu0 %v83_v36  ;;  %v704_v40 = vadd.f32 %v485_v26, %v69_v37 }
  0xab   :  { %v706_v41 = vadd.f32 %v485_v26, %v71_v38 }
  0xac   :  { %v84_v42 = vand.u32 2147483647, %v704_v40 }
  0xad   :  { %v86_v43 = vand.u32 2147483647, %v706_v41 }
  0xae   :  { %91 = vmax.xlane.f32.xlu0 %v85_v39  ;;  %89 = vmax.xlane.f32.xlu1 %v84_v42 }
  0xb2   :  { %93 = vmax.xlane.f32.xlu1 %v86_v43 }
 0x133   :  { %v783_v5 = vpop.xlane.xlu0 %87 }
 0x134   :  { %v95_v6 = vmax.f32 %v783_v5, 1e-08 }
 0x136   :  { %642 = vrcp.f32 %v95_v6  ;;  %v125_v0 = vmul.f32 0.007874016, %v95_v6 }
 0x137   :  { %v788_v7 = vpop.xlane.xlu1 %89  ;;  %v790_v8 = vpop.xlane.xlu0 %91 }
 0x138   :  { %v96_v9 = vmax.f32 %v788_v7, 1e-08  ;;  %v97_v10 = vmax.f32 %v790_v8, 1e-08 }
 0x13a   :  { %644 = vrcp.f32 %v96_v9 }
 0x13b   :  { %646 = vrcp.f32 %v97_v10  ;;  %v798_v11 = vpop.xlane.xlu1 %93 }
 0x13c   :  { %v98_v12 = vmax.f32 %v798_v11, 1e-08 }
 0x13e   :  { %648 = vrcp.f32 %v98_v12 }
 0x143   :  { %v643_v13 = vpop.eup %642 }
 0x144   :  { %v103_v14 = vmul.f32 127.0, %v643_v13  ;;  %v408_v13 = vrot.slane %v403_v63, %v407_v61 }
 0x146   :  { %v107_v15 = vmul.f32 %v103_v14, %v698_v32  ;;  %v412_v14 = vrot.slane %v403_v63, %v411_v62 }
 0x147   :  { %v645_v16 = vpop.eup %644 }
 0x148   :  { %v647_v17 = vpop.eup %646  ;;  %v104_v18 = vmul.f32 127.0, %v645_v16  ;;  %v571_v19 = vcvt.f32.s32 %v107_v15  ;;  %v574_v27 = vand.u32 2147483648, %v107_v15  ;;  %v569_v29 = vand.u32 2147483647, %v107_v15 }
 0x149   :  { %v105_v20 = vmul.f32 127.0, %v647_v17  ;;  %v127_v16 = vmul.f32 0.007874016, %v97_v10 }
 0x14a   :  { %v108_v21 = vmul.f32 %v104_v18, %v704_v40  ;;  %v572_v22 = vcvt.s32.f32 %v571_v19  ;;  %vm570_vm0 = vcmp.lt.f32.partialorder %v569_v29, 8388608.0  ;;  %v416_v18 = vrot.slane %v403_v63, %v415_v1 }
 0x14b   :  { %v649_v23 = vpop.eup %648  ;;  %v109_v24 = vmul.f32 %v105_v20, %v700_v34 }
 0x14c   :  { %v106_v25 = vmul.f32 127.0, %v649_v23  ;;  %v573_v26 = vand.u32 2147483647, %v572_v22  ;;  %v579_v28 = vcvt.f32.s32 %v108_v21  ;;  %v577_v35 = vand.u32 2147483647, %v108_v21 }
 0x14d   :  { %v587_v30 = vcvt.f32.s32 %v109_v24  ;;  %v582_v38 = vand.u32 2147483648, %v108_v21  ;;  %v585_v40 = vand.u32 2147483647, %v109_v24  ;;  %v590_v43 = vand.u32 2147483648, %v109_v24 }
 0x14e   :  { %v110_v31 = vmul.f32 %v106_v25, %v706_v41  ;;  %v575_v32 = vor.u32 %v574_v27, %v573_v26  ;;  %v580_v33 = vcvt.s32.f32 %v579_v28  ;;  %vm578_vm1 = vcmp.lt.f32.partialorder %v577_v35, 8388608.0 }
 0x14f   :  { %v588_v36 = vcvt.s32.f32 %v587_v30  ;;  %vm586_vm2 = vcmp.lt.f32.partialorder %v585_v40, 8388608.0  ;;  %v128_v25 = vmul.f32 0.007874016, %v98_v12 }
 0x150   :  { %v581_v37 = vand.u32 2147483647, %v580_v33  ;;  %v595_v39 = vcvt.f32.s32 %v110_v31  ;;  %v576_v34 = vsel %vm570_vm0, %v575_v32, %v107_v15  ;;  %v593_v47 = vand.u32 2147483647, %v110_v31 }
 0x151   :  { %v589_v42 = vand.u32 2147483647, %v588_v36  ;;  %v598_v41 = vand.u32 2147483648, %v110_v31  ;;  %v486_v50 = vclamps-f32 %v576_v34, 127.0  ;;  %v126_v15 = vmul.f32 0.007874016, %v96_v9 }
 0x152   :  { %v583_v44 = vor.u32 %v582_v38, %v581_v37  ;;  %v596_v45 = vcvt.s32.f32 %v595_v39  ;;  %vm594_vm3 = vcmp.lt.f32.partialorder %v593_v47, 8388608.0 }
 0x153   :  { %v591_v46 = vor.u32 %v590_v43, %v589_v42 }
 0x154   :  { %v584_v48 = vsel %vm578_vm1, %v583_v44, %v108_v21  ;;  %v597_v49 = vand.u32 2147483647, %v596_v45 }
 0x155   :  { %v487_v51 = vclamps-f32 %v584_v48, 127.0  ;;  %v592_v52 = vsel %vm586_vm2, %v591_v46, %v109_v24 }
 0x156   :  { %v599_v53 = vor.u32 %v598_v41, %v597_v49  ;;  %v488_v56 = vclamps-f32 %v592_v52, 127.0 }
 0x157   :  { %v123_v54 = vpack.c.bf16 %v487_v51, %v486_v50 }
 0x158   :  { %v600_v55 = vsel %vm594_vm3, %v599_v53, %v110_v31 }
 0x159   :  { %322 = vmatmul.mubr.bf16.vlgmr.msra.gmra.mxu0 %v123_v54  ;;  %565 = vmatprep.mubr.bf16.mxu1 %v123_v54  ;;  %v489_v57 = vclamps-f32 %v600_v55, 127.0 }
 0x15a   :  { %331 = vmatprep.mubr.bf16.mxu0 %v650_v2 }
 0x15b   :  { %v124_v58 = vpack.c.bf16 %v489_v57, %v488_v56 }
 0x15d   :  { %566 = vmatmul.mubr.bf16.vlgmr.msra.gmra.mxu1 %v124_v58 }
 0x161   :  { %332 = vmatmul.mubr.bf16.gmra.mxu0 %v124_v58 }
 0x219   :  { %v323_v3 = vpop.f32.mrf.mxu0 }
 0x21a   :  { %v391_v4 = vmul.f32 %v323_v3, %v125_v0 }
 0x21b   :  { %v325_v2 = vpop.f32.mrf.mxu0 }
 0x21c   :  { %v392_v17 = vmul.f32 %v325_v2, %v125_v0  ;;  %v420_v21 = vadd.f32 %v408_v13, %v391_v4 }
 0x21d   :  { %v327_v19 = vpop.f32.mrf.mxu0  ;;  %v567_v20 = vpop.f32.mrf.mxu1 }
 0x21e   :  { %v421_v22 = vadd.f32 %v412_v14, %v392_v17  ;;  %v394_v5 = vmul.f32 %v327_v19, %v126_v15  ;;  %v399_v6 = vmul.f32 %v567_v20, %v127_v16 }
 0x21f   :  { %v329_v23 = vpop.f32.mrf.mxu0  ;;  %v376_v24 = vpop.f32.mrf.mxu1 }
 0x220   :  { %v522_v26 = vpack.c.bf16 %v421_v22, %v420_v21  ;;  %v428_v27 = vadd.f32 %v416_v18, %v399_v6  ;;  %v395_v7 = vmul.f32 %v329_v23, %v126_v15  ;;  %v423_v9 = vadd.f32 %v408_v13, %v394_v5 }
 0x221   :  { %v393_v28 = vmul.f32 %v376_v24, %v125_v0  ;;  %v333_v8 = vpop.f32.mrf.mxu0  ;;  %v568_v10 = vpop.f32.mrf.mxu1 }
 0x222   :  { %472 = vst [vmem:[%s849_s6] sm:$0xff] %v522_v26  ;;  %v527_v29 = vpack.c.bf16 %v428_v27, %v428_v27  ;;  %v424_v30 = vadd.f32 %v412_v14, %v395_v7  ;;  %v397_v31 = vmul.f32 %v333_v8, %v127_v16  ;;  %v402_v32 = vmul.f32 %v568_v10, %v128_v25 }
 0x223   :  { %v422_v33 = vadd.f32 %v416_v18, %v393_v28  ;;  %v335_v35 = vpop.f32.mrf.mxu0  ;;  %v379_v36 = vpop.f32.mrf.mxu1 }
 0x224   :  { %477 = vst [vmem:[%s849_s6 + $0x20] sm:$0xf] %v527_v29  ;;  %v524_v11 = vpack.c.bf16 %v424_v30, %v423_v9  ;;  %v431_v12 = vadd.f32 %v416_v18, %v402_v32  ;;  %v398_v37 = vmul.f32 %v335_v35, %v127_v16  ;;  %v396_v39 = vmul.f32 %v379_v36, %v126_v15 }
 0x225   :  { %v523_v38 = vpack.c.bf16 %v422_v33, %v422_v33  ;;  %v337_v40 = vpop.f32.mrf.mxu0  ;;  %v426_v42 = vadd.f32 %v408_v13, %v397_v31 }
 0x226   :  { %474 = vst [vmem:[%s849_s6 + $0xc] sm:$0xff] %v524_v11  ;;  %v529_v43 = vpack.c.bf16 %v431_v12, %v431_v12  ;;  %v427_v34 = vadd.f32 %v412_v14, %v398_v37  ;;  %v400_v44 = vmul.f32 %v337_v40, %v128_v25  ;;  %v425_v45 = vadd.f32 %v416_v18, %v396_v39 }
 0x227   :  { %473 = vst [vmem:[%s849_s6 + $0x8] sm:$0xf] %v523_v38  ;;  %v339_v46 = vpop.f32.mrf.mxu0 }
 0x228   :  { %479 = vst [vmem:[%s849_s6 + $0x2c] sm:$0xf] %v529_v43  ;;  %v526_v47 = vpack.c.bf16 %v427_v34, %v426_v42  ;;  %v401_v48 = vmul.f32 %v339_v46, %v128_v25  ;;  %v525_v49 = vpack.c.bf16 %v425_v45, %v425_v45  ;;  %v429_v41 = vadd.f32 %v408_v13, %v400_v44 }
 0x22a   :  { %476 = vst [vmem:[%s849_s6 + $0x18] sm:$0xff] %v526_v47  ;;  %v430_v50 = vadd.f32 %v412_v14, %v401_v48  ;;  %475 = vst [vmem:[%s849_s6 + $0x14] sm:$0xf] %v525_v49 }
 0x22c   :  { %v528_v51 = vpack.c.bf16 %v430_v50, %v429_v41 }
 0x22e   :  { %478 = vst [vmem:[%s849_s6 + $0x24] sm:$0xff] %v528_v51 }

// kernel: encoder_forward.19
= control target key start
LH: loop header
LB: loop body
LE: loop exit
PB: predicated region body
PF: predicated region fallthrough
CT: control target
= control target key end

     0   :  { %s879_s0 = inlined_call_operand.vmem [shape: bf16[32,256], index: 0, kind: input, shape index: {}]   ;;  %s880_s1 = inlined_call_operand.vmem [shape: bf16[256,128], index: 1, kind: input, shape index: {}]   ;;  %s881_s2 = inlined_call_operand.vmem [shape: f32[1,128], index: 2, kind: input, shape index: {}]   ;;  %s882_s3 = inlined_call_operand.vmem [shape: f32[1,128], index: 3, kind: input, shape index: {}]   ;;  %s883_s4 = inlined_call_operand.vmem [shape: bf16[32,128], index: 4, kind: input, shape index: {}]   ;;  %s884_s5 = inlined_call_operand.hbm [shape: bf16[32,128], index: 5, kind: output, shape index: {}]  }
   0x1   :  { %v24_v0 = vld [vmem:[%s879_s0 + $0x10] sm:$0xff]  ;;  %v22_v1 = vld [vmem:[%s879_s0] sm:$0xff]  ;;  %v25_v2 = vld [vmem:[%s879_s0 + $0x18] sm:$0xff] }
   0x2   :  { %v30_v3 = vunpack.c.l.bf16 %v24_v0  ;;  %v31_v4 = vunpack.c.h.bf16 %v24_v0  ;;  %v26_v5 = vunpack.c.l.bf16 %v22_v1  ;;  %v27_v6 = vunpack.c.h.bf16 %v22_v1  ;;  %v23_v7 = vld [vmem:[%s879_s0 + $0x8] sm:$0xff] }
   0x3   :  { %v689_v8 = vunpack.c.l.bf16 %v25_v2  ;;  %v691_v9 = vunpack.c.h.bf16 %v25_v2  ;;  %v693_v16 = vunpack.c.l.bf16 %v23_v7  ;;  %v695_v17 = vunpack.c.h.bf16 %v23_v7 }
   0x4   :  { %v46_v10 = vmul.f32 0.044715, %v30_v3  ;;  %v47_v11 = vmul.f32 0.044715, %v31_v4  ;;  %v42_v12 = vmul.f32 0.044715, %v26_v5 }
   0x5   :  { %v43_v13 = vmul.f32 0.044715, %v27_v6  ;;  %v48_v20 = vmul.f32 0.044715, %v689_v8  ;;  %v49_v21 = vmul.f32 0.044715, %v691_v9 }
   0x6   :  { %v54_v14 = vmul.f32 %v46_v10, %v30_v3  ;;  %v55_v15 = vmul.f32 %v47_v11, %v31_v4  ;;  %v50_v18 = vmul.f32 %v42_v12, %v26_v5  ;;  %v44_v30 = vmul.f32 0.044715, %v693_v16 }
   0x7   :  { %v51_v19 = vmul.f32 %v43_v13, %v27_v6  ;;  %v56_v26 = vmul.f32 %v48_v20, %v689_v8  ;;  %v57_v27 = vmul.f32 %v49_v21, %v691_v9  ;;  %v45_v31 = vmul.f32 0.044715, %v695_v17 }
   0x8   :  { %v62_v22 = vmul.f32 %v54_v14, %v30_v3  ;;  %v63_v23 = vmul.f32 %v55_v15, %v31_v4  ;;  %v58_v24 = vmul.f32 %v50_v18, %v26_v5  ;;  %v52_v38 = vmul.f32 %v44_v30, %v693_v16 }
   0x9   :  { %v59_v25 = vmul.f32 %v51_v19, %v27_v6  ;;  %v64_v34 = vmul.f32 %v56_v26, %v689_v8  ;;  %v65_v35 = vmul.f32 %v57_v27, %v691_v9  ;;  %v53_v39 = vmul.f32 %v45_v31, %v695_v17 }
   0xa   :  { %v70_v28 = vadd.f32 %v62_v22, %v30_v3  ;;  %v71_v29 = vadd.f32 %v63_v23, %v31_v4  ;;  %v66_v32 = vadd.f32 %v58_v24, %v26_v5  ;;  %v60_v44 = vmul.f32 %v52_v38, %v693_v16 }
   0xb   :  { %v67_v33 = vadd.f32 %v59_v25, %v27_v6  ;;  %v72_v42 = vadd.f32 %v64_v34, %v689_v8  ;;  %v73_v43 = vadd.f32 %v65_v35, %v691_v9  ;;  %v61_v45 = vmul.f32 %v53_v39, %v695_v17 }
   0xc   :  { %v78_v36 = vmul.f32 0.7978846, %v70_v28  ;;  %v79_v37 = vmul.f32 0.7978846, %v71_v29  ;;  %v74_v40 = vmul.f32 0.7978846, %v66_v32  ;;  %v68_v48 = vadd.f32 %v60_v44, %v693_v16 }
   0xd   :  { %v75_v41 = vmul.f32 0.7978846, %v67_v33  ;;  %v80_v46 = vmul.f32 0.7978846, %v72_v42  ;;  %v81_v47 = vmul.f32 0.7978846, %v73_v43  ;;  %v69_v49 = vadd.f32 %v61_v45, %v695_v17 }
   0xe   :  { %598 = vtanh.f32 %v78_v36  ;;  %v76_v50 = vmul.f32 0.7978846, %v68_v48 }
   0xf   :  { %600 = vtanh.f32 %v79_v37  ;;  %v77_v51 = vmul.f32 0.7978846, %v69_v49 }
  0x10   :  { %602 = vtanh.f32 %v74_v40 }
  0x11   :  { %604 = vtanh.f32 %v75_v41 }
  0x12   :  { %606 = vtanh.f32 %v80_v46 }
  0x13   :  { %608 = vtanh.f32 %v81_v47 }
  0x14   :  { %10 = vsyncpa [#allocation3], 0  ;;  %610 = vtanh.f32 %v76_v50  ;;  %v38_v52 = vmul.f32 0.5, %v30_v3  ;;  %v39_v54 = vmul.f32 0.5, %v31_v4  ;;  %v34_v57 = vmul.f32 0.5, %v26_v5  ;;  %v582_v32 = vld [vmem:[%s880_s1 + $0x78] sm:$0xff]  }
  0x15   :  { %612 = vtanh.f32 %v77_v51  ;;  %v35_v60 = vmul.f32 0.5, %v27_v6  ;;  %v40_v0 = vmul.f32 0.5, %v689_v8  ;;  %v41_v3 = vmul.f32 0.5, %v691_v9  ;;  %v583_v33 = vld [vmem:[%s880_s1 + $0x38] sm:$0xff]   ;;  %471 = vmatprep.subr.bf16.mxu0 %v582_v32  ;;  %499 = vmatprep.subr.bf16.mxu1 %v582_v32  ;;  %v584_v34 = vld [vmem:[%s880_s1 + $0x70] sm:$0xff]   ;;  %v586_v36 = vld [vmem:[%s880_s1 + $0x68] sm:$0xff]  }
  0x16   :  { %v36_v6 = vmul.f32 0.5, %v693_v16  ;;  %v37_v15 = vmul.f32 0.5, %v695_v17  ;;  %472 = vmatpush3.bf16.msra.mxu0 %v583_v33  ;;  %507 = vmatpush3.bf16.msra.mxu1 %v583_v33  ;;  %v585_v35 = vld [vmem:[%s880_s1 + $0x30] sm:$0xff]   ;;  %v587_v37 = vld [vmem:[%s880_s1 + $0x28] sm:$0xff]   ;;  %v588_v38 = vld [vmem:[%s880_s1 + $0x60] sm:$0xff]   ;;  %s644_s8 = smov [#allocation2]  }
  0x17   :  { %473 = vmatprep.subr.bf16.mxu0 %v584_v34  ;;  %500 = vmatprep.subr.bf16.mxu1 %v584_v34  ;;  %v589_v39 = vld [vmem:[%s880_s1 + $0x20] sm:$0xff]   ;;  %v590_v40 = vld [vmem:[%s880_s1 + $0x58] sm:$0xff]   ;;  %v592_v42 = vld [vmem:[%s880_s1 + $0x50] sm:$0xff]   ;;  %s407_s9 = sshll.u32 %s644_s8, 4  ;;  %s408_s9 = int_to_ptr.vmem [resolvable:$true] %s407_s9 }
  0x18   :  { %v591_v41 = vld [vmem:[%s880_s1 + $0x18] sm:$0xff]   ;;  %v593_v43 = vld [vmem:[%s880_s1 + $0x10] sm:$0xff]   ;;  %v594_v44 = vld [vmem:[%s880_s1 + $0x48] sm:$0xff]   ;;  %p627_p1 = scmp.lt.s32.totalorder %s408_s9, %s408_s9 }
  0x19   :  { %v595_v45 = vld [vmem:[%s880_s1 + $0x8] sm:$0xff]   ;;  %v596_v46 = vld [vmem:[%s880_s1 + $0x40] sm:$0xff]  }
  0x1a   :  { %474 = vmatpush3.bf16.msra.mxu0 %v585_v35  ;;  %508 = vmatpush3.bf16.msra.mxu1 %v585_v35  ;;  %v597_v47 = vld [vmem:[%s880_s1] sm:$0xff]  }
  0x1b   :  { %v599_v53 = vpop.eup %598  ;;  %475 = vmatprep.subr.bf16.mxu0 %v586_v36  ;;  %501 = vmatprep.subr.bf16.mxu1 %v586_v36 }
  0x1c   :  { %v601_v55 = vpop.eup %600  ;;  %v94_v56 = vadd.f32 1.0, %v599_v53 }
  0x1d   :  { %v603_v58 = vpop.eup %602  ;;  %v95_v59 = vadd.f32 1.0, %v601_v55 }
  0x1e   :  { %v605_v61 = vpop.eup %604  ;;  %v713_v62 = vmul.f32 %v94_v56, %v38_v52  ;;  %v90_v63 = vadd.f32 1.0, %v603_v58  ;;  %476 = vmatpush3.bf16.msra.mxu0 %v587_v37  ;;  %509 = vmatpush3.bf16.msra.mxu1 %v587_v37 }
  0x1f   :  { %v607_v1 = vpop.eup %606  ;;  %v716_v2 = vmul.f32 %v95_v59, %v39_v54  ;;  %v91_v7 = vadd.f32 1.0, %v605_v61  ;;  %477 = vmatprep.subr.bf16.mxu0 %v588_v38  ;;  %502 = vmatprep.subr.bf16.mxu1 %v588_v38 }
  0x20   :  { %v609_v10 = vpop.eup %608  ;;  %v110_v4 = vand.u32 2147483647, %v713_v62  ;;  %v720_v11 = vmul.f32 %v90_v63, %v34_v57  ;;  %v96_v5 = vadd.f32 1.0, %v607_v1 }
  0x21   :  { %v611_v12 = vpop.eup %610  ;;  %v111_v13 = vand.u32 2147483647, %v716_v2  ;;  %v724_v14 = vmul.f32 %v91_v7, %v35_v60  ;;  %v97_v8 = vadd.f32 1.0, %v609_v10 }
  0x22   :  { %v613_v18 = vpop.eup %612  ;;  %v106_v19 = vand.u32 2147483647, %v720_v11  ;;  %v728_v9 = vmul.f32 %v96_v5, %v40_v0  ;;  %v92_v20 = vadd.f32 1.0, %v611_v12  ;;  %478 = vmatpush3.bf16.msra.mxu0 %v589_v39  ;;  %510 = vmatpush3.bf16.msra.mxu1 %v589_v39 }
  0x23   :  { %v120_v21 = vmax.f32.f32 %v110_v4, %v111_v13  ;;  %v107_v22 = vand.u32 2147483647, %v724_v14  ;;  %v731_v23 = vmul.f32 %v97_v8, %v41_v3  ;;  %v93_v16 = vadd.f32 1.0, %v613_v18  ;;  %479 = vmatprep.subr.bf16.mxu0 %v590_v40  ;;  %503 = vmatprep.subr.bf16.mxu1 %v590_v40 }
  0x24   :  { %v112_v24 = vand.u32 2147483647, %v728_v9  ;;  %v734_v25 = vmul.f32 %v92_v20, %v36_v6 }
  0x25   :  { %121 = vmax.xlane.f32.xlu1 %v120_v21  ;;  %v114_v26 = vmax.f32.f32 %v106_v19, %v107_v22  ;;  %v113_v17 = vand.u32 2147483647, %v731_v23  ;;  %v737_v27 = vmul.f32 %v93_v16, %v37_v15 }
  0x26   :  { %v108_v28 = vand.u32 2147483647, %v734_v25  ;;  %480 = vmatpush3.bf16.msra.mxu0 %v591_v41  ;;  %511 = vmatpush3.bf16.msra.mxu1 %v591_v41 }
  0x27   :  { %115 = vmax.xlane.f32.xlu0 %v114_v26  ;;  %v123_v29 = vmax.f32.f32 %v112_v24, %v113_v17  ;;  %v109_v30 = vand.u32 2147483647, %v737_v27  ;;  %481 = vmatprep.subr.bf16.mxu0 %v592_v42 }
  0x28   :  { %504 = vmatprep.subr.bf16.mxu1 %v592_v42 }
  0x29   :  { %124 = vmax.xlane.f32.xlu1 %v123_v29  ;;  %v117_v31 = vmax.f32.f32 %v108_v28, %v109_v30 }
  0x2a   :  { %482 = vmatpush3.bf16.msra.mxu0 %v593_v43  ;;  %512 = vmatpush3.bf16.msra.mxu1 %v593_v43 }
  0x2b   :  { %118 = vmax.xlane.f32.xlu0 %v117_v31  ;;  %483 = vmatprep.subr.bf16.mxu0 %v594_v44 }
  0x2c   :  { %505 = vmatprep.subr.bf16.mxu1 %v594_v44 }
  0x2e   :  { %484 = vmatpush3.bf16.msra.mxu0 %v595_v45  ;;  %513 = vmatpush3.bf16.msra.mxu1 %v595_v45 }
  0x2f   :  { %485 = vmatprep.subr.bf16.mxu0 %v596_v46  ;;  %506 = vmatprep.subr.bf16.mxu1 %v596_v46 }
  0x32   :  { %486 = vmatpush3.bf16.msra.mxu0 %v597_v47  ;;  %514 = vmatpush3.bf16.msra.mxu1 %v597_v47 }
  0xae   :  { %v789_v48 = vpop.xlane.xlu1 %121 }
  0xaf   :  { %v128_v49 = vmax.f32 %v789_v48, 1e-08 }
  0xb0   :  { %v792_v50 = vpop.xlane.xlu0 %115 }
  0xb1   :  { %614 = vrcp.f32 %v128_v49  ;;  %v126_v51 = vmax.f32 %v792_v50, 1e-08  ;;  %v176_v50 = vmul.f32 0.007874016, %v128_v49 }
  0xb2   :  { %v797_v52 = vpop.xlane.xlu1 %124 }
  0xb3   :  { %616 = vrcp.f32 %v126_v51  ;;  %v129_v53 = vmax.f32 %v797_v52, 1e-08 }
  0xb4   :  { %v802_v54 = vpop.xlane.xlu0 %118 }
  0xb5   :  { %618 = vrcp.f32 %v129_v53  ;;  %v127_v55 = vmax.f32 %v802_v54, 1e-08  ;;  %v177_v54 = vmul.f32 0.007874016, %v129_v53 }
  0xb7   :  { %620 = vrcp.f32 %v127_v55 }
  0xbe   :  { %v615_v56 = vpop.eup %614 }
  0xbf   :  { %v136_v57 = vmul.f32 127.0, %v615_v56 }
  0xc0   :  { %v617_v58 = vpop.eup %616 }
  0xc1   :  { %v143_v59 = vmul.f32 %v136_v57, %v716_v2  ;;  %v134_v60 = vmul.f32 127.0, %v617_v58  ;;  %v811_v63 = vmul.f32 %v136_v57, %v713_v62 }
  0xc2   :  { %v619_v61 = vpop.eup %618 }
  0xc3   :  { %v139_v0 = vmul.f32 %v134_v60, %v724_v14  ;;  %v137_v1 = vmul.f32 127.0, %v619_v61  ;;  %v557_v3 = vcvt.f32.s32 %v143_v59  ;;  %v815_v10 = vmul.f32 %v134_v60, %v720_v11 }
  0xc4   :  { %v621_v7 = vpop.eup %620  ;;  %v555_v6 = vand.u32 2147483647, %v143_v59  ;;  %v560_v8 = vand.u32 2147483648, %v143_v59  ;;  %v549_v18 = vcvt.f32.s32 %v811_v63 }
  0xc5   :  { %v145_v4 = vmul.f32 %v137_v1, %v731_v23  ;;  %v135_v5 = vmul.f32 127.0, %v621_v7  ;;  %v523_v12 = vand.u32 2147483647, %v139_v0  ;;  %v525_v13 = vcvt.f32.s32 %v139_v0 }
  0xc6   :  { %v558_v2 = vcvt.s32.f32 %v557_v3  ;;  %v819_v15 = vmul.f32 %v137_v1, %v728_v9  ;;  %v528_v14 = vand.u32 2147483648, %v139_v0  ;;  %vm824_vm0 = vcmp.lt.f32.partialorder %v555_v6, 8388608.0 }
  0xc7   :  { %v141_v62 = vmul.f32 %v135_v5, %v737_v27  ;;  %v526_v19 = vcvt.s32.f32 %v525_v13  ;;  %v571_v11 = vand.u32 2147483647, %v145_v4  ;;  %v573_v21 = vcvt.f32.s32 %v145_v4 }
  0xc8   :  { %v559_v20 = vand.u32 2147483647, %v558_v2  ;;  %v140_v22 = vmul.f32 %v135_v5, %v734_v25  ;;  %vm828_vm1 = vcmp.lt.f32.partialorder %v523_v12, 8388608.0  ;;  %v576_v30 = vand.u32 2147483648, %v145_v4 }
  0xc9   :  { %v539_v23 = vand.u32 2147483647, %v141_v62  ;;  %v541_v16 = vcvt.f32.s32 %v141_v62  ;;  %v527_v26 = vand.u32 2147483647, %v526_v19  ;;  %v574_v27 = vcvt.s32.f32 %v573_v21 }
  0xca   :  { %v561_v17 = vor.u32 %v560_v8, %v559_v20  ;;  %v544_v29 = vand.u32 2147483648, %v141_v62  ;;  %v517_v31 = vcvt.f32.s32 %v815_v10  ;;  %vm835_vm2 = vcmp.lt.f32.partialorder %v571_v11, 8388608.0 }
  0xcb   :  { %v542_v28 = vcvt.s32.f32 %v541_v16  ;;  %v529_v32 = vor.u32 %v528_v14, %v527_v26  ;;  %v575_v34 = vand.u32 2147483647, %v574_v27  ;;  %vm839_vm3 = vcmp.lt.f32.partialorder %v539_v23, 8388608.0 }
  0xcc   :  { %v562_v25 = vsel %vm824_vm0, %v561_v17, %v143_v59  ;;  %v515_v37 = vand.u32 2147483647, %v815_v10  ;;  %v518_v38 = vcvt.s32.f32 %v517_v31  ;;  %v520_v41 = vand.u32 2147483648, %v815_v10 }
  0xcd   :  { %v543_v36 = vand.u32 2147483647, %v542_v28  ;;  %v530_v39 = vsel %vm828_vm1, %v529_v32, %v139_v0  ;;  %v577_v40 = vor.u32 %v576_v30, %v575_v34  ;;  %v533_v42 = vcvt.f32.s32 %v140_v22 }
  0xce   :  { %v423_v44 = vclamps-f32 %v562_v25, 127.0  ;;  %v519_v45 = vand.u32 2147483647, %v518_v38  ;;  %v531_v46 = vand.u32 2147483647, %v140_v22  ;;  %v536_v57 = vand.u32 2147483648, %v140_v22 }
  0xcf   :  { %v545_v43 = vor.u32 %v544_v29, %v543_v36  ;;  %v578_v47 = vsel %vm835_vm2, %v577_v40, %v145_v4  ;;  %v534_v56 = vcvt.s32.f32 %v533_v42  ;;  %v550_v58 = vcvt.s32.f32 %v549_v18 }
  0xd0   :  { %v419_v60 = vclamps-f32 %v530_v39, 127.0  ;;  %v425_v61 = vclamps-f32 %v578_v47, 127.0  ;;  %v521_v0 = vor.u32 %v520_v41, %v519_v45  ;;  %v565_v5 = vcvt.f32.s32 %v819_v15 }
  0xd1   :  { %v546_v59 = vsel %vm839_vm3, %v545_v43, %v141_v62  ;;  %v535_v7 = vand.u32 2147483647, %v534_v56  ;;  %v551_v3 = vand.u32 2147483647, %v550_v58  ;;  %vm516_vm4 = vcmp.lt.f32.partialorder %v515_v37, 8388608.0  ;;  %v469_v43 = vld [vmem:[%s883_s4 + $0x8] sm:$0xff]  }
  0xd2   :  { %v421_v1 = vclamps-f32 %v546_v59, 127.0  ;;  %v173_v6 = vpack.c.bf16 %v425_v61, %v423_v44  ;;  %v552_v12 = vand.u32 2147483648, %v811_v63  ;;  %v522_v4 = vsel %vm516_vm4, %v521_v0, %v815_v10 }
  0xd3   :  { %v537_v2 = vor.u32 %v536_v57, %v535_v7  ;;  %v547_v8 = vand.u32 2147483647, %v811_v63  ;;  %vm532_vm5 = vcmp.lt.f32.partialorder %v531_v46, 8388608.0  ;;  %v566_v14 = vcvt.s32.f32 %v565_v5 }
  0xd4   :  { %v171_v13 = vpack.c.bf16 %v421_v1, %v419_v60  ;;  %346 = vmatprep.mubr.bf16.mxu1 %v173_v6  ;;  %v553_v62 = vor.u32 %v552_v12, %v551_v3  ;;  %v563_v19 = vand.u32 2147483647, %v819_v15  ;;  %v418_v20 = vclamps-f32 %v522_v4, 127.0 }
  0xd5   :  { %v538_v18 = vsel %vm532_vm5, %v537_v2, %v140_v22  ;;  %v567_v21 = vand.u32 2147483647, %v566_v14  ;;  %v568_v23 = vand.u32 2147483648, %v819_v15  ;;  %vm548_vm6 = vcmp.lt.f32.partialorder %v547_v8, 8388608.0 }
  0xd6   :  { %338 = vmatprep.mubr.bf16.mxu0 %v171_v13  ;;  %v420_v11 = vclamps-f32 %v538_v18, 127.0  ;;  %v554_v10 = vsel %vm548_vm6, %v553_v62, %v811_v63  ;;  %vm564_vm7 = vcmp.lt.f32.partialorder %v563_v19, 8388608.0  ;;  %v174_v29 = vmul.f32 0.007874016, %v126_v51  ;;  %v442_v63 = vld [vmem:[%s882_s3] ss:$0 sm:$0xff] }
  0xd7   :  { %v569_v24 = vor.u32 %v568_v23, %v567_v21  ;;  %v422_v26 = vclamps-f32 %v554_v10, 127.0  ;;  %v175_v34 = vmul.f32 0.007874016, %v127_v55  ;;  %v457_v47 = vunpack.c.l.bf16 %v469_v43 }
  0xd8   :  { %v170_v16 = vpack.c.bf16 %v420_v11, %v418_v20  ;;  %v458_v57 = vunpack.c.h.bf16 %v469_v43 }
  0xd9   :  { %v570_v9 = vsel %vm564_vm7, %v569_v24, %v819_v15  ;;  %v452_v15 = vld [vmem:[%s883_s4] sm:$0xff]   ;;  %s622_s4 = scalar_lea.vmem %s408_s9, 256 }
  0xda   :  { %339 = vmatmul.mubr.bf16.vlgmr.msra.gmra.mxu0 %v170_v16  ;;  %v424_v17 = vclamps-f32 %v570_v9, 127.0  ;;  %v453_v38 = vunpack.c.l.bf16 %v452_v15  ;;  %v454_v41 = vunpack.c.h.bf16 %v452_v15  ;;  %p623_p0 = scmp.ne.s32.totalorder %s408_s9, %s622_s4  ;;  %p628_p2 = scmp.lt.s32.totalorder %s622_s4, %s622_s4 }
  0xdc   :  { %v172_v27 = vpack.c.bf16 %v424_v17, %v422_v26  ;;  %p629_p3 = por %p628_p2, %p627_p1 }
  0xde   :  { %347 = vmatmul.mubr.bf16.vlgmr.msra.gmra.mxu1 %v172_v27  ;;  %p630_p4 = pnand %p629_p3, %p623_p0 }
 0x19a   :  { %v487_v22 = vpop.f32.mrf.mxu0 }
 0x19c   :  { %v488_v28 = vpop.f32.mrf.mxu0 }
 0x19d   :  { %v489_v30 = vadd.f32 %v488_v28, %v487_v22 }
 0x19e   :  { %v490_v31 = vpop.f32.mrf.mxu0  ;;  %v493_v32 = vpop.f32.mrf.mxu1 }
 0x19f   :  { %v355_v25 = vmul.f32 %v489_v30, %v174_v29 }
 0x1a0   :  { %v491_v33 = vpop.f32.mrf.mxu0  ;;  %v494_v35 = vpop.f32.mrf.mxu1 }
 0x1a1   :  { %v492_v36 = vadd.f32 %v491_v33, %v490_v31  ;;  %v495_v51 = vadd.f32 %v494_v35, %v493_v32  ;;  %v366_v37 = vadd.f32 %v442_v63, %v355_v25 }
 0x1a2   :  { %v496_v39 = vpop.f32.mrf.mxu1 }
 0x1a3   :  { %v356_v40 = vmul.f32 %v492_v36, %v175_v34  ;;  %v357_v42 = vmul.f32 %v495_v51, %v176_v50  ;;  %v378_v46 = vadd.f32 %v453_v38, %v366_v37 }
 0x1a4   :  { %v497_v45 = vpop.f32.mrf.mxu1 }
 0x1a5   :  { %v367_v44 = vadd.f32 %v442_v63, %v356_v40  ;;  %v498_v55 = vadd.f32 %v497_v45, %v496_v39  ;;  %v368_v49 = vadd.f32 %v442_v63, %v357_v42 }
 0x1a7   :  { %v379_v48 = vadd.f32 %v454_v41, %v367_v44  ;;  %v358_v56 = vmul.f32 %v498_v55, %v177_v54  ;;  %v380_v60 = vadd.f32 %v457_v47, %v368_v49 }
 0x1a9   :  { %v462_v58 = vpack.c.bf16 %v379_v48, %v378_v46  ;;  %v369_v59 = vadd.f32 %v442_v63, %v358_v56 }
 0x1ab   :  { %463 = vst [vmem:[#allocation2] sm:$0xff] %v462_v58   ;;  %v381_v61 = vadd.f32 %v458_v57, %v369_v59 }
 0x1ad   :  { %v467_v0 = vpack.c.bf16 %v381_v61, %v380_v60 }
 0x1af   :  { %470 = vst [vmem:[#allocation2 + $0x8] sm:$0xff] %v467_v0  }
 0x1b0   :  { %633 = shalt.err (!%p630_p4)
}
 0x1b1   :  { %s645_s10 = smov 64   ;;  %s646_s11 = smov 4  }
 0x1b2   :  { %413 = dma.vmem_to_hbm [thread:$0]  %s408_s9, 256, %s884_s5, [#allocation3], %s645_s10, %s645_s10, %s646_s11  }
 0x1b3   :  { %642 = dma.done.wait [#allocation3], 256  }
 0x1b4   :  { %643 = vsyncadd [#allocation3], 4294967040 }
 0x1b5   :  { %417 = vsyncpa [#allocation3], 1 }

</bundles_post_ra>
